<compile_context>
chip_gen: v7x
topology: tpu7x:2x2x1
jax: 0.10.0
libtpu: 0.0.40
codegen_flags: <defaults>
</compile_context>

<pallas_src>
import functools

import jax
import jax.numpy as jnp
from jax import lax
from jax.experimental import pallas as pl
from jax.experimental.pallas import tpu as pltpu

LEAK = 0.1
EPS = 1e-5          # PyTorch GroupNorm default eps


def _leaky(x):
    # LeakyReLU(0.1): for slope < 1, max(x, slope*x) is exact.
    return jnp.maximum(x, LEAK * x)


# ---------------------------------------------------------------------------
# Fused per-sample kernel
# ---------------------------------------------------------------------------
def down_fused_kernel(x_ref, wsw1_ref, bsw1_ref, w2_ref, b2_ref,
                      w3_ref, b3_ref, w4_ref, b4_ref, gamma_ref, beta_ref,
                      sel_ref, xskip_ref, xdown_ref, pad3_ref, pad4_ref,
                      *, H, W, CM, COUT):
    f32 = jnp.float32
    HW = H * W
    HD, WD = H // 2, W // 2
    HWD = HD * WD
    C0 = 8          # column offset of the image inside the padded scratch
                    # buffers (keeps the data store sublane-tile aligned)

    # Fresh zero borders every step (scratch persists across grid steps; with
    # "parallel" semantics each core must re-zero its own copy).
    pad3_ref[...] = jnp.zeros(pad3_ref.shape, pad3_ref.dtype)
    pad4_ref[...] = jnp.zeros(pad4_ref.shape, pad4_ref.dtype)

    x = x_ref[0]                                                   # (HW, Cin)

    # -- ResBlock pointwise stage: conv1 (1x1) + 1x1 skip projection fused. --
    z = jnp.dot(x, wsw1_ref[...], preferred_element_type=f32) + bsw1_ref[...]
    skip = z[:, :COUT]                                             # (HW, Cout)
    h1 = _leaky(z[:, COUT:])                                       # (HW, Cm)
    h2 = _leaky(jnp.dot(h1, w2_ref[...], preferred_element_type=f32)
                + b2_ref[...])                                     # (HW, Cm)

    # -- conv3: 3x3, pad=1, stride=1 as 9 shifted-window matmuls over a ------
    #    zero-padded image kept in VMEM scratch.
    pad3_ref[pl.ds(1, H), pl.ds(C0, W), :] = h2.reshape(H, W, CM)
    acc3 = jnp.zeros((HW, COUT), f32)
    for k in range(9):
        ky, kx = divmod(k, 3)
        win = pad3_ref[pl.ds(ky, H), pl.ds(C0 - 1 + kx, W), :]     # (H, W, Cm)
        acc3 = acc3 + jnp.dot(win.reshape(HW, CM), w3_ref[k],
                              preferred_element_type=f32)
    x_skip = skip + _leaky(acc3 + b3_ref[...])                     # (HW, Cout)
    xskip_ref[0] = x_skip

    # -- down conv: 4x4, pad=1, stride=2.  16 shifted-window matmuls on the --
    #    even output rows (free leading-dim reshape); the even-column pick is
    #    folded into one constant 0/1 selection matmul afterwards.
    pad4_ref[pl.ds(1, H), pl.ds(C0, W), :] = x_skip.reshape(H, W, COUT)
    acc4 = jnp.zeros((HD * W, COUT), f32)
    for k in range(16):
        ky, kx = divmod(k, 4)
        win = pad4_ref[pl.ds(ky, H), pl.ds(C0 - 1 + kx, W), :]     # (H, W, Cout)
        win = win.reshape(HD, 2, W, COUT)[:, 0]                    # even output rows
        acc4 = acc4 + jnp.dot(win.reshape(HD * W, COUT), w4_ref[k],
                              preferred_element_type=f32)
    y = jnp.dot(sel_ref[...], acc4, preferred_element_type=f32) + b4_ref[...]

    # -- GroupNorm(32, 32): one channel per group -> per-channel statistics --
    #    over the HWD spatial positions (two-pass, centered variance).
    mean = jnp.sum(y, axis=0, keepdims=True) * (1.0 / HWD)
    d = y - mean
    var = jnp.sum(d * d, axis=0, keepdims=True) * (1.0 / HWD)
    out = d * lax.rsqrt(var + EPS) * gamma_ref[...] + beta_ref[...]
    xdown_ref[0] = _leaky(out)                                     # (HWD, Cout)


# ---------------------------------------------------------------------------
# Wrapper: layout conversion + weight prep + pallas_call
# ---------------------------------------------------------------------------
def down_forward(x_nchw, params):
    N, Cin, H, W = x_nchw.shape
    Cm = params["w1"].shape[1]
    Cout = params["ws"].shape[1]
    assert Cin != Cout          # Res_bool branch with channel mismatch -> 1x1 skip conv
    assert Cout == 32           # GroupNorm(32, out_ch) with one channel per group
    assert H % 2 == 0 and W % 2 == 0

    HW = H * W
    HD, WD = H // 2, W // 2
    HWD = HD * WD

    # NCHW -> flattened NHWC rows
    x2 = jnp.transpose(x_nchw, (0, 2, 3, 1)).reshape(N, HW, Cin)

    # Fused [skip-proj | conv1] weights; conv3/conv4 weights as per-tap matrices.
    wsw1 = jnp.concatenate([params["ws"], params["w1"]], axis=1)   # (Cin, Cout+Cm)
    bsw1 = jnp.concatenate([params["bs"], params["b1"]], axis=1)   # (1, Cout+Cm)
    w3 = params["w3"].reshape(9, Cm, Cout)
    w4 = params["w4"].reshape(16, Cout, Cout)

    # 0/1 matrix selecting the even columns of the (HD, W) row-subsampled grid.
    p = jnp.arange(HWD)
    want = (p // WD) * W + (p % WD) * 2
    sel = (want[:, None] == jnp.arange(HD * W)[None, :]).astype(jnp.float32)

    PW = W + 16                         # padded image width (data at cols 8..8+W-1)
    kernel = functools.partial(down_fused_kernel, H=H, W=W, CM=Cm, COUT=Cout)

    xskip2, xdown2 = pl.pallas_call(
        kernel,
        out_shape=(jax.ShapeDtypeStruct((N, HW, Cout), jnp.float32),
                   jax.ShapeDtypeStruct((N, HWD, Cout), jnp.float32)),
        grid=(N,),
        in_specs=[
            pl.BlockSpec((1, HW, Cin), lambda n: (n, 0, 0)),         # x
            pl.BlockSpec((Cin, Cout + Cm), lambda n: (0, 0)),        # [ws | w1]
            pl.BlockSpec((1, Cout + Cm), lambda n: (0, 0)),          # [bs | b1]
            pl.BlockSpec((Cm, Cm), lambda n: (0, 0)),                # w2
            pl.BlockSpec((1, Cm), lambda n: (0, 0)),                 # b2
            pl.BlockSpec((9, Cm, Cout), lambda n: (0, 0, 0)),        # w3
            pl.BlockSpec((1, Cout), lambda n: (0, 0)),               # b3
            pl.BlockSpec((16, Cout, Cout), lambda n: (0, 0, 0)),     # w4
            pl.BlockSpec((1, Cout), lambda n: (0, 0)),               # b4
            pl.BlockSpec((1, Cout), lambda n: (0, 0)),               # gamma
            pl.BlockSpec((1, Cout), lambda n: (0, 0)),               # beta
            pl.BlockSpec((HWD, HD * W), lambda n: (0, 0)),           # sel
        ],
        out_specs=(
            pl.BlockSpec((1, HW, Cout), lambda n: (n, 0, 0)),        # x_skip
            pl.BlockSpec((1, HWD, Cout), lambda n: (n, 0, 0)),       # x_down
        ),
        scratch_shapes=[
            pltpu.VMEM((H + 2, PW, Cm), jnp.float32),    # zero-padded h2 image
            pltpu.VMEM((H + 3, PW, Cout), jnp.float32),  # zero-padded x_skip image
        ],
        compiler_params=pltpu.CompilerParams(
            dimension_semantics=("parallel",)),          # batch over TCs (v7x)
    )(x2, wsw1, bsw1, params["w2"], params["b2"], w3, params["b3"],
      w4, params["b4"], params["gamma"], params["beta"], sel)

    x_skip = jnp.transpose(xskip2.reshape(N, H, W, Cout), (0, 3, 1, 2))
    x_down = jnp.transpose(xdown2.reshape(N, HD, WD, Cout), (0, 3, 1, 2))
    return x_skip, x_down


# ---------------------------------------------------------------------------
# Parameters and a pure-JAX reference for validation
# ---------------------------------------------------------------------------
def make_params(key, in_ch, m_ch, out_ch):
    ks = jax.random.split(key, 10)
    f32 = jnp.float32
    return {
        # 1x1 convs stored as (Cin, Cout) matrices
        "w1": jax.random.normal(ks[0], (in_ch, m_ch), f32) * 0.1,
        "b1": jax.random.normal(ks[1], (1, m_ch), f32) * 0.1,
        "w2": jax.random.normal(ks[2], (m_ch, m_ch), f32) * 0.1,
        "b2": jax.random.normal(ks[3], (1, m_ch), f32) * 0.1,
        "ws": jax.random.normal(ks[4], (in_ch, out_ch), f32) * 0.1,
        "bs": jax.random.normal(ks[5], (1, out_ch), f32) * 0.1,
        # spatial convs stored HWIO: (kh, kw, Cin, Cout)
        "w3": jax.random.normal(ks[6], (3, 3, m_ch, out_ch), f32) * 0.1,
        "b3": jax.random.normal(ks[7], (1, out_ch), f32) * 0.1,
        "w4": jax.random.normal(ks[8], (4, 4, out_ch, out_ch), f32) * 0.1,
        "b4": jax.random.normal(ks[9], (1, out_ch), f32) * 0.1,
        # GroupNorm affine (PyTorch default init)
        "gamma": jnp.ones((1, out_ch), f32),
        "beta": jnp.zeros((1, out_ch), f32),
    }


def down_reference(x_nchw, params):
    """Pure-JAX reference (XLA convs at HIGHEST precision)."""
    hi = lax.Precision.HIGHEST

    def conv(v, w_hwio, b, stride, pad):
        w = jnp.transpose(w_hwio, (3, 2, 0, 1))                    # -> OIHW
        y = lax.conv_general_dilated(
            v, w, (stride, stride), ((pad, pad), (pad, pad)),
            dimension_numbers=("NCHW", "OIHW", "NCHW"), precision=hi)
        return y + b.reshape(1, -1, 1, 1)

    def lk(v):
        return jnp.maximum(v, LEAK * v)

    h = lk(conv(x_nchw, params["w1"][None, None], params["b1"], 1, 0))
    h = lk(conv(h, params["w2"][None, None], params["b2"], 1, 0))
    h = lk(conv(h, params["w3"], params["b3"], 1, 1))
    skip = conv(x_nchw, params["ws"][None, None], params["bs"], 1, 0)
    x_skip = skip + h

    y = conv(x_skip, params["w4"], params["b4"], 2, 1)
    # GroupNorm(32, 32): one channel per group -> per-channel stats over H, W
    mean = jnp.mean(y, axis=(2, 3), keepdims=True)
    var = jnp.mean((y - mean) ** 2, axis=(2, 3), keepdims=True)
    yn = (y - mean) * lax.rsqrt(var + EPS)
    yn = yn * params["gamma"].reshape(1, -1, 1, 1) + params["beta"].reshape(1, -1, 1, 1)
    return x_skip, lk(yn)


if __name__ == "__main__":
    N, in_ch, m_ch, out_ch = 2, 4, 8, 32
    H = W = 16

    root = jax.random.PRNGKey(0)
    k_x, k_p = jax.random.split(root)
    x = jax.random.normal(k_x, (N, in_ch, H, W), jnp.float32)
    params = make_params(k_p, in_ch, m_ch, out_ch)

    fwd = jax.jit(down_forward)
    x_skip, x_down = fwd(x, params)
    jax.block_until_ready((x_skip, x_down))

    assert x_skip.shape == (N, out_ch, H, W)
    assert x_down.shape == (N, out_ch, H // 2, W // 2)

    r_skip, r_down = down_reference(x, params)
    assert bool(jnp.allclose(x_skip, r_skip, rtol=5e-2, atol=5e-2)), "x_skip mismatch"
    assert bool(jnp.allclose(x_down, r_down, rtol=5e-2, atol=5e-2)), "x_down mismatch"

    print("KERNEL_OK")
</pallas_src>

<mosaic_0001>
module attributes {stable_mosaic.version = 11 : i64} {
  func.func @down_fused_kernel(%arg0: i32, %arg1: memref<1x256x4xf32, #tpu.memory_space<vmem>>, %arg2: memref<4x40xf32, #tpu.memory_space<vmem>>, %arg3: memref<1x40xf32, #tpu.memory_space<vmem>>, %arg4: memref<8x8xf32, #tpu.memory_space<vmem>>, %arg5: memref<1x8xf32, #tpu.memory_space<vmem>>, %arg6: memref<9x8x32xf32, #tpu.memory_space<vmem>>, %arg7: memref<1x32xf32, #tpu.memory_space<vmem>>, %arg8: memref<16x32x32xf32, #tpu.memory_space<vmem>>, %arg9: memref<1x32xf32, #tpu.memory_space<vmem>>, %arg10: memref<1x32xf32, #tpu.memory_space<vmem>>, %arg11: memref<1x32xf32, #tpu.memory_space<vmem>>, %arg12: memref<64x128xf32, #tpu.memory_space<vmem>>, %arg13: memref<1x256x32xf32, #tpu.memory_space<vmem>>, %arg14: memref<1x64x32xf32, #tpu.memory_space<vmem>>, %arg15: memref<18x32x8xf32, #tpu.memory_space<vmem>>, %arg16: memref<19x32x32xf32, #tpu.memory_space<vmem>>) attributes {dimension_semantics = [#tpu.dimension_semantics<parallel>], iteration_bounds = array<i64: 2>, scalar_prefetch = 0 : i64, scratch_operands = 2 : i64, tpu.core_type = #tpu.core_type<tc>, window_params = [{transform_indices = @transform_0, window_bounds = array<i64: 1, 256, 4>}, {pipeline_mode = #tpu.pipeline_mode<synchronous>, transform_indices = @transform_1, window_bounds = array<i64: 4, 40>}, {pipeline_mode = #tpu.pipeline_mode<synchronous>, transform_indices = @transform_2, window_bounds = array<i64: 1, 40>}, {pipeline_mode = #tpu.pipeline_mode<synchronous>, transform_indices = @transform_3, window_bounds = array<i64: 8, 8>}, {pipeline_mode = #tpu.pipeline_mode<synchronous>, transform_indices = @transform_4, window_bounds = array<i64: 1, 8>}, {pipeline_mode = #tpu.pipeline_mode<synchronous>, transform_indices = @transform_5, window_bounds = array<i64: 9, 8, 32>}, {pipeline_mode = #tpu.pipeline_mode<synchronous>, transform_indices = @transform_6, window_bounds = array<i64: 1, 32>}, {pipeline_mode = #tpu.pipeline_mode<synchronous>, transform_indices = @transform_7, window_bounds = array<i64: 16, 32, 32>}, {pipeline_mode = #tpu.pipeline_mode<synchronous>, transform_indices = @transform_8, window_bounds = array<i64: 1, 32>}, {pipeline_mode = #tpu.pipeline_mode<synchronous>, transform_indices = @transform_9, window_bounds = array<i64: 1, 32>}, {pipeline_mode = #tpu.pipeline_mode<synchronous>, transform_indices = @transform_10, window_bounds = array<i64: 1, 32>}, {pipeline_mode = #tpu.pipeline_mode<synchronous>, transform_indices = @transform_11, window_bounds = array<i64: 64, 128>}, {transform_indices = @transform_12, window_bounds = array<i64: 1, 256, 32>}, {transform_indices = @transform_13, window_bounds = array<i64: 1, 64, 32>}]} {
    %cst = arith.constant 0.000000e+00 : f32
    %0 = vector.broadcast %cst : f32 to vector<18x32x8xf32>
    %c0 = arith.constant 0 : index
    %c0_0 = arith.constant 0 : index
    %c0_1 = arith.constant 0 : index
    %1 = vector.load %arg15[%c0, %c0_0, %c0_1] : memref<18x32x8xf32, #tpu.memory_space<vmem>>, vector<18x32x8xf32>
    tpu.vector_store %arg15[%c0, %c0_0, %c0_1], %0 {strides = array<i32>} : memref<18x32x8xf32, #tpu.memory_space<vmem>>, vector<18x32x8xf32>,
    %cst_2 = arith.constant 0.000000e+00 : f32
    %2 = vector.broadcast %cst_2 : f32 to vector<19x32x32xf32>
    %c0_3 = arith.constant 0 : index
    %c0_4 = arith.constant 0 : index
    %c0_5 = arith.constant 0 : index
    %3 = vector.load %arg16[%c0_3, %c0_4, %c0_5] : memref<19x32x32xf32, #tpu.memory_space<vmem>>, vector<19x32x32xf32>
    tpu.vector_store %arg16[%c0_3, %c0_4, %c0_5], %2 {strides = array<i32>} : memref<19x32x32xf32, #tpu.memory_space<vmem>>, vector<19x32x32xf32>,
    %c0_6 = arith.constant 0 : index
    %c0_7 = arith.constant 0 : index
    %c0_8 = arith.constant 0 : index
    %4 = vector.load %arg1[%c0_6, %c0_7, %c0_8] : memref<1x256x4xf32, #tpu.memory_space<vmem>>, vector<1x256x4xf32>
    %5 = vector.shape_cast %4 : vector<1x256x4xf32> to vector<256x4xf32>
    %c0_9 = arith.constant 0 : index
    %c0_10 = arith.constant 0 : index
    %6 = vector.load %arg2[%c0_9, %c0_10] : memref<4x40xf32, #tpu.memory_space<vmem>>, vector<4x40xf32>
    %cst_11 = arith.constant dense<0.000000e+00> : vector<256x40xf32>
    %7 = tpu.matmul %5, %6, %cst_11 {dimension_numbers = #tpu.dot_dimension_numbers<[1], [0], [0], [1], [0, 0, 1, 1], [], []>} : vector<256x4xf32>, vector<4x40xf32>, vector<256x40xf32> -> vector<256x40xf32>
    %c0_12 = arith.constant 0 : index
    %c0_13 = arith.constant 0 : index
    %8 = vector.load %arg3[%c0_12, %c0_13] : memref<1x40xf32, #tpu.memory_space<vmem>>, vector<1x40xf32>
    %9 = vector.broadcast %8 : vector<1x40xf32> to vector<256x40xf32>
    %10 = arith.addf %7, %9 : vector<256x40xf32>
    %11 = vector.extract_strided_slice %10 {offsets = [0, 0], sizes = [256, 32], strides = [1, 1]} : vector<256x40xf32> to vector<256x32xf32>
    %12 = vector.extract_strided_slice %10 {offsets = [0, 32], sizes = [256, 8], strides = [1, 1]} : vector<256x40xf32> to vector<256x8xf32>
    %cst_14 = arith.constant 1.000000e-01 : f32
    %13 = vector.broadcast %cst_14 : f32 to vector<256x8xf32>
    %14 = arith.mulf %13, %12 : vector<256x8xf32>
    %15 = arith.maximumf %12, %14 : vector<256x8xf32>
    %c0_15 = arith.constant 0 : index
    %c0_16 = arith.constant 0 : index
    %16 = vector.load %arg4[%c0_15, %c0_16] : memref<8x8xf32, #tpu.memory_space<vmem>>, vector<8x8xf32>
    %cst_17 = arith.constant dense<0.000000e+00> : vector<256x8xf32>
    %17 = tpu.matmul %15, %16, %cst_17 {dimension_numbers = #tpu.dot_dimension_numbers<[1], [0], [0], [1], [0, 0, 1, 1], [], []>} : vector<256x8xf32>, vector<8x8xf32>, vector<256x8xf32> -> vector<256x8xf32>
    %c0_18 = arith.constant 0 : index
    %c0_19 = arith.constant 0 : index
    %18 = vector.load %arg5[%c0_18, %c0_19] : memref<1x8xf32, #tpu.memory_space<vmem>>, vector<1x8xf32>
    %19 = vector.broadcast %18 : vector<1x8xf32> to vector<256x8xf32>
    %20 = arith.addf %17, %19 : vector<256x8xf32>
    %cst_20 = arith.constant 1.000000e-01 : f32
    %21 = vector.broadcast %cst_20 : f32 to vector<256x8xf32>
    %22 = arith.mulf %21, %20 : vector<256x8xf32>
    %23 = arith.maximumf %20, %22 : vector<256x8xf32>
    %24 = vector.shape_cast %23 : vector<256x8xf32> to vector<16x16x8xf32>
    %c1 = arith.constant 1 : index
    %c8 = arith.constant 8 : index
    %c0_21 = arith.constant 0 : index
    %25 = vector.load %arg15[%c1, %c8, %c0_21] : memref<18x32x8xf32, #tpu.memory_space<vmem>>, vector<16x16x8xf32>
    tpu.vector_store %arg15[%c1, %c8, %c0_21], %24 {strides = array<i32>} : memref<18x32x8xf32, #tpu.memory_space<vmem>>, vector<16x16x8xf32>,
    %cst_22 = arith.constant 0.000000e+00 : f32
    %26 = vector.broadcast %cst_22 : f32 to vector<256x32xf32>
    %c0_23 = arith.constant 0 : index
    %c7 = arith.constant 7 : index
    %c0_24 = arith.constant 0 : index
    %27 = vector.load %arg15[%c0_23, %c7, %c0_24] : memref<18x32x8xf32, #tpu.memory_space<vmem>>, vector<16x16x8xf32>
    %28 = vector.shape_cast %27 : vector<16x16x8xf32> to vector<256x8xf32>
    %c0_25 = arith.constant 0 : index
    %c0_26 = arith.constant 0 : index
    %c0_27 = arith.constant 0 : index
    %29 = vector.load %arg6[%c0_25, %c0_26, %c0_27] : memref<9x8x32xf32, #tpu.memory_space<vmem>>, vector<1x8x32xf32>
    %30 = vector.shape_cast %29 : vector<1x8x32xf32> to vector<8x32xf32>
    %cst_28 = arith.constant dense<0.000000e+00> : vector<256x32xf32>
    %31 = tpu.matmul %28, %30, %cst_28 {dimension_numbers = #tpu.dot_dimension_numbers<[1], [0], [0], [1], [0, 0, 1, 1], [], []>} : vector<256x8xf32>, vector<8x32xf32>, vector<256x32xf32> -> vector<256x32xf32>
    %32 = arith.addf %26, %31 : vector<256x32xf32>
    %c0_29 = arith.constant 0 : index
    %c8_30 = arith.constant 8 : index
    %c0_31 = arith.constant 0 : index
    %33 = vector.load %arg15[%c0_29, %c8_30, %c0_31] : memref<18x32x8xf32, #tpu.memory_space<vmem>>, vector<16x16x8xf32>
    %34 = vector.shape_cast %33 : vector<16x16x8xf32> to vector<256x8xf32>
    %c1_32 = arith.constant 1 : index
    %c0_33 = arith.constant 0 : index
    %c0_34 = arith.constant 0 : index
    %35 = vector.load %arg6[%c1_32, %c0_33, %c0_34] : memref<9x8x32xf32, #tpu.memory_space<vmem>>, vector<1x8x32xf32>
    %36 = vector.shape_cast %35 : vector<1x8x32xf32> to vector<8x32xf32>
    %cst_35 = arith.constant dense<0.000000e+00> : vector<256x32xf32>
    %37 = tpu.matmul %34, %36, %cst_35 {dimension_numbers = #tpu.dot_dimension_numbers<[1], [0], [0], [1], [0, 0, 1, 1], [], []>} : vector<256x8xf32>, vector<8x32xf32>, vector<256x32xf32> -> vector<256x32xf32>
    %38 = arith.addf %32, %37 : vector<256x32xf32>
    %c0_36 = arith.constant 0 : index
    %c9 = arith.constant 9 : index
    %c0_37 = arith.constant 0 : index
    %39 = vector.load %arg15[%c0_36, %c9, %c0_37] : memref<18x32x8xf32, #tpu.memory_space<vmem>>, vector<16x16x8xf32>
    %40 = vector.shape_cast %39 : vector<16x16x8xf32> to vector<256x8xf32>
    %c2 = arith.constant 2 : index
    %c0_38 = arith.constant 0 : index
    %c0_39 = arith.constant 0 : index
    %41 = vector.load %arg6[%c2, %c0_38, %c0_39] : memref<9x8x32xf32, #tpu.memory_space<vmem>>, vector<1x8x32xf32>
    %42 = vector.shape_cast %41 : vector<1x8x32xf32> to vector<8x32xf32>
    %cst_40 = arith.constant dense<0.000000e+00> : vector<256x32xf32>
    %43 = tpu.matmul %40, %42, %cst_40 {dimension_numbers = #tpu.dot_dimension_numbers<[1], [0], [0], [1], [0, 0, 1, 1], [], []>} : vector<256x8xf32>, vector<8x32xf32>, vector<256x32xf32> -> vector<256x32xf32>
    %44 = arith.addf %38, %43 : vector<256x32xf32>
    %c1_41 = arith.constant 1 : index
    %c7_42 = arith.constant 7 : index
    %c0_43 = arith.constant 0 : index
    %45 = vector.load %arg15[%c1_41, %c7_42, %c0_43] : memref<18x32x8xf32, #tpu.memory_space<vmem>>, vector<16x16x8xf32>
    %46 = vector.shape_cast %45 : vector<16x16x8xf32> to vector<256x8xf32>
    %c3 = arith.constant 3 : index
    %c0_44 = arith.constant 0 : index
    %c0_45 = arith.constant 0 : index
    %47 = vector.load %arg6[%c3, %c0_44, %c0_45] : memref<9x8x32xf32, #tpu.memory_space<vmem>>, vector<1x8x32xf32>
    %48 = vector.shape_cast %47 : vector<1x8x32xf32> to vector<8x32xf32>
    %cst_46 = arith.constant dense<0.000000e+00> : vector<256x32xf32>
    %49 = tpu.matmul %46, %48, %cst_46 {dimension_numbers = #tpu.dot_dimension_numbers<[1], [0], [0], [1], [0, 0, 1, 1], [], []>} : vector<256x8xf32>, vector<8x32xf32>, vector<256x32xf32> -> vector<256x32xf32>
    %50 = arith.addf %44, %49 : vector<256x32xf32>
    %c1_47 = arith.constant 1 : index
    %c8_48 = arith.constant 8 : index
    %c0_49 = arith.constant 0 : index
    %51 = vector.load %arg15[%c1_47, %c8_48, %c0_49] : memref<18x32x8xf32, #tpu.memory_space<vmem>>, vector<16x16x8xf32>
    %52 = vector.shape_cast %51 : vector<16x16x8xf32> to vector<256x8xf32>
    %c4 = arith.constant 4 : index
    %c0_50 = arith.constant 0 : index
    %c0_51 = arith.constant 0 : index
    %53 = vector.load %arg6[%c4, %c0_50, %c0_51] : memref<9x8x32xf32, #tpu.memory_space<vmem>>, vector<1x8x32xf32>
    %54 = vector.shape_cast %53 : vector<1x8x32xf32> to vector<8x32xf32>
    %cst_52 = arith.constant dense<0.000000e+00> : vector<256x32xf32>
    %55 = tpu.matmul %52, %54, %cst_52 {dimension_numbers = #tpu.dot_dimension_numbers<[1], [0], [0], [1], [0, 0, 1, 1], [], []>} : vector<256x8xf32>, vector<8x32xf32>, vector<256x32xf32> -> vector<256x32xf32>
    %56 = arith.addf %50, %55 : vector<256x32xf32>
    %c1_53 = arith.constant 1 : index
    %c9_54 = arith.constant 9 : index
    %c0_55 = arith.constant 0 : index
    %57 = vector.load %arg15[%c1_53, %c9_54, %c0_55] : memref<18x32x8xf32, #tpu.memory_space<vmem>>, vector<16x16x8xf32>
    %58 = vector.shape_cast %57 : vector<16x16x8xf32> to vector<256x8xf32>
    %c5 = arith.constant 5 : index
    %c0_56 = arith.constant 0 : index
    %c0_57 = arith.constant 0 : index
    %59 = vector.load %arg6[%c5, %c0_56, %c0_57] : memref<9x8x32xf32, #tpu.memory_space<vmem>>, vector<1x8x32xf32>
    %60 = vector.shape_cast %59 : vector<1x8x32xf32> to vector<8x32xf32>
    %cst_58 = arith.constant dense<0.000000e+00> : vector<256x32xf32>
    %61 = tpu.matmul %58, %60, %cst_58 {dimension_numbers = #tpu.dot_dimension_numbers<[1], [0], [0], [1], [0, 0, 1, 1], [], []>} : vector<256x8xf32>, vector<8x32xf32>, vector<256x32xf32> -> vector<256x32xf32>
    %62 = arith.addf %56, %61 : vector<256x32xf32>
    %c2_59 = arith.constant 2 : index
    %c7_60 = arith.constant 7 : index
    %c0_61 = arith.constant 0 : index
    %63 = vector.load %arg15[%c2_59, %c7_60, %c0_61] : memref<18x32x8xf32, #tpu.memory_space<vmem>>, vector<16x16x8xf32>
    %64 = vector.shape_cast %63 : vector<16x16x8xf32> to vector<256x8xf32>
    %c6 = arith.constant 6 : index
    %c0_62 = arith.constant 0 : index
    %c0_63 = arith.constant 0 : index
    %65 = vector.load %arg6[%c6, %c0_62, %c0_63] : memref<9x8x32xf32, #tpu.memory_space<vmem>>, vector<1x8x32xf32>
    %66 = vector.shape_cast %65 : vector<1x8x32xf32> to vector<8x32xf32>
    %cst_64 = arith.constant dense<0.000000e+00> : vector<256x32xf32>
    %67 = tpu.matmul %64, %66, %cst_64 {dimension_numbers = #tpu.dot_dimension_numbers<[1], [0], [0], [1], [0, 0, 1, 1], [], []>} : vector<256x8xf32>, vector<8x32xf32>, vector<256x32xf32> -> vector<256x32xf32>
    %68 = arith.addf %62, %67 : vector<256x32xf32>
    %c2_65 = arith.constant 2 : index
    %c8_66 = arith.constant 8 : index
    %c0_67 = arith.constant 0 : index
    %69 = vector.load %arg15[%c2_65, %c8_66, %c0_67] : memref<18x32x8xf32, #tpu.memory_space<vmem>>, vector<16x16x8xf32>
    %70 = vector.shape_cast %69 : vector<16x16x8xf32> to vector<256x8xf32>
    %c7_68 = arith.constant 7 : index
    %c0_69 = arith.constant 0 : index
    %c0_70 = arith.constant 0 : index
    %71 = vector.load %arg6[%c7_68, %c0_69, %c0_70] : memref<9x8x32xf32, #tpu.memory_space<vmem>>, vector<1x8x32xf32>
    %72 = vector.shape_cast %71 : vector<1x8x32xf32> to vector<8x32xf32>
    %cst_71 = arith.constant dense<0.000000e+00> : vector<256x32xf32>
    %73 = tpu.matmul %70, %72, %cst_71 {dimension_numbers = #tpu.dot_dimension_numbers<[1], [0], [0], [1], [0, 0, 1, 1], [], []>} : vector<256x8xf32>, vector<8x32xf32>, vector<256x32xf32> -> vector<256x32xf32>
    %74 = arith.addf %68, %73 : vector<256x32xf32>
    %c2_72 = arith.constant 2 : index
    %c9_73 = arith.constant 9 : index
    %c0_74 = arith.constant 0 : index
    %75 = vector.load %arg15[%c2_72, %c9_73, %c0_74] : memref<18x32x8xf32, #tpu.memory_space<vmem>>, vector<16x16x8xf32>
    %76 = vector.shape_cast %75 : vector<16x16x8xf32> to vector<256x8xf32>
    %c8_75 = arith.constant 8 : index
    %c0_76 = arith.constant 0 : index
    %c0_77 = arith.constant 0 : index
    %77 = vector.load %arg6[%c8_75, %c0_76, %c0_77] : memref<9x8x32xf32, #tpu.memory_space<vmem>>, vector<1x8x32xf32>
    %78 = vector.shape_cast %77 : vector<1x8x32xf32> to vector<8x32xf32>
    %cst_78 = arith.constant dense<0.000000e+00> : vector<256x32xf32>
    %79 = tpu.matmul %76, %78, %cst_78 {dimension_numbers = #tpu.dot_dimension_numbers<[1], [0], [0], [1], [0, 0, 1, 1], [], []>} : vector<256x8xf32>, vector<8x32xf32>, vector<256x32xf32> -> vector<256x32xf32>
    %80 = arith.addf %74, %79 : vector<256x32xf32>
    %c0_79 = arith.constant 0 : index
    %c0_80 = arith.constant 0 : index
    %81 = vector.load %arg7[%c0_79, %c0_80] : memref<1x32xf32, #tpu.memory_space<vmem>>, vector<1x32xf32>
    %82 = vector.broadcast %81 : vector<1x32xf32> to vector<256x32xf32>
    %83 = arith.addf %80, %82 : vector<256x32xf32>
    %cst_81 = arith.constant 1.000000e-01 : f32
    %84 = vector.broadcast %cst_81 : f32 to vector<256x32xf32>
    %85 = arith.mulf %84, %83 : vector<256x32xf32>
    %86 = arith.maximumf %83, %85 : vector<256x32xf32>
    %87 = arith.addf %11, %86 : vector<256x32xf32>
    %c0_82 = arith.constant 0 : index
    %c0_83 = arith.constant 0 : index
    %c0_84 = arith.constant 0 : index
    %88 = vector.load %arg13[%c0_82, %c0_83, %c0_84] : memref<1x256x32xf32, #tpu.memory_space<vmem>>, vector<1x256x32xf32>
    %89 = vector.shape_cast %88 : vector<1x256x32xf32> to vector<256x32xf32>
    %90 = vector.shape_cast %87 : vector<256x32xf32> to vector<1x256x32xf32>
    tpu.vector_store %arg13[%c0_82, %c0_83, %c0_84], %90 {strides = array<i32>} : memref<1x256x32xf32, #tpu.memory_space<vmem>>, vector<1x256x32xf32>,
    %91 = vector.shape_cast %87 : vector<256x32xf32> to vector<16x16x32xf32>
    %c1_85 = arith.constant 1 : index
    %c8_86 = arith.constant 8 : index
    %c0_87 = arith.constant 0 : index
    %92 = vector.load %arg16[%c1_85, %c8_86, %c0_87] : memref<19x32x32xf32, #tpu.memory_space<vmem>>, vector<16x16x32xf32>
    tpu.vector_store %arg16[%c1_85, %c8_86, %c0_87], %91 {strides = array<i32>} : memref<19x32x32xf32, #tpu.memory_space<vmem>>, vector<16x16x32xf32>,
    %cst_88 = arith.constant 0.000000e+00 : f32
    %93 = vector.broadcast %cst_88 : f32 to vector<128x32xf32>
    %c0_89 = arith.constant 0 : index
    %c7_90 = arith.constant 7 : index
    %c0_91 = arith.constant 0 : index
    %94 = vector.load %arg16[%c0_89, %c7_90, %c0_91] : memref<19x32x32xf32, #tpu.memory_space<vmem>>, vector<16x16x32xf32>
    %95 = vector.shape_cast %94 : vector<16x16x32xf32> to vector<8x2x16x32xf32>
    %96 = vector.extract_strided_slice %95 {offsets = [0, 0, 0, 0], sizes = [8, 1, 16, 32], strides = [1, 1, 1, 1]} : vector<8x2x16x32xf32> to vector<8x1x16x32xf32>
    %97 = vector.shape_cast %96 : vector<8x1x16x32xf32> to vector<8x16x32xf32>
    %98 = vector.shape_cast %97 : vector<8x16x32xf32> to vector<128x32xf32>
    %c0_92 = arith.constant 0 : index
    %c0_93 = arith.constant 0 : index
    %c0_94 = arith.constant 0 : index
    %99 = vector.load %arg8[%c0_92, %c0_93, %c0_94] : memref<16x32x32xf32, #tpu.memory_space<vmem>>, vector<1x32x32xf32>
    %100 = vector.shape_cast %99 : vector<1x32x32xf32> to vector<32x32xf32>
    %cst_95 = arith.constant dense<0.000000e+00> : vector<128x32xf32>
    %101 = tpu.matmul %98, %100, %cst_95 {dimension_numbers = #tpu.dot_dimension_numbers<[1], [0], [0], [1], [0, 0, 1, 1], [], []>} : vector<128x32xf32>, vector<32x32xf32>, vector<128x32xf32> -> vector<128x32xf32>
    %102 = arith.addf %93, %101 : vector<128x32xf32>
    %c0_96 = arith.constant 0 : index
    %c8_97 = arith.constant 8 : index
    %c0_98 = arith.constant 0 : index
    %103 = vector.load %arg16[%c0_96, %c8_97, %c0_98] : memref<19x32x32xf32, #tpu.memory_space<vmem>>, vector<16x16x32xf32>
    %104 = vector.shape_cast %103 : vector<16x16x32xf32> to vector<8x2x16x32xf32>
    %105 = vector.extract_strided_slice %104 {offsets = [0, 0, 0, 0], sizes = [8, 1, 16, 32], strides = [1, 1, 1, 1]} : vector<8x2x16x32xf32> to vector<8x1x16x32xf32>
    %106 = vector.shape_cast %105 : vector<8x1x16x32xf32> to vector<8x16x32xf32>
    %107 = vector.shape_cast %106 : vector<8x16x32xf32> to vector<128x32xf32>
    %c1_99 = arith.constant 1 : index
    %c0_100 = arith.constant 0 : index
    %c0_101 = arith.constant 0 : index
    %108 = vector.load %arg8[%c1_99, %c0_100, %c0_101] : memref<16x32x32xf32, #tpu.memory_space<vmem>>, vector<1x32x32xf32>
    %109 = vector.shape_cast %108 : vector<1x32x32xf32> to vector<32x32xf32>
    %cst_102 = arith.constant dense<0.000000e+00> : vector<128x32xf32>
    %110 = tpu.matmul %107, %109, %cst_102 {dimension_numbers = #tpu.dot_dimension_numbers<[1], [0], [0], [1], [0, 0, 1, 1], [], []>} : vector<128x32xf32>, vector<32x32xf32>, vector<128x32xf32> -> vector<128x32xf32>
    %111 = arith.addf %102, %110 : vector<128x32xf32>
    %c0_103 = arith.constant 0 : index
    %c9_104 = arith.constant 9 : index
    %c0_105 = arith.constant 0 : index
    %112 = vector.load %arg16[%c0_103, %c9_104, %c0_105] : memref<19x32x32xf32, #tpu.memory_space<vmem>>, vector<16x16x32xf32>
    %113 = vector.shape_cast %112 : vector<16x16x32xf32> to vector<8x2x16x32xf32>
    %114 = vector.extract_strided_slice %113 {offsets = [0, 0, 0, 0], sizes = [8, 1, 16, 32], strides = [1, 1, 1, 1]} : vector<8x2x16x32xf32> to vector<8x1x16x32xf32>
    %115 = vector.shape_cast %114 : vector<8x1x16x32xf32> to vector<8x16x32xf32>
    %116 = vector.shape_cast %115 : vector<8x16x32xf32> to vector<128x32xf32>
    %c2_106 = arith.constant 2 : index
    %c0_107 = arith.constant 0 : index
    %c0_108 = arith.constant 0 : index
    %117 = vector.load %arg8[%c2_106, %c0_107, %c0_108] : memref<16x32x32xf32, #tpu.memory_space<vmem>>, vector<1x32x32xf32>
    %118 = vector.shape_cast %117 : vector<1x32x32xf32> to vector<32x32xf32>
    %cst_109 = arith.constant dense<0.000000e+00> : vector<128x32xf32>
    %119 = tpu.matmul %116, %118, %cst_109 {dimension_numbers = #tpu.dot_dimension_numbers<[1], [0], [0], [1], [0, 0, 1, 1], [], []>} : vector<128x32xf32>, vector<32x32xf32>, vector<128x32xf32> -> vector<128x32xf32>
    %120 = arith.addf %111, %119 : vector<128x32xf32>
    %c0_110 = arith.constant 0 : index
    %c10 = arith.constant 10 : index
    %c0_111 = arith.constant 0 : index
    %121 = vector.load %arg16[%c0_110, %c10, %c0_111] : memref<19x32x32xf32, #tpu.memory_space<vmem>>, vector<16x16x32xf32>
    %122 = vector.shape_cast %121 : vector<16x16x32xf32> to vector<8x2x16x32xf32>
    %123 = vector.extract_strided_slice %122 {offsets = [0, 0, 0, 0], sizes = [8, 1, 16, 32], strides = [1, 1, 1, 1]} : vector<8x2x16x32xf32> to vector<8x1x16x32xf32>
    %124 = vector.shape_cast %123 : vector<8x1x16x32xf32> to vector<8x16x32xf32>
    %125 = vector.shape_cast %124 : vector<8x16x32xf32> to vector<128x32xf32>
    %c3_112 = arith.constant 3 : index
    %c0_113 = arith.constant 0 : index
    %c0_114 = arith.constant 0 : index
    %126 = vector.load %arg8[%c3_112, %c0_113, %c0_114] : memref<16x32x32xf32, #tpu.memory_space<vmem>>, vector<1x32x32xf32>
    %127 = vector.shape_cast %126 : vector<1x32x32xf32> to vector<32x32xf32>
    %cst_115 = arith.constant dense<0.000000e+00> : vector<128x32xf32>
    %128 = tpu.matmul %125, %127, %cst_115 {dimension_numbers = #tpu.dot_dimension_numbers<[1], [0], [0], [1], [0, 0, 1, 1], [], []>} : vector<128x32xf32>, vector<32x32xf32>, vector<128x32xf32> -> vector<128x32xf32>
    %129 = arith.addf %120, %128 : vector<128x32xf32>
    %c1_116 = arith.constant 1 : index
    %c7_117 = arith.constant 7 : index
    %c0_118 = arith.constant 0 : index
    %130 = vector.load %arg16[%c1_116, %c7_117, %c0_118] : memref<19x32x32xf32, #tpu.memory_space<vmem>>, vector<16x16x32xf32>
    %131 = vector.shape_cast %130 : vector<16x16x32xf32> to vector<8x2x16x32xf32>
    %132 = vector.extract_strided_slice %131 {offsets = [0, 0, 0, 0], sizes = [8, 1, 16, 32], strides = [1, 1, 1, 1]} : vector<8x2x16x32xf32> to vector<8x1x16x32xf32>
    %133 = vector.shape_cast %132 : vector<8x1x16x32xf32> to vector<8x16x32xf32>
    %134 = vector.shape_cast %133 : vector<8x16x32xf32> to vector<128x32xf32>
    %c4_119 = arith.constant 4 : index
    %c0_120 = arith.constant 0 : index
    %c0_121 = arith.constant 0 : index
    %135 = vector.load %arg8[%c4_119, %c0_120, %c0_121] : memref<16x32x32xf32, #tpu.memory_space<vmem>>, vector<1x32x32xf32>
    %136 = vector.shape_cast %135 : vector<1x32x32xf32> to vector<32x32xf32>
    %cst_122 = arith.constant dense<0.000000e+00> : vector<128x32xf32>
    %137 = tpu.matmul %134, %136, %cst_122 {dimension_numbers = #tpu.dot_dimension_numbers<[1], [0], [0], [1], [0, 0, 1, 1], [], []>} : vector<128x32xf32>, vector<32x32xf32>, vector<128x32xf32> -> vector<128x32xf32>
    %138 = arith.addf %129, %137 : vector<128x32xf32>
    %c1_123 = arith.constant 1 : index
    %c8_124 = arith.constant 8 : index
    %c0_125 = arith.constant 0 : index
    %139 = vector.load %arg16[%c1_123, %c8_124, %c0_125] : memref<19x32x32xf32, #tpu.memory_space<vmem>>, vector<16x16x32xf32>
    %140 = vector.shape_cast %139 : vector<16x16x32xf32> to vector<8x2x16x32xf32>
    %141 = vector.extract_strided_slice %140 {offsets = [0, 0, 0, 0], sizes = [8, 1, 16, 32], strides = [1, 1, 1, 1]} : vector<8x2x16x32xf32> to vector<8x1x16x32xf32>
    %142 = vector.shape_cast %141 : vector<8x1x16x32xf32> to vector<8x16x32xf32>
    %143 = vector.shape_cast %142 : vector<8x16x32xf32> to vector<128x32xf32>
    %c5_126 = arith.constant 5 : index
    %c0_127 = arith.constant 0 : index
    %c0_128 = arith.constant 0 : index
    %144 = vector.load %arg8[%c5_126, %c0_127, %c0_128] : memref<16x32x32xf32, #tpu.memory_space<vmem>>, vector<1x32x32xf32>
    %145 = vector.shape_cast %144 : vector<1x32x32xf32> to vector<32x32xf32>
    %cst_129 = arith.constant dense<0.000000e+00> : vector<128x32xf32>
    %146 = tpu.matmul %143, %145, %cst_129 {dimension_numbers = #tpu.dot_dimension_numbers<[1], [0], [0], [1], [0, 0, 1, 1], [], []>} : vector<128x32xf32>, vector<32x32xf32>, vector<128x32xf32> -> vector<128x32xf32>
    %147 = arith.addf %138, %146 : vector<128x32xf32>
    %c1_130 = arith.constant 1 : index
    %c9_131 = arith.constant 9 : index
    %c0_132 = arith.constant 0 : index
    %148 = vector.load %arg16[%c1_130, %c9_131, %c0_132] : memref<19x32x32xf32, #tpu.memory_space<vmem>>, vector<16x16x32xf32>
    %149 = vector.shape_cast %148 : vector<16x16x32xf32> to vector<8x2x16x32xf32>
    %150 = vector.extract_strided_slice %149 {offsets = [0, 0, 0, 0], sizes = [8, 1, 16, 32], strides = [1, 1, 1, 1]} : vector<8x2x16x32xf32> to vector<8x1x16x32xf32>
    %151 = vector.shape_cast %150 : vector<8x1x16x32xf32> to vector<8x16x32xf32>
    %152 = vector.shape_cast %151 : vector<8x16x32xf32> to vector<128x32xf32>
    %c6_133 = arith.constant 6 : index
    %c0_134 = arith.constant 0 : index
    %c0_135 = arith.constant 0 : index
    %153 = vector.load %arg8[%c6_133, %c0_134, %c0_135] : memref<16x32x32xf32, #tpu.memory_space<vmem>>, vector<1x32x32xf32>
    %154 = vector.shape_cast %153 : vector<1x32x32xf32> to vector<32x32xf32>
    %cst_136 = arith.constant dense<0.000000e+00> : vector<128x32xf32>
    %155 = tpu.matmul %152, %154, %cst_136 {dimension_numbers = #tpu.dot_dimension_numbers<[1], [0], [0], [1], [0, 0, 1, 1], [], []>} : vector<128x32xf32>, vector<32x32xf32>, vector<128x32xf32> -> vector<128x32xf32>
    %156 = arith.addf %147, %155 : vector<128x32xf32>
    %c1_137 = arith.constant 1 : index
    %c10_138 = arith.constant 10 : index
    %c0_139 = arith.constant 0 : index
    %157 = vector.load %arg16[%c1_137, %c10_138, %c0_139] : memref<19x32x32xf32, #tpu.memory_space<vmem>>, vector<16x16x32xf32>
    %158 = vector.shape_cast %157 : vector<16x16x32xf32> to vector<8x2x16x32xf32>
    %159 = vector.extract_strided_slice %158 {offsets = [0, 0, 0, 0], sizes = [8, 1, 16, 32], strides = [1, 1, 1, 1]} : vector<8x2x16x32xf32> to vector<8x1x16x32xf32>
    %160 = vector.shape_cast %159 : vector<8x1x16x32xf32> to vector<8x16x32xf32>
    %161 = vector.shape_cast %160 : vector<8x16x32xf32> to vector<128x32xf32>
    %c7_140 = arith.constant 7 : index
    %c0_141 = arith.constant 0 : index
    %c0_142 = arith.constant 0 : index
    %162 = vector.load %arg8[%c7_140, %c0_141, %c0_142] : memref<16x32x32xf32, #tpu.memory_space<vmem>>, vector<1x32x32xf32>
    %163 = vector.shape_cast %162 : vector<1x32x32xf32> to vector<32x32xf32>
    %cst_143 = arith.constant dense<0.000000e+00> : vector<128x32xf32>
    %164 = tpu.matmul %161, %163, %cst_143 {dimension_numbers = #tpu.dot_dimension_numbers<[1], [0], [0], [1], [0, 0, 1, 1], [], []>} : vector<128x32xf32>, vector<32x32xf32>, vector<128x32xf32> -> vector<128x32xf32>
    %165 = arith.addf %156, %164 : vector<128x32xf32>
    %c2_144 = arith.constant 2 : index
    %c7_145 = arith.constant 7 : index
    %c0_146 = arith.constant 0 : index
    %166 = vector.load %arg16[%c2_144, %c7_145, %c0_146] : memref<19x32x32xf32, #tpu.memory_space<vmem>>, vector<16x16x32xf32>
    %167 = vector.shape_cast %166 : vector<16x16x32xf32> to vector<8x2x16x32xf32>
    %168 = vector.extract_strided_slice %167 {offsets = [0, 0, 0, 0], sizes = [8, 1, 16, 32], strides = [1, 1, 1, 1]} : vector<8x2x16x32xf32> to vector<8x1x16x32xf32>
    %169 = vector.shape_cast %168 : vector<8x1x16x32xf32> to vector<8x16x32xf32>
    %170 = vector.shape_cast %169 : vector<8x16x32xf32> to vector<128x32xf32>
    %c8_147 = arith.constant 8 : index
    %c0_148 = arith.constant 0 : index
    %c0_149 = arith.constant 0 : index
    %171 = vector.load %arg8[%c8_147, %c0_148, %c0_149] : memref<16x32x32xf32, #tpu.memory_space<vmem>>, vector<1x32x32xf32>
    %172 = vector.shape_cast %171 : vector<1x32x32xf32> to vector<32x32xf32>
    %cst_150 = arith.constant dense<0.000000e+00> : vector<128x32xf32>
    %173 = tpu.matmul %170, %172, %cst_150 {dimension_numbers = #tpu.dot_dimension_numbers<[1], [0], [0], [1], [0, 0, 1, 1], [], []>} : vector<128x32xf32>, vector<32x32xf32>, vector<128x32xf32> -> vector<128x32xf32>
    %174 = arith.addf %165, %173 : vector<128x32xf32>
    %c2_151 = arith.constant 2 : index
    %c8_152 = arith.constant 8 : index
    %c0_153 = arith.constant 0 : index
    %175 = vector.load %arg16[%c2_151, %c8_152, %c0_153] : memref<19x32x32xf32, #tpu.memory_space<vmem>>, vector<16x16x32xf32>
    %176 = vector.shape_cast %175 : vector<16x16x32xf32> to vector<8x2x16x32xf32>
    %177 = vector.extract_strided_slice %176 {offsets = [0, 0, 0, 0], sizes = [8, 1, 16, 32], strides = [1, 1, 1, 1]} : vector<8x2x16x32xf32> to vector<8x1x16x32xf32>
    %178 = vector.shape_cast %177 : vector<8x1x16x32xf32> to vector<8x16x32xf32>
    %179 = vector.shape_cast %178 : vector<8x16x32xf32> to vector<128x32xf32>
    %c9_154 = arith.constant 9 : index
    %c0_155 = arith.constant 0 : index
    %c0_156 = arith.constant 0 : index
    %180 = vector.load %arg8[%c9_154, %c0_155, %c0_156] : memref<16x32x32xf32, #tpu.memory_space<vmem>>, vector<1x32x32xf32>
    %181 = vector.shape_cast %180 : vector<1x32x32xf32> to vector<32x32xf32>
    %cst_157 = arith.constant dense<0.000000e+00> : vector<128x32xf32>
    %182 = tpu.matmul %179, %181, %cst_157 {dimension_numbers = #tpu.dot_dimension_numbers<[1], [0], [0], [1], [0, 0, 1, 1], [], []>} : vector<128x32xf32>, vector<32x32xf32>, vector<128x32xf32> -> vector<128x32xf32>
    %183 = arith.addf %174, %182 : vector<128x32xf32>
    %c2_158 = arith.constant 2 : index
    %c9_159 = arith.constant 9 : index
    %c0_160 = arith.constant 0 : index
    %184 = vector.load %arg16[%c2_158, %c9_159, %c0_160] : memref<19x32x32xf32, #tpu.memory_space<vmem>>, vector<16x16x32xf32>
    %185 = vector.shape_cast %184 : vector<16x16x32xf32> to vector<8x2x16x32xf32>
    %186 = vector.extract_strided_slice %185 {offsets = [0, 0, 0, 0], sizes = [8, 1, 16, 32], strides = [1, 1, 1, 1]} : vector<8x2x16x32xf32> to vector<8x1x16x32xf32>
    %187 = vector.shape_cast %186 : vector<8x1x16x32xf32> to vector<8x16x32xf32>
    %188 = vector.shape_cast %187 : vector<8x16x32xf32> to vector<128x32xf32>
    %c10_161 = arith.constant 10 : index
    %c0_162 = arith.constant 0 : index
    %c0_163 = arith.constant 0 : index
    %189 = vector.load %arg8[%c10_161, %c0_162, %c0_163] : memref<16x32x32xf32, #tpu.memory_space<vmem>>, vector<1x32x32xf32>
    %190 = vector.shape_cast %189 : vector<1x32x32xf32> to vector<32x32xf32>
    %cst_164 = arith.constant dense<0.000000e+00> : vector<128x32xf32>
    %191 = tpu.matmul %188, %190, %cst_164 {dimension_numbers = #tpu.dot_dimension_numbers<[1], [0], [0], [1], [0, 0, 1, 1], [], []>} : vector<128x32xf32>, vector<32x32xf32>, vector<128x32xf32> -> vector<128x32xf32>
    %192 = arith.addf %183, %191 : vector<128x32xf32>
    %c2_165 = arith.constant 2 : index
    %c10_166 = arith.constant 10 : index
    %c0_167 = arith.constant 0 : index
    %193 = vector.load %arg16[%c2_165, %c10_166, %c0_167] : memref<19x32x32xf32, #tpu.memory_space<vmem>>, vector<16x16x32xf32>
    %194 = vector.shape_cast %193 : vector<16x16x32xf32> to vector<8x2x16x32xf32>
    %195 = vector.extract_strided_slice %194 {offsets = [0, 0, 0, 0], sizes = [8, 1, 16, 32], strides = [1, 1, 1, 1]} : vector<8x2x16x32xf32> to vector<8x1x16x32xf32>
    %196 = vector.shape_cast %195 : vector<8x1x16x32xf32> to vector<8x16x32xf32>
    %197 = vector.shape_cast %196 : vector<8x16x32xf32> to vector<128x32xf32>
    %c11 = arith.constant 11 : index
    %c0_168 = arith.constant 0 : index
    %c0_169 = arith.constant 0 : index
    %198 = vector.load %arg8[%c11, %c0_168, %c0_169] : memref<16x32x32xf32, #tpu.memory_space<vmem>>, vector<1x32x32xf32>
    %199 = vector.shape_cast %198 : vector<1x32x32xf32> to vector<32x32xf32>
    %cst_170 = arith.constant dense<0.000000e+00> : vector<128x32xf32>
    %200 = tpu.matmul %197, %199, %cst_170 {dimension_numbers = #tpu.dot_dimension_numbers<[1], [0], [0], [1], [0, 0, 1, 1], [], []>} : vector<128x32xf32>, vector<32x32xf32>, vector<128x32xf32> -> vector<128x32xf32>
    %201 = arith.addf %192, %200 : vector<128x32xf32>
    %c3_171 = arith.constant 3 : index
    %c7_172 = arith.constant 7 : index
    %c0_173 = arith.constant 0 : index
    %202 = vector.load %arg16[%c3_171, %c7_172, %c0_173] : memref<19x32x32xf32, #tpu.memory_space<vmem>>, vector<16x16x32xf32>
    %203 = vector.shape_cast %202 : vector<16x16x32xf32> to vector<8x2x16x32xf32>
    %204 = vector.extract_strided_slice %203 {offsets = [0, 0, 0, 0], sizes = [8, 1, 16, 32], strides = [1, 1, 1, 1]} : vector<8x2x16x32xf32> to vector<8x1x16x32xf32>
    %205 = vector.shape_cast %204 : vector<8x1x16x32xf32> to vector<8x16x32xf32>
    %206 = vector.shape_cast %205 : vector<8x16x32xf32> to vector<128x32xf32>
    %c12 = arith.constant 12 : index
    %c0_174 = arith.constant 0 : index
    %c0_175 = arith.constant 0 : index
    %207 = vector.load %arg8[%c12, %c0_174, %c0_175] : memref<16x32x32xf32, #tpu.memory_space<vmem>>, vector<1x32x32xf32>
    %208 = vector.shape_cast %207 : vector<1x32x32xf32> to vector<32x32xf32>
    %cst_176 = arith.constant dense<0.000000e+00> : vector<128x32xf32>
    %209 = tpu.matmul %206, %208, %cst_176 {dimension_numbers = #tpu.dot_dimension_numbers<[1], [0], [0], [1], [0, 0, 1, 1], [], []>} : vector<128x32xf32>, vector<32x32xf32>, vector<128x32xf32> -> vector<128x32xf32>
    %210 = arith.addf %201, %209 : vector<128x32xf32>
    %c3_177 = arith.constant 3 : index
    %c8_178 = arith.constant 8 : index
    %c0_179 = arith.constant 0 : index
    %211 = vector.load %arg16[%c3_177, %c8_178, %c0_179] : memref<19x32x32xf32, #tpu.memory_space<vmem>>, vector<16x16x32xf32>
    %212 = vector.shape_cast %211 : vector<16x16x32xf32> to vector<8x2x16x32xf32>
    %213 = vector.extract_strided_slice %212 {offsets = [0, 0, 0, 0], sizes = [8, 1, 16, 32], strides = [1, 1, 1, 1]} : vector<8x2x16x32xf32> to vector<8x1x16x32xf32>
    %214 = vector.shape_cast %213 : vector<8x1x16x32xf32> to vector<8x16x32xf32>
    %215 = vector.shape_cast %214 : vector<8x16x32xf32> to vector<128x32xf32>
    %c13 = arith.constant 13 : index
    %c0_180 = arith.constant 0 : index
    %c0_181 = arith.constant 0 : index
    %216 = vector.load %arg8[%c13, %c0_180, %c0_181] : memref<16x32x32xf32, #tpu.memory_space<vmem>>, vector<1x32x32xf32>
    %217 = vector.shape_cast %216 : vector<1x32x32xf32> to vector<32x32xf32>
    %cst_182 = arith.constant dense<0.000000e+00> : vector<128x32xf32>
    %218 = tpu.matmul %215, %217, %cst_182 {dimension_numbers = #tpu.dot_dimension_numbers<[1], [0], [0], [1], [0, 0, 1, 1], [], []>} : vector<128x32xf32>, vector<32x32xf32>, vector<128x32xf32> -> vector<128x32xf32>
    %219 = arith.addf %210, %218 : vector<128x32xf32>
    %c3_183 = arith.constant 3 : index
    %c9_184 = arith.constant 9 : index
    %c0_185 = arith.constant 0 : index
    %220 = vector.load %arg16[%c3_183, %c9_184, %c0_185] : memref<19x32x32xf32, #tpu.memory_space<vmem>>, vector<16x16x32xf32>
    %221 = vector.shape_cast %220 : vector<16x16x32xf32> to vector<8x2x16x32xf32>
    %222 = vector.extract_strided_slice %221 {offsets = [0, 0, 0, 0], sizes = [8, 1, 16, 32], strides = [1, 1, 1, 1]} : vector<8x2x16x32xf32> to vector<8x1x16x32xf32>
    %223 = vector.shape_cast %222 : vector<8x1x16x32xf32> to vector<8x16x32xf32>
    %224 = vector.shape_cast %223 : vector<8x16x32xf32> to vector<128x32xf32>
    %c14 = arith.constant 14 : index
    %c0_186 = arith.constant 0 : index
    %c0_187 = arith.constant 0 : index
    %225 = vector.load %arg8[%c14, %c0_186, %c0_187] : memref<16x32x32xf32, #tpu.memory_space<vmem>>, vector<1x32x32xf32>
    %226 = vector.shape_cast %225 : vector<1x32x32xf32> to vector<32x32xf32>
    %cst_188 = arith.constant dense<0.000000e+00> : vector<128x32xf32>
    %227 = tpu.matmul %224, %226, %cst_188 {dimension_numbers = #tpu.dot_dimension_numbers<[1], [0], [0], [1], [0, 0, 1, 1], [], []>} : vector<128x32xf32>, vector<32x32xf32>, vector<128x32xf32> -> vector<128x32xf32>
    %228 = arith.addf %219, %227 : vector<128x32xf32>
    %c3_189 = arith.constant 3 : index
    %c10_190 = arith.constant 10 : index
    %c0_191 = arith.constant 0 : index
    %229 = vector.load %arg16[%c3_189, %c10_190, %c0_191] : memref<19x32x32xf32, #tpu.memory_space<vmem>>, vector<16x16x32xf32>
    %230 = vector.shape_cast %229 : vector<16x16x32xf32> to vector<8x2x16x32xf32>
    %231 = vector.extract_strided_slice %230 {offsets = [0, 0, 0, 0], sizes = [8, 1, 16, 32], strides = [1, 1, 1, 1]} : vector<8x2x16x32xf32> to vector<8x1x16x32xf32>
    %232 = vector.shape_cast %231 : vector<8x1x16x32xf32> to vector<8x16x32xf32>
    %233 = vector.shape_cast %232 : vector<8x16x32xf32> to vector<128x32xf32>
    %c15 = arith.constant 15 : index
    %c0_192 = arith.constant 0 : index
    %c0_193 = arith.constant 0 : index
    %234 = vector.load %arg8[%c15, %c0_192, %c0_193] : memref<16x32x32xf32, #tpu.memory_space<vmem>>, vector<1x32x32xf32>
    %235 = vector.shape_cast %234 : vector<1x32x32xf32> to vector<32x32xf32>
    %cst_194 = arith.constant dense<0.000000e+00> : vector<128x32xf32>
    %236 = tpu.matmul %233, %235, %cst_194 {dimension_numbers = #tpu.dot_dimension_numbers<[1], [0], [0], [1], [0, 0, 1, 1], [], []>} : vector<128x32xf32>, vector<32x32xf32>, vector<128x32xf32> -> vector<128x32xf32>
    %237 = arith.addf %228, %236 : vector<128x32xf32>
    %c0_195 = arith.constant 0 : index
    %c0_196 = arith.constant 0 : index
    %238 = vector.load %arg12[%c0_195, %c0_196] : memref<64x128xf32, #tpu.memory_space<vmem>>, vector<64x128xf32>
    %cst_197 = arith.constant dense<0.000000e+00> : vector<64x32xf32>
    %239 = tpu.matmul %238, %237, %cst_197 {dimension_numbers = #tpu.dot_dimension_numbers<[1], [0], [0], [1], [0, 0, 1, 1], [], []>} : vector<64x128xf32>, vector<128x32xf32>, vector<64x32xf32> -> vector<64x32xf32>
    %c0_198 = arith.constant 0 : index
    %c0_199 = arith.constant 0 : index
    %240 = vector.load %arg9[%c0_198, %c0_199] : memref<1x32xf32, #tpu.memory_space<vmem>>, vector<1x32xf32>
    %241 = vector.broadcast %240 : vector<1x32xf32> to vector<64x32xf32>
    %242 = arith.addf %239, %241 : vector<64x32xf32>
    %cst_200 = arith.constant dense<0.000000e+00> : vector<32xf32>
    %243 = vector.multi_reduction <add>, %242, %cst_200 [0] : vector<64x32xf32> to vector<32xf32>
    %244 = vector.shape_cast %243 : vector<32xf32> to vector<1x32xf32>
    %cst_201 = arith.constant 1.562500e-02 : f32
    %245 = vector.broadcast %cst_201 : f32 to vector<1x32xf32>
    %246 = arith.mulf %244, %245 : vector<1x32xf32>
    %247 = vector.broadcast %246 : vector<1x32xf32> to vector<64x32xf32>
    %248 = arith.subf %242, %247 : vector<64x32xf32>
    %249 = arith.mulf %248, %248 : vector<64x32xf32>
    %cst_202 = arith.constant dense<0.000000e+00> : vector<32xf32>
    %250 = vector.multi_reduction <add>, %249, %cst_202 [0] : vector<64x32xf32> to vector<32xf32>
    %251 = vector.shape_cast %250 : vector<32xf32> to vector<1x32xf32>
    %cst_203 = arith.constant 1.562500e-02 : f32
    %252 = vector.broadcast %cst_203 : f32 to vector<1x32xf32>
    %253 = arith.mulf %251, %252 : vector<1x32xf32>
    %cst_204 = arith.constant 9.99999974E-6 : f32
    %254 = vector.broadcast %cst_204 : f32 to vector<1x32xf32>
    %255 = arith.addf %253, %254 : vector<1x32xf32>
    %256 = math.rsqrt %255 : vector<1x32xf32>
    %257 = vector.broadcast %256 : vector<1x32xf32> to vector<64x32xf32>
    %258 = arith.mulf %248, %257 : vector<64x32xf32>
    %c0_205 = arith.constant 0 : index
    %c0_206 = arith.constant 0 : index
    %259 = vector.load %arg10[%c0_205, %c0_206] : memref<1x32xf32, #tpu.memory_space<vmem>>, vector<1x32xf32>
    %260 = vector.broadcast %259 : vector<1x32xf32> to vector<64x32xf32>
    %261 = arith.mulf %258, %260 : vector<64x32xf32>
    %c0_207 = arith.constant 0 : index
    %c0_208 = arith.constant 0 : index
    %262 = vector.load %arg11[%c0_207, %c0_208] : memref<1x32xf32, #tpu.memory_space<vmem>>, vector<1x32xf32>
    %263 = vector.broadcast %262 : vector<1x32xf32> to vector<64x32xf32>
    %264 = arith.addf %261, %263 : vector<64x32xf32>
    %cst_209 = arith.constant 1.000000e-01 : f32
    %265 = vector.broadcast %cst_209 : f32 to vector<64x32xf32>
    %266 = arith.mulf %265, %264 : vector<64x32xf32>
    %267 = arith.maximumf %264, %266 : vector<64x32xf32>
    %c0_210 = arith.constant 0 : index
    %c0_211 = arith.constant 0 : index
    %c0_212 = arith.constant 0 : index
    %268 = vector.load %arg14[%c0_210, %c0_211, %c0_212] : memref<1x64x32xf32, #tpu.memory_space<vmem>>, vector<1x64x32xf32>
    %269 = vector.shape_cast %268 : vector<1x64x32xf32> to vector<64x32xf32>
    %270 = vector.shape_cast %267 : vector<64x32xf32> to vector<1x64x32xf32>
    tpu.vector_store %arg14[%c0_210, %c0_211, %c0_212], %270 {strides = array<i32>} : memref<1x64x32xf32, #tpu.memory_space<vmem>>, vector<1x64x32xf32>,
    return
  }
  func.func @transform_0(%arg0: i32) -> (i32, i32, i32) {
    %c0_i32 = arith.constant 0 : i32
    %c0_i32_0 = arith.constant 0 : i32
    %c0_i32_1 = arith.constant 0 : i32
    return %arg0, %c0_i32, %c0_i32_0 : i32, i32, i32
  }
  func.func @transform_1(%arg0: i32) -> (i32, i32) {
    %c0_i32 = arith.constant 0 : i32
    %c0_i32_0 = arith.constant 0 : i32
    %c0_i32_1 = arith.constant 0 : i32
    return %c0_i32, %c0_i32_0 : i32, i32
  }
  func.func @transform_2(%arg0: i32) -> (i32, i32) {
    %c0_i32 = arith.constant 0 : i32
    %c0_i32_0 = arith.constant 0 : i32
    %c0_i32_1 = arith.constant 0 : i32
    return %c0_i32, %c0_i32_0 : i32, i32
  }
  func.func @transform_3(%arg0: i32) -> (i32, i32) {
    %c0_i32 = arith.constant 0 : i32
    %c0_i32_0 = arith.constant 0 : i32
    %c0_i32_1 = arith.constant 0 : i32
    return %c0_i32, %c0_i32_0 : i32, i32
  }
  func.func @transform_4(%arg0: i32) -> (i32, i32) {
    %c0_i32 = arith.constant 0 : i32
    %c0_i32_0 = arith.constant 0 : i32
    %c0_i32_1 = arith.constant 0 : i32
    return %c0_i32, %c0_i32_0 : i32, i32
  }
  func.func @transform_5(%arg0: i32) -> (i32, i32, i32) {
    %c0_i32 = arith.constant 0 : i32
    %c0_i32_0 = arith.constant 0 : i32
    %c0_i32_1 = arith.constant 0 : i32
    %c0_i32_2 = arith.constant 0 : i32
    return %c0_i32, %c0_i32_0, %c0_i32_1 : i32, i32, i32
  }
  func.func @transform_6(%arg0: i32) -> (i32, i32) {
    %c0_i32 = arith.constant 0 : i32
    %c0_i32_0 = arith.constant 0 : i32
    %c0_i32_1 = arith.constant 0 : i32
    return %c0_i32, %c0_i32_0 : i32, i32
  }
  func.func @transform_7(%arg0: i32) -> (i32, i32, i32) {
    %c0_i32 = arith.constant 0 : i32
    %c0_i32_0 = arith.constant 0 : i32
    %c0_i32_1 = arith.constant 0 : i32
    %c0_i32_2 = arith.constant 0 : i32
    return %c0_i32, %c0_i32_0, %c0_i32_1 : i32, i32, i32
  }
  func.func @transform_8(%arg0: i32) -> (i32, i32) {
    %c0_i32 = arith.constant 0 : i32
    %c0_i32_0 = arith.constant 0 : i32
    %c0_i32_1 = arith.constant 0 : i32
    return %c0_i32, %c0_i32_0 : i32, i32
  }
  func.func @transform_9(%arg0: i32) -> (i32, i32) {
    %c0_i32 = arith.constant 0 : i32
    %c0_i32_0 = arith.constant 0 : i32
    %c0_i32_1 = arith.constant 0 : i32
    return %c0_i32, %c0_i32_0 : i32, i32
  }
  func.func @transform_10(%arg0: i32) -> (i32, i32) {
    %c0_i32 = arith.constant 0 : i32
    %c0_i32_0 = arith.constant 0 : i32
    %c0_i32_1 = arith.constant 0 : i32
    return %c0_i32, %c0_i32_0 : i32, i32
  }
  func.func @transform_11(%arg0: i32) -> (i32, i32) {
    %c0_i32 = arith.constant 0 : i32
    %c0_i32_0 = arith.constant 0 : i32
    %c0_i32_1 = arith.constant 0 : i32
    return %c0_i32, %c0_i32_0 : i32, i32
  }
  func.func @transform_12(%arg0: i32) -> (i32, i32, i32) {
    %c0_i32 = arith.constant 0 : i32
    %c0_i32_0 = arith.constant 0 : i32
    %c0_i32_1 = arith.constant 0 : i32
    return %arg0, %c0_i32, %c0_i32_0 : i32, i32, i32
  }
  func.func @transform_13(%arg0: i32) -> (i32, i32, i32) {
    %c0_i32 = arith.constant 0 : i32
    %c0_i32_0 = arith.constant 0 : i32
    %c0_i32_1 = arith.constant 0 : i32
    return %arg0, %c0_i32, %c0_i32_0 : i32, i32, i32
  }
}

</mosaic_0001>

<bundles_post_ra>
// kernel: down_forward.1
= control target key start
LH: loop header
LB: loop body
LE: loop exit
PB: predicated region body
PF: predicated region fallthrough
CT: control target
= control target key end

     0   :  { %s15314_s0 = inlined_call_operand.vmem [shape: f32[2,256,4], index: 0, kind: input, shape index: {}]   ;;  %s15315_s1 = inlined_call_operand.vmem [shape: f32[4,40], index: 1, kind: input, shape index: {}]   ;;  %s15316_s2 = inlined_call_operand.vmem [shape: f32[1,40], index: 2, kind: input, shape index: {}]   ;;  %s15317_s3 = inlined_call_operand.vmem [shape: f32[8,8], index: 3, kind: input, shape index: {}]   ;;  %s15318_s4 = inlined_call_operand.vmem [shape: f32[1,8], index: 4, kind: input, shape index: {}]   ;;  %s15319_s5 = inlined_call_operand.vmem [shape: f32[9,8,32], index: 5, kind: input, shape index: {}]   ;;  %s15320_s6 = inlined_call_operand.vmem [shape: f32[1,32], index: 6, kind: input, shape index: {}]   ;;  %s15321_s7 = inlined_call_operand.vmem [shape: f32[16,32,32], index: 7, kind: input, shape index: {}]   ;;  %s15322_s8 = inlined_call_operand.vmem [shape: f32[1,32], index: 8, kind: input, shape index: {}]   ;;  %s15323_s9 = inlined_call_operand.vmem [shape: f32[1,32], index: 9, kind: input, shape index: {}]   ;;  %s15324_s10 = inlined_call_operand.vmem [shape: f32[1,32], index: 10, kind: input, shape index: {}]   ;;  %s15325_s11 = inlined_call_operand.vmem [shape: f32[64,128], index: 11, kind: input, shape index: {}]   ;;  %s15326_s12 = inlined_call_operand.hbm [shape: f32[2,256,32], index: 12, kind: output, shape index: {0}]   ;;  %s15327_s13 = inlined_call_operand.hbm [shape: f32[2,64,32], index: 13, kind: output, shape index: {1}]  }
   0x1   :  { %15470 = sst [smem:[#allocation71_spill]] %s15314_s0 }
   0x2   :  { %15471 = sst [smem:[#allocation72_spill]] %s15315_s1 }
   0x3   :  { %15472 = sst [smem:[#allocation73_spill]] %s15316_s2 }
   0x4   :  { %15473 = sst [smem:[#allocation74_spill]] %s15317_s3 }
   0x5   :  { %15474 = sst [smem:[#allocation75_spill]] %s15318_s4 }
   0x6   :  { %19 = vsyncpa [#allocation5], 0 }
   0x7   :  { %21 = vsyncpa [#allocation5 + $0x1], 0 }
   0x8   :  { %22 = vsyncpa [#allocation7], 0 }
   0x9   :  { %24 = vsyncpa [#allocation7 + $0x1], 0  ;;  %s12556_s25 = smov 0   ;;  %s12558_s26 = smov 0  }
   0xa   :  { %s12560_s27 = smov 0   ;;  %s12562_s28 = smov 0  }
   0xb LB: > { %s12577_s29 = sadd.s32 4294967295, %s12478_s28   ;;  %s9161_s30 = sadd.s32 4294967294, %s12478_s28   ;;  %s12478_s28 = sphi %s12562_s28, %s15730_s28   ;;  %s12474_s27 = sphi %s12560_s27, %s15729_s27   ;;  %s12470_s26 = sphi %s12558_s26, %s15728_s26   ;;  %s12466_s25 = sphi %s12556_s25, %s15727_s25  }
   0xc   : > { %s12581_s14 = sadd.s32 1, %s12478_s28   ;;  %s294_s15 = sadd.s32 1, %s12474_s27 }
   0xd   : > { %s291_s16 = ssub.s32 %s12478_s28, %s12581_s14  ;;  %p304_p0 = scmp.ne.s32.totalorder %s12474_s27, %s12470_s26 }
   0xe   : > { %p292_p1 = scmp.eq.s32.totalorder %s291_s16, 0  ;;  %p305_p2 = scmp.eq.s32.totalorder %s12577_s29, 1 }
   0xf   : > { %p310_p3 = scmp.ne.s32.totalorder %s12470_s26, %s12466_s25  ;;  %p311_p4 = scmp.eq.s32.totalorder %s9161_s30, 1 }
  0x10   : > { %s12592_s17 = scalar_select %p292_p1, %s12474_s27, %s294_s15  }
  0x11   : > { %p12594_p5 = por %p305_p2, %p304_p0  ;;  %p12598_p6 = por %p311_p4, %p310_p3 }
  0x12   : > { %p9164_p7 = scmp.ge.s32.totalorder %s12478_s28, 1  ;;  %p396_p8 = scmp.lt.s32.totalorder %s12478_s28, 3 }
  0x14   : > { %p397_p9 = pnand %p9164_p7, %p396_p8 }
  0x16   : > { %400 = sbr.rel (%p397_p9) target bundleno = 2413 (0x96d), region = 68 }
  0x1d   : > { %s15477_s1 = sld [smem:[#allocation72_spill]]  ;;  %vm737_vm0 = vcmask 1043456   ;;  %p445_p10 = scmp.lt.s32.totalorder %s12577_s29, 1  ;;  %vm640_vm1 = vcmask 31744   ;;  %vm450_vm2 = vcmask 64512   ;;  %vm523_vm3 = vcmask 261120  }
  0x1e   : > { %s15478_s0 = sld [smem:[#allocation71_spill]]  ;;  %s15479_s3 = sld [smem:[#allocation74_spill]] }
  0x1f   : > { %s446_s22 = scalar_select %p445_p10, %s12577_s29, 1 }
  0x20   : > { %s15480_s2 = sld [smem:[#allocation73_spill]]  ;;  %s15513_s4 = sld [smem:[#allocation75_spill]] }
  0x21   : > { %s9860_s23 = sshll.u32 %s446_s22, 8  ;;  %s9861_s22 = sshll.u32 %s12577_s29, 12 }
  0x23   : > { %v632_v0 = vld [vmem:[%s15477_s1] sm:$0xf] }
  0x24   : > { %10570 = vmatprep.subr.msk.mxu0 %vm737_vm0, %v632_v0  ;;  %11836 = vmatprep.subr.msk.mxu1 %vm737_vm0, %v632_v0  ;;  %s12612_s15 = scalar_lea.vmem %s15478_s0, %s9860_s23  ;;  %v1030_v33 = vld [vmem:[%s15479_s3] sm:$0xff]  ;;  %s12480_s23 = smov 96  }
  0x25   : > { %10571 = vmatpush3.msk.msra.mxu0 %vm737_vm0, %v632_v0  ;;  %11837 = vmatpush3.msk.msra.mxu1 %vm737_vm0, %v632_v0  ;;  %v600_v1 = vld [vmem:[%s12612_s15] sm:$0xff]  ;;  %v601_v2 = vld [vmem:[%s12612_s15 + $0x8] sm:$0xff]  ;;  %v602_v3 = vld [vmem:[%s12612_s15 + $0x10] sm:$0xff]  ;;  %s15196_s3 = scalar_lea.hbm %s15326_s12, %s9861_s22 }
  0x26   : > { %10572 = vmatprep.mubr.msk.f32.mxu0 %vm640_vm1, %v600_v1  ;;  %v603_v4 = vld [vmem:[%s12612_s15 + $0x18] sm:$0xff]  ;;  %v604_v5 = vld [vmem:[%s12612_s15 + $0x20] sm:$0xff]  ;;  %v605_v7 = vld [vmem:[%s12612_s15 + $0x28] sm:$0xff]  ;;  %10620 = vmatprep.subr.mxu1 %v1030_v33 }
  0x27   : > { %10573 = vmatmul.mubr.msk.f32.vlgmr.msra.gmra.mrb[0].mxu0 %vm640_vm1, %v601_v2  ;;  %v620_v6 = vld [vmem:[%s12612_s15 + $0xa0] sm:$0xff]  ;;  %v621_v8 = vld [vmem:[%s12612_s15 + $0xa8] sm:$0xff]  ;;  %v622_v9 = vld [vmem:[%s12612_s15 + $0xb0] sm:$0xff] }
  0x28   : > { %10575 = vmatprep.mubr.msk.f32.mxu0 %vm640_vm1, %v602_v3  ;;  %10602 = vmatprep.mubr.msk.f32.mxu1 %vm640_vm1, %v620_v6  ;;  %v606_v10 = vld [vmem:[%s12612_s15 + $0x30] sm:$0xff]  ;;  %v623_v11 = vld [vmem:[%s12612_s15 + $0xb8] sm:$0xff]  ;;  %v624_v12 = vld [vmem:[%s12612_s15 + $0xc0] sm:$0xff] }
  0x29   : > { %10603 = vmatmul.mubr.msk.f32.vlgmr.msra.gmra.mrb[0].mxu1 %vm640_vm1, %v621_v8  ;;  %v607_v13 = vld [vmem:[%s12612_s15 + $0x38] sm:$0xff]  ;;  %v608_v14 = vld [vmem:[%s12612_s15 + $0x40] sm:$0xff]  ;;  %v625_v15 = vld [vmem:[%s12612_s15 + $0xc8] sm:$0xff] }
  0x2a   : > { %10605 = vmatprep.mubr.msk.f32.mxu1 %vm640_vm1, %v622_v9  ;;  %v626_v16 = vld [vmem:[%s12612_s15 + $0xd0] sm:$0xff]  ;;  %v609_v17 = vld [vmem:[%s12612_s15 + $0x48] sm:$0xff]  ;;  %v627_v19 = vld [vmem:[%s12612_s15 + $0xd8] sm:$0xff]  ;;  %10621 = vmatpush3.msra.mxu1 %v1030_v33 }
  0x2b   : > { %10576 = vmatmul.mubr.msk.f32.gmra.mrb[2].mxu0 %vm640_vm1, %v603_v4  ;;  %v610_v18 = vld [vmem:[%s12612_s15 + $0x50] sm:$0xff]  ;;  %v628_v20 = vld [vmem:[%s12612_s15 + $0xe0] sm:$0xff]  ;;  %v611_v21 = vld [vmem:[%s12612_s15 + $0x58] sm:$0xff] }
  0x2c   : > { %10578 = vmatprep.mubr.msk.f32.mxu0 %vm640_vm1, %v604_v5  ;;  %v612_v22 = vld [vmem:[%s12612_s15 + $0x60] sm:$0xff]  ;;  %v629_v23 = vld [vmem:[%s12612_s15 + $0xe8] sm:$0xff]  ;;  %v614_v25 = vld [vmem:[%s12612_s15 + $0x70] sm:$0xff] }
  0x2d   : > { %10606 = vmatmul.mubr.msk.f32.gmra.mrb[2].mxu1 %vm640_vm1, %v623_v11  ;;  %v613_v24 = vld [vmem:[%s12612_s15 + $0x68] sm:$0xff]  ;;  %v615_v26 = vld [vmem:[%s12612_s15 + $0x78] sm:$0xff]  ;;  %v616_v27 = vld [vmem:[%s12612_s15 + $0x80] sm:$0xff] }
  0x2e   : > { %10608 = vmatprep.mubr.msk.f32.mxu1 %vm640_vm1, %v624_v12  ;;  %v617_v28 = vld [vmem:[%s12612_s15 + $0x88] sm:$0xff]  ;;  %v618_v29 = vld [vmem:[%s12612_s15 + $0x90] sm:$0xff]  ;;  %v619_v30 = vld [vmem:[%s12612_s15 + $0x98] sm:$0xff] }
  0x2f   : > { %10579 = vmatmul.mubr.msk.f32.gmra.mrb[4].mxu0 %vm640_vm1, %v605_v7  ;;  %v630_v31 = vld [vmem:[%s12612_s15 + $0xf0] sm:$0xff]  ;;  %v631_v32 = vld [vmem:[%s12612_s15 + $0xf8] sm:$0xff]  ;;  %v12684_v34 = vld [vmem:[%s15480_s2] ss:$0 sm:$0xff]  ;;  %s14146_s15 = sand.u32 1, %s12470_s26   ;;  %s12482_s2 = smov [#allocation4]  }
  0x30   : > { %10581 = vmatprep.mubr.msk.f32.mxu0 %vm640_vm1, %v606_v10  ;;  %s9165_s16 = sshll.u32 %s14146_s15, 8  ;;  %s9033_s30 = scalar_lea.sflag [#allocation5], %s14146_s15 }
  0x31   : > { %10609 = vmatmul.mubr.msk.f32.gmra.mrb[4].mxu1 %vm640_vm1, %v625_v15  ;;  %s14155_s20 = scalar_lea.vmem [#allocation4], %s9165_s16  ;;  %s12388_s0 = sshll.u32 %s12482_s2, 4  ;;  %s12389_s0 = int_to_ptr.vmem [resolvable:$false] %s12388_s0 }
  0x32   : > { %10611 = vmatprep.mubr.msk.f32.mxu1 %vm640_vm1, %v626_v16  ;;  %s12390_s1 = scalar_lea.vmem %s12389_s0, 8192 }
  0x33   : > { %10582 = vmatmul.mubr.msk.f32.gmra.mrb[6].mxu0 %vm640_vm1, %v607_v13 }
  0x34   : > { %10584 = vmatprep.mubr.msk.f32.mxu0 %vm640_vm1, %v608_v14 }
  0x35   : > { %10612 = vmatmul.mubr.msk.f32.gmra.mrb[6].mxu1 %vm640_vm1, %v627_v19 }
  0x36   : > { %10614 = vmatprep.mubr.msk.f32.mxu1 %vm640_vm1, %v628_v20 }
  0x37   : > { %10585 = vmatmul.mubr.msk.f32.gmra.mrb[8].mxu0 %vm640_vm1, %v609_v17 }
  0x38   : > { %10587 = vmatprep.mubr.msk.f32.mxu0 %vm640_vm1, %v610_v18 }
  0x39   : > { %10615 = vmatmul.mubr.msk.f32.gmra.mrb[8].mxu1 %vm640_vm1, %v629_v23 }
  0x3a   : > { %10617 = vmatprep.mubr.msk.f32.mxu1 %vm640_vm1, %v630_v31 }
  0x3b   : > { %10588 = vmatmul.mubr.msk.f32.gmra.mrb[10].mxu0 %vm640_vm1, %v611_v21 }
  0x3c   : > { %10590 = vmatprep.mubr.msk.f32.mxu0 %vm640_vm1, %v612_v22 }
  0x3d   : > { %10618 = vmatmul.mubr.msk.f32.gmra.mrb[10].mxu1 %vm640_vm1, %v631_v32 }
  0x3f   : > { %10591 = vmatmul.mubr.msk.f32.gmra.mrb[12].mxu0 %vm640_vm1, %v613_v24 }
  0x40   : > { %10593 = vmatprep.mubr.msk.f32.mxu0 %vm640_vm1, %v614_v25 }
  0x43   : > { %10594 = vmatmul.mubr.msk.f32.gmra.mrb[14].mxu0 %vm640_vm1, %v615_v26 }
  0x44   : > { %10596 = vmatprep.mubr.msk.f32.mxu0 %vm640_vm1, %v616_v27 }
  0x47   : > { %10597 = vmatmul.mubr.msk.f32.gmra.mrb[16].mxu0 %vm640_vm1, %v617_v28 }
  0x48   : > { %10599 = vmatprep.mubr.msk.f32.mxu0 %vm640_vm1, %v618_v29 }
  0x4b   : > { %10600 = vmatmul.mubr.msk.f32.gmra.mrb[18].mxu0 %vm640_vm1, %v619_v30 }
  0xfa   : > { %v10574_v35 = vpop.f32.mrb[0].mxu0 }
  0xfb   : > { %v807_v36 = vpop.f32.mrb[1].mxu0  ;;  %v12687_v37 = vadd.f32 %v10574_v35, %v12684_v34 }
  0xfc   : > { %v12690_v38 = vadd.f32 %v12684_v34, %v807_v36  ;;  %v12701_v46 = vpop.f32.mrb[0].mxu1 }
  0xfd   : > { %15481 = vst [vmem:[#allocation10_spill] sm:$0xff] %v12687_v37  ;;  %v967_v43 = vmul.f32 0.1, %v12687_v37  ;;  %v12703_v47 = vpop.f32.mrb[1].mxu1 }
  0xfe   : > { %15482 = vst [vmem:[#allocation11_spill] sm:$0xff] %v12690_v38  ;;  %v10577_v39 = vpop.f32.mrb[2].mxu0  ;;  %v966_v40 = vmul.f32 0.1, %v12690_v38 }
  0xff   : > { %v12694_v41 = vadd.f32 %v10577_v39, %v12684_v34  ;;  %v817_v42 = vpop.f32.mrb[3].mxu0  ;;  %v999_v55 = vmax.f32 %v12687_v37, %v967_v43  ;;  %v13436_v37 = vld [vmem:[%s15319_s5 + $0x20] sm:$0xff] }
 0x100   : > { %v12698_v44 = vadd.f32 %v12684_v34, %v817_v42  ;;  %v998_v45 = vmax.f32 %v12690_v38, %v966_v40  ;;  %v12716_v56 = vpop.f32.mrb[2].mxu1 }
 0x101   : > { %15483 = vst [vmem:[#allocation12_spill] sm:$0xff] %v12694_v41  ;;  %v969_v50 = vmul.f32 0.1, %v12694_v41  ;;  %v12718_v57 = vpop.f32.mrb[3].mxu1 }
 0x102   : > { %15484 = vst [vmem:[#allocation13_spill] sm:$0xff] %v12698_v44  ;;  %v10580_v48 = vpop.f32.mrb[4].mxu0  ;;  %1070 = vrot.lane.b32.xlu0 %v998_v45, %s12480_s23  ;;  %v968_v49 = vmul.f32 0.1, %v12698_v44 }
 0x103   : > { %v827_v51 = vpop.f32.mrb[5].mxu0  ;;  %v12709_v52 = vadd.f32 %v10580_v48, %v12684_v34  ;;  %v1001_v61 = vmax.f32 %v12694_v41, %v969_v50 }
 0x104   : > { %v12712_v53 = vadd.f32 %v12684_v34, %v827_v51  ;;  %v1000_v54 = vmax.f32 %v12698_v44, %v968_v49  ;;  %v12732_v2 = vpop.f32.mrb[4].mxu1 }
 0x105   : > { %15485 = vst [vmem:[#allocation14_spill] sm:$0xff] %v12709_v52  ;;  %v971_v62 = vmul.f32 0.1, %v12709_v52  ;;  %v12734_v3 = vpop.f32.mrb[5].mxu1 }
 0x106   : > { %15486 = vst [vmem:[#allocation15_spill] sm:$0xff] %v12712_v53  ;;  %v970_v58 = vmul.f32 0.1, %v12712_v53  ;;  %v10583_v59 = vpop.f32.mrb[6].mxu0  ;;  %1074 = vrot.lane.b32.xlu1 %v1000_v54, %s12480_s23  ;;  %1072 = vrot.lane.b32.xlu0 %v999_v55, %s12480_s23 }
 0x107   : > { %v837_v60 = vpop.f32.mrb[7].mxu0  ;;  %v12726_v63 = vadd.f32 %v10583_v59, %v12684_v34  ;;  %v1003_v10 = vmax.f32 %v12709_v52, %v971_v62 }
 0x108   : > { %v12729_v0 = vadd.f32 %v12684_v34, %v837_v60  ;;  %v1002_v1 = vmax.f32 %v12712_v53, %v970_v58  ;;  %v12748_v12 = vpop.f32.mrb[6].mxu1 }
 0x109   : > { %15487 = vst [vmem:[#allocation16_spill] sm:$0xff] %v12726_v63  ;;  %v973_v8 = vmul.f32 0.1, %v12726_v63  ;;  %v12750_v13 = vpop.f32.mrb[7].mxu1 }
 0x10a   : > { %15488 = vst [vmem:[#allocation17_spill] sm:$0xff] %v12729_v0  ;;  %v972_v4 = vmul.f32 0.1, %v12729_v0  ;;  %v10586_v5 = vpop.f32.mrb[8].mxu0  ;;  %1076 = vrot.lane.b32.xlu1 %v1001_v61, %s12480_s23  ;;  %1078 = vrot.lane.b32.xlu0 %v1002_v1, %s12480_s23  ;;  %v12809_v61 = vadd.f32 %v12684_v34, %v12703_v47 }
 0x10b   : > { %v12740_v6 = vadd.f32 %v10586_v5, %v12684_v34  ;;  %v847_v7 = vpop.f32.mrb[9].mxu0  ;;  %v1005_v20 = vmax.f32 %v12726_v63, %v973_v8 }
 0x10c   : > { %v12744_v9 = vadd.f32 %v12684_v34, %v847_v7  ;;  %v1004_v11 = vmax.f32 %v12729_v0, %v972_v4  ;;  %v12764_v22 = vpop.f32.mrb[8].mxu1  ;;  %15499 = vst [vmem:[#allocation28_spill] sm:$0xff] %v12809_v61  ;;  %v986_v47 = vmul.f32 0.1, %v12809_v61 }
 0x10d   : > { %15489 = vst [vmem:[#allocation18_spill] sm:$0xff] %v12740_v6  ;;  %v975_v16 = vmul.f32 0.1, %v12740_v6  ;;  %v12766_v23 = vpop.f32.mrb[9].mxu1 }
 0x10e   : > { %15490 = vst [vmem:[#allocation19_spill] sm:$0xff] %v12744_v9  ;;  %v974_v14 = vmul.f32 0.1, %v12744_v9  ;;  %v10589_v15 = vpop.f32.mrb[10].mxu0  ;;  %1080 = vrot.lane.b32.xlu1 %v1003_v10, %s12480_s23  ;;  %1082 = vrot.lane.b32.xlu0 %v1004_v11, %s12480_s23  ;;  %v12826_v11 = vadd.f32 %v12684_v34, %v12718_v57  ;;  %v12841_v57 = vadd.f32 %v12684_v34, %v12734_v3 }
 0x10f   : > { %v857_v17 = vpop.f32.mrb[11].mxu0  ;;  %v12757_v18 = vadd.f32 %v10589_v15, %v12684_v34  ;;  %v1007_v27 = vmax.f32 %v12740_v6, %v975_v16  ;;  %v12831_v15 = vadd.f32 %v12701_v46, %v12684_v34  ;;  %v12846_v46 = vadd.f32 %v12716_v56, %v12684_v34 }
 0x110   : > { %v12760_v19 = vadd.f32 %v12684_v34, %v857_v17  ;;  %v1006_v21 = vmax.f32 %v12744_v9, %v974_v14  ;;  %15502 = vst [vmem:[#allocation31_spill] sm:$0xff] %v12826_v11  ;;  %15504 = vst [vmem:[#allocation33_spill] sm:$0xff] %v12841_v57  ;;  %v12855_v3 = vadd.f32 %v12684_v34, %v12750_v13 }
 0x111   : > { %15491 = vst [vmem:[#allocation20_spill] sm:$0xff] %v12757_v18  ;;  %v977_v28 = vmul.f32 0.1, %v12757_v18  ;;  %15503 = vst [vmem:[#allocation32_spill] sm:$0xff] %v12831_v15  ;;  %v12860_v56 = vadd.f32 %v12732_v2, %v12684_v34  ;;  %v12871_v13 = vadd.f32 %v12684_v34, %v12766_v23  ;;  %v12878_v2 = vadd.f32 %v12748_v12, %v12684_v34 }
 0x112   : > { %15492 = vst [vmem:[#allocation21_spill] sm:$0xff] %v12760_v19  ;;  %v976_v24 = vmul.f32 0.1, %v12760_v19  ;;  %v10592_v25 = vpop.f32.mrb[12].mxu0  ;;  %1084 = vrot.lane.b32.xlu1 %v1005_v20, %s12480_s23  ;;  %1086 = vrot.lane.b32.xlu0 %v1006_v21, %s12480_s23  ;;  %v988_v20 = vmul.f32 0.1, %v12826_v11  ;;  %v1018_v21 = vmax.f32 %v12809_v61, %v986_v47 }
 0x113   : > { %v867_v26 = vpop.f32.mrb[13].mxu0  ;;  %v12774_v29 = vadd.f32 %v10592_v25, %v12684_v34  ;;  %v1009_v42 = vmax.f32 %v12757_v18, %v977_v28  ;;  %15505 = vst [vmem:[#allocation34_spill] sm:$0xff] %v12846_v46  ;;  %15506 = vst [vmem:[#allocation35_spill] sm:$0xff] %v12855_v3  ;;  %v989_v28 = vmul.f32 0.1, %v12846_v46  ;;  %v15328_v12 = vmov 0.0  }
 0x114   : > { %v12777_v30 = vadd.f32 %v12684_v34, %v867_v26  ;;  %v1008_v31 = vmax.f32 %v12760_v19, %v976_v24  ;;  %v987_v24 = vmul.f32 0.1, %v12831_v15  ;;  %v990_v26 = vmul.f32 0.1, %v12841_v57  ;;  %15507 = vst [vmem:[#allocation36_spill] sm:$0xff] %v12860_v56  ;;  %15508 = vst [vmem:[#allocation37_spill] sm:$0xff] %v12871_v13 }
 0x115   : > { %15493 = vst [vmem:[#allocation22_spill] sm:$0xff] %v12774_v29  ;;  %v979_v39 = vmul.f32 0.1, %v12774_v29  ;;  %15509 = vst [vmem:[#allocation38_spill] sm:$0xff] %v12878_v2  ;;  %v12889_v23 = vmul.f32 0.1, %v12871_v13 }
 0x116   : > { %15494 = vst [vmem:[#allocation23_spill] sm:$0xff] %v12777_v30  ;;  %v978_v32 = vmul.f32 0.1, %v12777_v30  ;;  %v10595_v33 = vpop.f32.mrb[14].mxu0  ;;  %1088 = vrot.lane.b32.xlu1 %v1007_v27, %s12480_s23  ;;  %1090 = vrot.lane.b32.xlu0 %v1008_v31, %s12480_s23  ;;  %v1020_v27 = vmax.f32 %v12826_v11, %v988_v20  ;;  %v1019_v31 = vmax.f32 %v12831_v15, %v987_v24  ;;  %457 = vst.msk [vmem:[#allocation2 + $0x30] sm:$0xff] %vm450_vm2, %v15328_v12 }
 0x117   : > { %v12784_v35 = vadd.f32 %v10595_v33, %v12684_v34  ;;  %v877_v36 = vpop.f32.mrb[15].mxu0  ;;  %v1011_v55 = vmax.f32 %v12774_v29, %v979_v39  ;;  %v1022_v33 = vmax.f32 %v12841_v57, %v990_v26  ;;  %v1021_v39 = vmax.f32 %v12846_v46, %v989_v28  ;;  %451 = vst.msk [vmem:[#allocation2] sm:$0xff] %vm450_vm2, %v15328_v12 }
 0x118   : > { %v12788_v40 = vadd.f32 %v12684_v34, %v877_v36  ;;  %v1010_v43 = vmax.f32 %v12777_v30, %v978_v32  ;;  %v12866_v32 = vmul.f32 0.1, %v12855_v3  ;;  %v12874_v36 = vmul.f32 0.1, %v12860_v56  ;;  %452 = vst.msk [vmem:[#allocation2 + $0x8] sm:$0xff] %vm450_vm2, %v15328_v12  ;;  %453 = vst.msk [vmem:[#allocation2 + $0x10] sm:$0xff] %vm450_vm2, %v15328_v12 }
 0x119   : > { %15495 = vst [vmem:[#allocation24_spill] sm:$0xff] %v12784_v35  ;;  %v981_v49 = vmul.f32 0.1, %v12784_v35  ;;  %454 = vst.msk [vmem:[#allocation2 + $0x18] sm:$0xff] %vm450_vm2, %v15328_v12 }
 0x11a   : > { %15496 = vst [vmem:[#allocation25_spill] sm:$0xff] %v12788_v40  ;;  %v980_v45 = vmul.f32 0.1, %v12788_v40  ;;  %v10598_v48 = vpop.f32.mrb[16].mxu0  ;;  %1092 = vrot.lane.b32.xlu1 %v1009_v42, %s12480_s23  ;;  %1094 = vrot.lane.b32.xlu0 %v1010_v43, %s12480_s23  ;;  %v12884_v42 = vld [vmem:[%s15319_s5 + $0x8] sm:$0xff]  ;;  %v1024_v43 = vmax.f32 %v12855_v3, %v12866_v32  ;;  %455 = vst.msk [vmem:[#allocation2 + $0x20] sm:$0xff] %vm450_vm2, %v15328_v12 }
 0x11b   : > { %v887_v50 = vpop.f32.mrb[17].mxu0  ;;  %v12797_v51 = vadd.f32 %v10598_v48, %v12684_v34  ;;  %v1013_v1 = vmax.f32 %v12784_v35, %v981_v49  ;;  %456 = vst.msk [vmem:[#allocation2 + $0x28] sm:$0xff] %vm450_vm2, %v15328_v12  ;;  %458 = vst.msk [vmem:[#allocation2 + $0x38] sm:$0xff] %vm450_vm2, %v15328_v12  ;;  %10670 = vmatprep.subr.mxu0 %v12884_v42  ;;  %v13041_v48 = vadd.f32 %v12764_v22, %v12684_v34 }
 0x11c   : > { %v12800_v54 = vadd.f32 %v12684_v34, %v887_v50  ;;  %v1012_v58 = vmax.f32 %v12788_v40, %v980_v45  ;;  %459 = vst.msk [vmem:[#allocation2 + $0x40] sm:$0xff] %vm450_vm2, %v15328_v12  ;;  %460 = vst.msk [vmem:[#allocation2 + $0x48] sm:$0xff] %vm450_vm2, %v15328_v12  ;;  %v993_v45 = vmul.f32 0.1, %v12878_v2  ;;  %v1023_v49 = vmax.f32 %v12860_v56, %v12874_v36 }
 0x11d   : > { %15497 = vst [vmem:[#allocation26_spill] sm:$0xff] %v12797_v51  ;;  %v983_v4 = vmul.f32 0.1, %v12797_v51  ;;  %461 = vst.msk [vmem:[#allocation2 + $0x50] sm:$0xff] %vm450_vm2, %v15328_v12  ;;  %10671 = vmatpush3.msra.mxu0 %v12884_v42  ;;  %v1026_v50 = vmax.f32 %v12871_v13, %v12889_v23 }
 0x11e   : > { %15498 = vst [vmem:[#allocation27_spill] sm:$0xff] %v12800_v54  ;;  %v982_v59 = vmul.f32 0.1, %v12800_v54  ;;  %v10601_v60 = vpop.f32.mrb[18].mxu0  ;;  %1096 = vrot.lane.b32.xlu1 %v1011_v55, %s12480_s23  ;;  %1098 = vrot.lane.b32.xlu0 %v1012_v58, %s12480_s23  ;;  %462 = vst.msk [vmem:[#allocation2 + $0x58] sm:$0xff] %vm450_vm2, %v15328_v12  ;;  %v1025_v22 = vmax.f32 %v12878_v2, %v993_v45 }
 0x11f   : > { %v897_v62 = vpop.f32.mrb[19].mxu0  ;;  %v12814_v5 = vadd.f32 %v10601_v60, %v12684_v34  ;;  %v1015_v16 = vmax.f32 %v12797_v51, %v983_v4  ;;  %463 = vst.msk [vmem:[#allocation2 + $0x60] sm:$0xff] %vm450_vm2, %v15328_v12  ;;  %464 = vst.msk [vmem:[#allocation2 + $0x68] sm:$0xff] %vm450_vm2, %v15328_v12  ;;  %v995_v55 = vmul.f32 0.1, %v13041_v48 }
 0x120   : > { %v12817_v7 = vadd.f32 %v12684_v34, %v897_v62  ;;  %v1014_v8 = vmax.f32 %v12800_v54, %v982_v59  ;;  %465 = vst.msk [vmem:[#allocation2 + $0x70] sm:$0xff] %vm450_vm2, %v15328_v12  ;;  %466 = vst.msk [vmem:[#allocation2 + $0x78] sm:$0xff] %vm450_vm2, %v15328_v12  ;;  %v10619_v59 = vpop.f32.mrb[10].mxu1  ;;  %v2230_v38 = vld [vmem:[#allocation2 + $0x11] sm:$0xff] }
 0x121   : > { %15500 = vst [vmem:[#allocation29_spill] sm:$0xff] %v12814_v5  ;;  %v985_v14 = vmul.f32 0.1, %v12814_v5  ;;  %467 = vst.msk [vmem:[#allocation2 + $0x80] sm:$0xff] %vm450_vm2, %v15328_v12  ;;  %v1027_v58 = vmax.f32 %v13041_v48, %v995_v55  ;;  %v13060_v60 = vadd.f32 %v10619_v59, %v12684_v34  ;;  %v957_v62 = vpop.f32.mrb[11].mxu1 }
 0x122   : > { %15501 = vst [vmem:[#allocation30_spill] sm:$0xff] %v12817_v7  ;;  %v984_v10 = vmul.f32 0.1, %v12817_v7  ;;  %1100 = vrot.lane.b32.xlu1 %v1013_v1, %s12480_s23  ;;  %1102 = vrot.lane.b32.xlu0 %v1014_v8, %s12480_s23  ;;  %468 = vst.msk [vmem:[#allocation2 + $0x88] sm:$0xff] %vm450_vm2, %v15328_v12  ;;  %v13063_v1 = vadd.f32 %v12684_v34, %v957_v62 }
 0x123   : > { %v1017_v25 = vmax.f32 %v12814_v5, %v985_v14  ;;  %469 = vst.msk [vmem:[#allocation2 + $0x90] sm:$0xff] %vm450_vm2, %v15328_v12  ;;  %470 = vst.msk [vmem:[#allocation2 + $0x98] sm:$0xff] %vm450_vm2, %v15328_v12  ;;  %v997_v4 = vmul.f32 0.1, %v13060_v60 }
 0x124   : > { %v1016_v17 = vmax.f32 %v12817_v7, %v984_v10  ;;  %471 = vst.msk [vmem:[#allocation2 + $0xa0] sm:$0xff] %vm450_vm2, %v15328_v12  ;;  %472 = vst.msk [vmem:[#allocation2 + $0xa8] sm:$0xff] %vm450_vm2, %v15328_v12  ;;  %v996_v8 = vmul.f32 0.1, %v13063_v1 }
 0x125   : > { %473 = vst.msk [vmem:[#allocation2 + $0xb0] sm:$0xff] %vm450_vm2, %v15328_v12  ;;  %474 = vst.msk [vmem:[#allocation2 + $0xb8] sm:$0xff] %vm450_vm2, %v15328_v12  ;;  %v1029_v10 = vmax.f32 %v13060_v60, %v997_v4 }
 0x126   : > { %1104 = vrot.lane.b32.xlu1 %v1015_v16, %s12480_s23  ;;  %1106 = vrot.lane.b32.xlu0 %v1016_v17, %s12480_s23  ;;  %475 = vst.msk [vmem:[#allocation2 + $0xc0] sm:$0xff] %vm450_vm2, %v15328_v12  ;;  %476 = vst.msk [vmem:[#allocation2 + $0xc8] sm:$0xff] %vm450_vm2, %v15328_v12  ;;  %v1028_v14 = vmax.f32 %v13063_v1, %v996_v8 }
 0x127   : > { %477 = vst.msk [vmem:[#allocation2 + $0xd0] sm:$0xff] %vm450_vm2, %v15328_v12  ;;  %478 = vst.msk [vmem:[#allocation2 + $0xd8] sm:$0xff] %vm450_vm2, %v15328_v12 }
 0x128   : > { %479 = vst.msk [vmem:[#allocation2 + $0xe0] sm:$0xff] %vm450_vm2, %v15328_v12  ;;  %480 = vst.msk [vmem:[#allocation2 + $0xe8] sm:$0xff] %vm450_vm2, %v15328_v12 }
 0x129   : > { %481 = vst.msk [vmem:[#allocation2 + $0xf0] sm:$0xff] %vm450_vm2, %v15328_v12  ;;  %482 = vst.msk [vmem:[#allocation2 + $0xf8] sm:$0xff] %vm450_vm2, %v15328_v12 }
 0x12a   : > { %1108 = vrot.lane.b32.xlu1 %v1017_v25, %s12480_s23  ;;  %1110 = vrot.lane.b32.xlu0 %v1018_v21, %s12480_s23  ;;  %483 = vst.msk [vmem:[#allocation2 + $0x100] sm:$0xff] %vm450_vm2, %v15328_v12  ;;  %484 = vst.msk [vmem:[#allocation2 + $0x108] sm:$0xff] %vm450_vm2, %v15328_v12 }
 0x12b   : > { %485 = vst.msk [vmem:[#allocation2 + $0x110] sm:$0xff] %vm450_vm2, %v15328_v12  ;;  %486 = vst.msk [vmem:[#allocation2 + $0x118] sm:$0xff] %vm450_vm2, %v15328_v12 }
 0x12c   : > { %487 = vst.msk [vmem:[#allocation2 + $0x120] sm:$0xff] %vm450_vm2, %v15328_v12  ;;  %488 = vst.msk [vmem:[#allocation2 + $0x128] sm:$0xff] %vm450_vm2, %v15328_v12 }
 0x12d   : > { %489 = vst.msk [vmem:[#allocation2 + $0x130] sm:$0xff] %vm450_vm2, %v15328_v12  ;;  %490 = vst.msk [vmem:[#allocation2 + $0x138] sm:$0xff] %vm450_vm2, %v15328_v12 }
 0x12e   : > { %1112 = vrot.lane.b32.xlu1 %v1019_v31, %s12480_s23  ;;  %1114 = vrot.lane.b32.xlu0 %v1020_v27, %s12480_s23  ;;  %491 = vst.msk [vmem:[#allocation2 + $0x140] sm:$0xff] %vm450_vm2, %v15328_v12  ;;  %492 = vst.msk [vmem:[#allocation2 + $0x148] sm:$0xff] %vm450_vm2, %v15328_v12 }
 0x12f   : > { %493 = vst.msk [vmem:[#allocation2 + $0x150] sm:$0xff] %vm450_vm2, %v15328_v12  ;;  %494 = vst.msk [vmem:[#allocation2 + $0x158] sm:$0xff] %vm450_vm2, %v15328_v12 }
 0x130   : > { %495 = vst.msk [vmem:[#allocation2 + $0x160] sm:$0xff] %vm450_vm2, %v15328_v12  ;;  %496 = vst.msk [vmem:[#allocation2 + $0x168] sm:$0xff] %vm450_vm2, %v15328_v12 }
 0x131   : > { %497 = vst.msk [vmem:[#allocation2 + $0x170] sm:$0xff] %vm450_vm2, %v15328_v12  ;;  %498 = vst.msk [vmem:[#allocation2 + $0x178] sm:$0xff] %vm450_vm2, %v15328_v12 }
 0x132   : > { %1116 = vrot.lane.b32.xlu1 %v1021_v39, %s12480_s23  ;;  %1118 = vrot.lane.b32.xlu0 %v1022_v33, %s12480_s23  ;;  %499 = vst.msk [vmem:[#allocation2 + $0x180] sm:$0xff] %vm450_vm2, %v15328_v12  ;;  %500 = vst.msk [vmem:[#allocation2 + $0x188] sm:$0xff] %vm450_vm2, %v15328_v12 }
 0x133   : > { %501 = vst.msk [vmem:[#allocation2 + $0x190] sm:$0xff] %vm450_vm2, %v15328_v12  ;;  %502 = vst.msk [vmem:[#allocation2 + $0x198] sm:$0xff] %vm450_vm2, %v15328_v12 }
 0x134   : > { %503 = vst.msk [vmem:[#allocation2 + $0x1a0] sm:$0xff] %vm450_vm2, %v15328_v12  ;;  %504 = vst.msk [vmem:[#allocation2 + $0x1a8] sm:$0xff] %vm450_vm2, %v15328_v12 }
 0x135   : > { %505 = vst.msk [vmem:[#allocation2 + $0x1b0] sm:$0xff] %vm450_vm2, %v15328_v12  ;;  %506 = vst.msk [vmem:[#allocation2 + $0x1b8] sm:$0xff] %vm450_vm2, %v15328_v12 }
 0x136   : > { %507 = vst.msk [vmem:[#allocation2 + $0x1c0] sm:$0xff] %vm450_vm2, %v15328_v12  ;;  %508 = vst.msk [vmem:[#allocation2 + $0x1c8] sm:$0xff] %vm450_vm2, %v15328_v12  ;;  %1120 = vrot.lane.b32.xlu1 %v1023_v49, %s12480_s23  ;;  %1122 = vrot.lane.b32.xlu0 %v1024_v43, %s12480_s23 }
 0x137   : > { %509 = vst.msk [vmem:[#allocation2 + $0x1d0] sm:$0xff] %vm450_vm2, %v15328_v12  ;;  %510 = vst.msk [vmem:[#allocation2 + $0x1d8] sm:$0xff] %vm450_vm2, %v15328_v12 }
 0x138   : > { %511 = vst.msk [vmem:[#allocation2 + $0x1e0] sm:$0xff] %vm450_vm2, %v15328_v12  ;;  %512 = vst.msk [vmem:[#allocation2 + $0x1e8] sm:$0xff] %vm450_vm2, %v15328_v12 }
 0x139   : > { %513 = vst.msk [vmem:[#allocation2 + $0x1f0] sm:$0xff] %vm450_vm2, %v15328_v12  ;;  %514 = vst.msk [vmem:[#allocation2 + $0x1f8] sm:$0xff] %vm450_vm2, %v15328_v12 }
 0x13a   : > { %515 = vst.msk [vmem:[#allocation2 + $0x200] sm:$0xff] %vm450_vm2, %v15328_v12  ;;  %516 = vst.msk [vmem:[#allocation2 + $0x208] sm:$0xff] %vm450_vm2, %v15328_v12  ;;  %1124 = vrot.lane.b32.xlu1 %v1025_v22, %s12480_s23  ;;  %1126 = vrot.lane.b32.xlu0 %v1026_v50, %s12480_s23 }
 0x13b   : > { %517 = vst.msk [vmem:[#allocation2 + $0x210] sm:$0xff] %vm450_vm2, %v15328_v12  ;;  %518 = vst.msk [vmem:[#allocation2 + $0x218] sm:$0xff] %vm450_vm2, %v15328_v12 }
 0x13c   : > { %519 = vst.msk [vmem:[#allocation2 + $0x220] sm:$0xff] %vm450_vm2, %v15328_v12  ;;  %520 = vst.msk [vmem:[#allocation2 + $0x228] sm:$0xff] %vm450_vm2, %v15328_v12 }
 0x13d   : > { %521 = vst.msk [vmem:[#allocation2 + $0x230] sm:$0xff] %vm450_vm2, %v15328_v12  ;;  %522 = vst.msk [vmem:[#allocation2 + $0x238] sm:$0xff] %vm450_vm2, %v15328_v12 }
 0x13e   : > { %15510 = vst [vmem:[#allocation39_spill] sm:$0xff] %v13041_v48  ;;  %1128 = vrot.lane.b32.xlu1 %v1027_v58, %s12480_s23  ;;  %15511 = vst [vmem:[#allocation40_spill] sm:$0xff] %v13060_v60  ;;  %1130 = vrot.lane.b32.xlu0 %v1028_v14, %s12480_s23  ;;  %v1554_v14 = vld [vmem:[#allocation2 + $0x10] sm:$0xff] }
 0x13f   : > { %15512 = vst [vmem:[#allocation41_spill] sm:$0xff] %v13063_v1 }
 0x142   : > { %1132 = vrot.lane.b32.xlu1 %v1029_v10, %s12480_s23 }
 0x174   : > { %v1071_v47 = vpop.permute.xlu0 %1070 }
 0x175   : > { %10622 = vmatprep.mubr.msk.f32.mxu1 %vm450_vm2, %v1071_v47  ;;  %v1553_v47 = vld [vmem:[#allocation2 + $0x8] sm:$0xff] }
 0x176   : > { %10672 = vmatprep.mubr.msk.f32.mxu0 %vm450_vm2, %v1553_v47 }
 0x177   : > { %10673 = vmatmul.mubr.msk.f32.vlgmr.msra.gmra.mrb[20].mxu0 %vm450_vm2, %v1554_v14 }
 0x178   : > { %v1075_v16 = vpop.permute.xlu1 %1074  ;;  %v1073_v17 = vpop.permute.xlu0 %1072 }
 0x179   : > { %10623 = vmatmul.mubr.msk.f32.vlgmr.msra.gmra.mrb[12].mxu1 %vm450_vm2, %v1073_v17 }
 0x17a   : > { %10625 = vmatprep.mubr.msk.f32.mxu1 %vm450_vm2, %v1075_v16  ;;  %v1552_v16 = vld [vmem:[%s15319_s5] sm:$0xff] }
 0x17b   : > { %10720 = vmatprep.subr.mxu0 %v1552_v16 }
 0x17c   : > { %v1077_v34 = vpop.permute.xlu1 %1076  ;;  %v1079_v20 = vpop.permute.xlu0 %1078  ;;  %10721 = vmatpush3.msra.mxu0 %v1552_v16 }
 0x17d   : > { %10626 = vmatmul.mubr.msk.f32.gmra.mrb[14].mxu1 %vm450_vm2, %v1077_v34 }
 0x17e   : > { %10628 = vmatprep.mubr.msk.f32.mxu1 %vm450_vm2, %v1079_v20  ;;  %v13111_v20 = vld [vmem:[%s15319_s5 + $0x10] sm:$0xff] }
 0x17f   : > { %10770 = vmatprep.subr.mxu0 %v13111_v20 }
 0x180   : > { %v1081_v21 = vpop.permute.xlu1 %1080  ;;  %v1083_v24 = vpop.permute.xlu0 %1082 }
 0x181   : > { %10629 = vmatmul.mubr.msk.f32.gmra.mrb[16].mxu1 %vm450_vm2, %v1081_v21  ;;  %v13117_v21 = vld [vmem:[%s15513_s4] ss:$0 sm:$0xff]  ;;  %s9051_s4 = sshll.u32 %s14155_s20, 4  ;;  %s15199_s4 = int_to_ptr.vmem [resolvable:$true] %s9051_s4 }
 0x182   : > { %10631 = vmatprep.mubr.msk.f32.mxu1 %vm450_vm2, %v1083_v24  ;;  %s12384_s16 = scalar_lea.vmem %s15199_s4, 4096  ;;  %p12391_p0 = scmp.lt.s32.totalorder %s15199_s4, %s12389_s0 }
 0x183   : > { %p12385_p11 = scmp.ne.s32.totalorder %s15199_s4, %s12384_s16  ;;  %p12392_p1 = scmp.lt.s32.totalorder %s12390_s1, %s12384_s16 }
 0x184   : > { %v1085_v25 = vpop.permute.xlu1 %1084  ;;  %v1087_v26 = vpop.permute.xlu0 %1086 }
 0x185   : > { %10632 = vmatmul.mubr.msk.f32.gmra.mrb[18].mxu1 %vm450_vm2, %v1085_v25  ;;  %p12386_p12 = pnand %p12385_p11, %p12594_p5  ;;  %p12393_p2 = por %p12392_p1, %p12391_p0 }
 0x186   : > { %10634 = vmatprep.mubr.msk.f32.mxu1 %vm450_vm2, %v1087_v26 }
 0x187   : > { %p12387_p13 = pneg %p12386_p12 }
 0x188   : > { %v1089_v27 = vpop.permute.xlu1 %1088  ;;  %v1091_v28 = vpop.permute.xlu0 %1090 }
 0x189   : > { %10635 = vmatmul.mubr.msk.f32.gmra.mrb[20].mxu1 %vm450_vm2, %v1089_v27  ;;  %p12394_p3 = pnand %p12393_p2, %p12387_p13 }
 0x18a   : > { %10637 = vmatprep.mubr.msk.f32.mxu1 %vm450_vm2, %v1091_v28 }
 0x18c   : > { %v1093_v31 = vpop.permute.xlu1 %1092  ;;  %v1095_v32 = vpop.permute.xlu0 %1094 }
 0x18d   : > { %10638 = vmatmul.mubr.msk.f32.gmra.mrb[22].mxu1 %vm450_vm2, %v1093_v31 }
 0x18e   : > { %10640 = vmatprep.mubr.msk.f32.mxu1 %vm450_vm2, %v1095_v32 }
 0x190   : > { %v1097_v33 = vpop.permute.xlu1 %1096  ;;  %v1099_v36 = vpop.permute.xlu0 %1098 }
 0x191   : > { %10641 = vmatmul.mubr.msk.f32.gmra.mrb[24].mxu1 %vm450_vm2, %v1097_v33 }
 0x192   : > { %10643 = vmatprep.mubr.msk.f32.mxu1 %vm450_vm2, %v1099_v36 }
 0x194   : > { %v1101_v39 = vpop.permute.xlu1 %1100  ;;  %v1103_v42 = vpop.permute.xlu0 %1102 }
 0x195   : > { %10644 = vmatmul.mubr.msk.f32.gmra.mrb[26].mxu1 %vm450_vm2, %v1101_v39 }
 0x196   : > { %10646 = vmatprep.mubr.msk.f32.mxu1 %vm450_vm2, %v1103_v42 }
 0x198   : > { %v1105_v23 = vpop.permute.xlu1 %1104  ;;  %v1107_v43 = vpop.permute.xlu0 %1106 }
 0x199   : > { %10647 = vmatmul.mubr.msk.f32.gmra.mrb[28].mxu1 %vm450_vm2, %v1105_v23 }
 0x19a   : > { %10649 = vmatprep.mubr.msk.f32.mxu1 %vm450_vm2, %v1107_v43 }
 0x19c   : > { %v1109_v45 = vpop.permute.xlu1 %1108  ;;  %v1111_v49 = vpop.permute.xlu0 %1110 }
 0x19d   : > { %10650 = vmatmul.mubr.msk.f32.gmra.mrb[30].mxu1 %vm450_vm2, %v1109_v45 }
 0x19e   : > { %10652 = vmatprep.mubr.msk.f32.mxu1 %vm450_vm2, %v1111_v49 }
 0x1a0   : > { %v1113_v50 = vpop.permute.xlu1 %1112  ;;  %v1115_v55 = vpop.permute.xlu0 %1114 }
 0x1a1   : > { %10653 = vmatmul.mubr.msk.f32.gmra.mrb[32].mxu1 %vm450_vm2, %v1113_v50 }
 0x1a2   : > { %10655 = vmatprep.mubr.msk.f32.mxu1 %vm450_vm2, %v1115_v55 }
 0x1a4   : > { %v1117_v22 = vpop.permute.xlu1 %1116  ;;  %v1119_v58 = vpop.permute.xlu0 %1118 }
 0x1a5   : > { %10656 = vmatmul.mubr.msk.f32.gmra.mrb[34].mxu1 %vm450_vm2, %v1117_v22 }
 0x1a6   : > { %10658 = vmatprep.mubr.msk.f32.mxu1 %vm450_vm2, %v1119_v58 }
 0x1a8   : > { %v1121_v59 = vpop.permute.xlu1 %1120  ;;  %v1123_v62 = vpop.permute.xlu0 %1122 }
 0x1a9   : > { %10659 = vmatmul.mubr.msk.f32.gmra.mrb[36].mxu1 %vm450_vm2, %v1121_v59 }
 0x1aa   : > { %10661 = vmatprep.mubr.msk.f32.mxu1 %vm450_vm2, %v1123_v62 }
 0x1ac   : > { %v1125_v4 = vpop.permute.xlu1 %1124  ;;  %v1127_v8 = vpop.permute.xlu0 %1126 }
 0x1ad   : > { %10662 = vmatmul.mubr.msk.f32.gmra.mrb[38].mxu1 %vm450_vm2, %v1125_v4 }
 0x1ae   : > { %10664 = vmatprep.mubr.msk.f32.mxu1 %vm450_vm2, %v1127_v8 }
 0x1b0   : > { %v1129_v10 = vpop.permute.xlu1 %1128  ;;  %v1131_v17 = vpop.permute.xlu0 %1130 }
 0x1b1   : > { %10665 = vmatmul.mubr.msk.f32.gmra.mrb[40].mxu1 %vm450_vm2, %v1129_v10 }
 0x1b2   : > { %10667 = vmatprep.mubr.msk.f32.mxu1 %vm450_vm2, %v1131_v17 }
 0x1b4   : > { %v1133_v34 = vpop.permute.xlu1 %1132 }
 0x1b5   : > { %10668 = vmatmul.mubr.msk.f32.gmra.mrb[42].mxu1 %vm450_vm2, %v1133_v34 }
 0x24c   : > { %v10624_v24 = vpop.f32.mrb[12].mxu1 }
 0x24d   : > { %v1270_v25 = vadd.f32 %v10624_v24, %v13117_v21  ;;  %v1264_v26 = vpop.f32.mrb[13].mxu1 }
 0x24e   : > { %v1265_v27 = vadd.f32 %v13117_v21, %v1264_v26 }
 0x24f   : > { %v1424_v28 = vmul.f32 0.1, %v1270_v25 }
 0x250   : > { %v1423_v31 = vmul.f32 0.1, %v1265_v27  ;;  %v10627_v32 = vpop.f32.mrb[14].mxu1 }
 0x251   : > { %v1456_v33 = vmax.f32 %v1270_v25, %v1424_v28  ;;  %v1280_v36 = vadd.f32 %v10627_v32, %v13117_v21  ;;  %v1274_v39 = vpop.f32.mrb[15].mxu1 }
 0x252   : > { %v1455_v42 = vmax.f32 %v1265_v27, %v1423_v31  ;;  %v1275_v23 = vadd.f32 %v13117_v21, %v1274_v39 }
 0x253   : > { %1489 = vst.msk [vmem:[#allocation2 + $0x30] sm:$0xff] %vm450_vm2, %v1456_v33  ;;  %v1426_v43 = vmul.f32 0.1, %v1280_v36 }
 0x254   : > { %1488 = vst.msk [vmem:[#allocation2 + $0x28] sm:$0xff] %vm450_vm2, %v1455_v42  ;;  %v1425_v45 = vmul.f32 0.1, %v1275_v23  ;;  %v10630_v49 = vpop.f32.mrb[16].mxu1 }
 0x255   : > { %v1458_v50 = vmax.f32 %v1280_v36, %v1426_v43  ;;  %v1290_v55 = vadd.f32 %v10630_v49, %v13117_v21  ;;  %v1284_v22 = vpop.f32.mrb[17].mxu1 }
 0x256   : > { %v1457_v58 = vmax.f32 %v1275_v23, %v1425_v45  ;;  %v1285_v59 = vadd.f32 %v13117_v21, %v1284_v22 }
 0x257   : > { %1491 = vst.msk [vmem:[#allocation2 + $0x50] sm:$0xff] %vm450_vm2, %v1458_v50  ;;  %v1428_v62 = vmul.f32 0.1, %v1290_v55 }
 0x258   : > { %1490 = vst.msk [vmem:[#allocation2 + $0x48] sm:$0xff] %vm450_vm2, %v1457_v58  ;;  %v1427_v4 = vmul.f32 0.1, %v1285_v59  ;;  %v10633_v8 = vpop.f32.mrb[18].mxu1 }
 0x259   : > { %v1460_v10 = vmax.f32 %v1290_v55, %v1428_v62  ;;  %v1300_v47 = vadd.f32 %v10633_v8, %v13117_v21  ;;  %v1294_v14 = vpop.f32.mrb[19].mxu1 }
 0x25a   : > { %v1459_v16 = vmax.f32 %v1285_v59, %v1427_v4  ;;  %v1295_v17 = vadd.f32 %v13117_v21, %v1294_v14  ;;  %v13137_v27 = vld [vmem:[#allocation2 + $0x30] sm:$0xff] }
 0x25b   : > { %1493 = vst.msk [vmem:[#allocation2 + $0x70] sm:$0xff] %vm450_vm2, %v1460_v10  ;;  %v1430_v34 = vmul.f32 0.1, %v1300_v47  ;;  %v13132_v24 = vld [vmem:[#allocation2 + $0x28] sm:$0xff] }
 0x25c   : > { %1492 = vst.msk [vmem:[#allocation2 + $0x68] sm:$0xff] %vm450_vm2, %v1459_v16  ;;  %v1429_v25 = vmul.f32 0.1, %v1295_v17  ;;  %v10636_v26 = vpop.f32.mrb[20].mxu1  ;;  %10675 = vmatprep.mubr.msk.f32.mxu0 %vm450_vm2, %v13132_v24 }
 0x25d   : > { %v1462_v28 = vmax.f32 %v1300_v47, %v1430_v34  ;;  %v1310_v31 = vadd.f32 %v10636_v26, %v13117_v21  ;;  %v1304_v32 = vpop.f32.mrb[21].mxu1  ;;  %10676 = vmatmul.mubr.msk.f32.gmra.mrb[22].mxu0 %vm450_vm2, %v13137_v27 }
 0x25e   : > { %v1461_v33 = vmax.f32 %v1295_v17, %v1429_v25  ;;  %v1305_v36 = vadd.f32 %v13117_v21, %v1304_v32  ;;  %v13149_v45 = vld [vmem:[#allocation2 + $0x50] sm:$0xff] }
 0x25f   : > { %1495 = vst.msk [vmem:[#allocation2 + $0x90] sm:$0xff] %vm450_vm2, %v1462_v28  ;;  %v1432_v39 = vmul.f32 0.1, %v1310_v31  ;;  %v13144_v42 = vld [vmem:[#allocation2 + $0x48] sm:$0xff] }
 0x260   : > { %1494 = vst.msk [vmem:[#allocation2 + $0x88] sm:$0xff] %vm450_vm2, %v1461_v33  ;;  %v1431_v23 = vmul.f32 0.1, %v1305_v36  ;;  %v10639_v43 = vpop.f32.mrb[22].mxu1  ;;  %10678 = vmatprep.mubr.msk.f32.mxu0 %vm450_vm2, %v13144_v42 }
 0x261   : > { %v1464_v49 = vmax.f32 %v1310_v31, %v1432_v39  ;;  %v1320_v50 = vadd.f32 %v10639_v43, %v13117_v21  ;;  %v1314_v55 = vpop.f32.mrb[23].mxu1  ;;  %10679 = vmatmul.mubr.msk.f32.gmra.mrb[24].mxu0 %vm450_vm2, %v13149_v45 }
 0x262   : > { %v1463_v22 = vmax.f32 %v1305_v36, %v1431_v23  ;;  %v1315_v58 = vadd.f32 %v13117_v21, %v1314_v55  ;;  %v13161_v10 = vld [vmem:[#allocation2 + $0x70] sm:$0xff] }
 0x263   : > { %1497 = vst.msk [vmem:[#allocation2 + $0xb0] sm:$0xff] %vm450_vm2, %v1464_v49  ;;  %v1434_v59 = vmul.f32 0.1, %v1320_v50  ;;  %v13156_v62 = vld [vmem:[#allocation2 + $0x68] sm:$0xff] }
 0x264   : > { %1496 = vst.msk [vmem:[#allocation2 + $0xa8] sm:$0xff] %vm450_vm2, %v1463_v22  ;;  %v1433_v4 = vmul.f32 0.1, %v1315_v58  ;;  %v10642_v8 = vpop.f32.mrb[24].mxu1  ;;  %10681 = vmatprep.mubr.msk.f32.mxu0 %vm450_vm2, %v13156_v62  ;;  %v13324_v2 = vld [vmem:[#allocation2 + $0x67] sm:$0xff] }
 0x265   : > { %v1466_v47 = vmax.f32 %v1320_v50, %v1434_v59  ;;  %v1330_v14 = vadd.f32 %v10642_v8, %v13117_v21  ;;  %v1324_v16 = vpop.f32.mrb[25].mxu1  ;;  %10682 = vmatmul.mubr.msk.f32.gmra.mrb[26].mxu0 %vm450_vm2, %v13161_v10 }
 0x266   : > { %v1465_v17 = vmax.f32 %v1315_v58, %v1433_v4  ;;  %v1325_v34 = vadd.f32 %v13117_v21, %v1324_v16  ;;  %v13173_v32 = vld [vmem:[#allocation2 + $0x90] sm:$0xff] }
 0x267   : > { %1499 = vst.msk [vmem:[#allocation2 + $0xd0] sm:$0xff] %vm450_vm2, %v1466_v47  ;;  %v1436_v25 = vmul.f32 0.1, %v1330_v14  ;;  %v13168_v26 = vld [vmem:[#allocation2 + $0x88] sm:$0xff] }
 0x268   : > { %1498 = vst.msk [vmem:[#allocation2 + $0xc8] sm:$0xff] %vm450_vm2, %v1465_v17  ;;  %v1435_v28 = vmul.f32 0.1, %v1325_v34  ;;  %v10645_v31 = vpop.f32.mrb[26].mxu1  ;;  %10684 = vmatprep.mubr.msk.f32.mxu0 %vm450_vm2, %v13168_v26  ;;  %v13332_v57 = vld [vmem:[#allocation2 + $0x87] sm:$0xff]  ;;  %v13336_v56 = vld [vmem:[#allocation2 + $0x8f] sm:$0xff] }
 0x269   : > { %v1468_v33 = vmax.f32 %v1330_v14, %v1436_v25  ;;  %v1340_v36 = vadd.f32 %v10645_v31, %v13117_v21  ;;  %v1334_v39 = vpop.f32.mrb[27].mxu1  ;;  %10685 = vmatmul.mubr.msk.f32.gmra.mrb[28].mxu0 %vm450_vm2, %v13173_v32 }
 0x26a   : > { %v1467_v23 = vmax.f32 %v1325_v34, %v1435_v28  ;;  %v1335_v43 = vadd.f32 %v13117_v21, %v1334_v39  ;;  %v13185_v58 = vld [vmem:[#allocation2 + $0xb0] sm:$0xff] }
 0x26b   : > { %1501 = vst.msk [vmem:[#allocation2 + $0xf0] sm:$0xff] %vm450_vm2, %v1468_v33  ;;  %v1438_v49 = vmul.f32 0.1, %v1340_v36  ;;  %v13180_v50 = vld [vmem:[#allocation2 + $0xa8] sm:$0xff] }
 0x26c   : > { %1500 = vst.msk [vmem:[#allocation2 + $0xe8] sm:$0xff] %vm450_vm2, %v1467_v23  ;;  %v1437_v55 = vmul.f32 0.1, %v1335_v43  ;;  %v10648_v22 = vpop.f32.mrb[28].mxu1  ;;  %10687 = vmatprep.mubr.msk.f32.mxu0 %vm450_vm2, %v13180_v50  ;;  %v13340_v11 = vld [vmem:[#allocation2 + $0xa7] sm:$0xff]  ;;  %v13344_v46 = vld [vmem:[#allocation2 + $0xaf] sm:$0xff] }
 0x26d   : > { %v1470_v59 = vmax.f32 %v1340_v36, %v1438_v49  ;;  %v1350_v4 = vadd.f32 %v10648_v22, %v13117_v21  ;;  %v1344_v8 = vpop.f32.mrb[29].mxu1  ;;  %10688 = vmatmul.mubr.msk.f32.gmra.mrb[30].mxu0 %vm450_vm2, %v13185_v58 }
 0x26e   : > { %v1469_v47 = vmax.f32 %v1335_v43, %v1437_v55  ;;  %v1345_v14 = vadd.f32 %v13117_v21, %v1344_v8  ;;  %v13197_v28 = vld [vmem:[#allocation2 + $0xd0] sm:$0xff] }
 0x26f   : > { %1503 = vst.msk [vmem:[#allocation2 + $0x110] sm:$0xff] %vm450_vm2, %v1470_v59  ;;  %v1440_v16 = vmul.f32 0.1, %v1350_v4  ;;  %v13192_v17 = vld [vmem:[#allocation2 + $0xc8] sm:$0xff] }
 0x270   : > { %1502 = vst.msk [vmem:[#allocation2 + $0x108] sm:$0xff] %vm450_vm2, %v1469_v47  ;;  %v1439_v34 = vmul.f32 0.1, %v1345_v14  ;;  %v10651_v25 = vpop.f32.mrb[30].mxu1  ;;  %10690 = vmatprep.mubr.msk.f32.mxu0 %vm450_vm2, %v13192_v17  ;;  %v13348_v61 = vld [vmem:[#allocation2 + $0xc7] sm:$0xff]  ;;  %v13352_v15 = vld [vmem:[#allocation2 + $0xcf] sm:$0xff] }
 0x271   : > { %v1472_v31 = vmax.f32 %v1350_v4, %v1440_v16  ;;  %v1360_v33 = vadd.f32 %v10651_v25, %v13117_v21  ;;  %v1354_v36 = vpop.f32.mrb[31].mxu1  ;;  %10691 = vmatmul.mubr.msk.f32.gmra.mrb[32].mxu0 %vm450_vm2, %v13197_v28 }
 0x272   : > { %v1471_v39 = vmax.f32 %v1345_v14, %v1439_v34  ;;  %v1355_v23 = vadd.f32 %v13117_v21, %v1354_v36  ;;  %v13209_v59 = vld [vmem:[#allocation2 + $0xf0] sm:$0xff] }
 0x273   : > { %1505 = vst.msk [vmem:[#allocation2 + $0x130] sm:$0xff] %vm450_vm2, %v1472_v31  ;;  %v1442_v43 = vmul.f32 0.1, %v1360_v33  ;;  %v13204_v49 = vld [vmem:[#allocation2 + $0xe8] sm:$0xff] }
 0x274   : > { %1504 = vst.msk [vmem:[#allocation2 + $0x128] sm:$0xff] %vm450_vm2, %v1471_v39  ;;  %v1441_v55 = vmul.f32 0.1, %v1355_v23  ;;  %v10654_v22 = vpop.f32.mrb[32].mxu1  ;;  %10693 = vmatprep.mubr.msk.f32.mxu0 %vm450_vm2, %v13204_v49  ;;  %v13356_v7 = vld [vmem:[#allocation2 + $0xe7] sm:$0xff]  ;;  %v13360_v5 = vld [vmem:[#allocation2 + $0xef] sm:$0xff] }
 0x275   : > { %v1474_v4 = vmax.f32 %v1360_v33, %v1442_v43  ;;  %v1370_v8 = vadd.f32 %v10654_v22, %v13117_v21  ;;  %v1364_v47 = vpop.f32.mrb[33].mxu1  ;;  %10694 = vmatmul.mubr.msk.f32.gmra.mrb[34].mxu0 %vm450_vm2, %v13209_v59 }
 0x276   : > { %v1473_v14 = vmax.f32 %v1355_v23, %v1441_v55  ;;  %v1365_v16 = vadd.f32 %v13117_v21, %v1364_v47  ;;  %v13221_v33 = vld [vmem:[#allocation2 + $0x110] sm:$0xff] }
 0x277   : > { %1507 = vst.msk [vmem:[#allocation2 + $0x150] sm:$0xff] %vm450_vm2, %v1474_v4  ;;  %v1444_v34 = vmul.f32 0.1, %v1370_v8  ;;  %v13216_v25 = vld [vmem:[#allocation2 + $0x108] sm:$0xff] }
 0x278   : > { %1506 = vst.msk [vmem:[#allocation2 + $0x148] sm:$0xff] %vm450_vm2, %v1473_v14  ;;  %v1443_v31 = vmul.f32 0.1, %v1365_v16  ;;  %v10657_v36 = vpop.f32.mrb[34].mxu1  ;;  %10696 = vmatprep.mubr.msk.f32.mxu0 %vm450_vm2, %v13216_v25  ;;  %v13364_v54 = vld [vmem:[#allocation2 + $0x107] sm:$0xff]  ;;  %v13368_v51 = vld [vmem:[#allocation2 + $0x10f] sm:$0xff] }
 0x279   : > { %v1476_v39 = vmax.f32 %v1370_v8, %v1444_v34  ;;  %v1380_v43 = vadd.f32 %v10657_v36, %v13117_v21  ;;  %v1374_v23 = vpop.f32.mrb[35].mxu1  ;;  %10697 = vmatmul.mubr.msk.f32.gmra.mrb[36].mxu0 %vm450_vm2, %v13221_v33 }
 0x27a   : > { %v1475_v55 = vmax.f32 %v1365_v16, %v1443_v31  ;;  %v1375_v22 = vadd.f32 %v13117_v21, %v1374_v23  ;;  %v13233_v8 = vld [vmem:[#allocation2 + $0x130] sm:$0xff] }
 0x27b   : > { %1509 = vst.msk [vmem:[#allocation2 + $0x170] sm:$0xff] %vm450_vm2, %v1476_v39  ;;  %v1446_v4 = vmul.f32 0.1, %v1380_v43  ;;  %v13228_v47 = vld [vmem:[#allocation2 + $0x128] sm:$0xff] }
 0x27c   : > { %1508 = vst.msk [vmem:[#allocation2 + $0x168] sm:$0xff] %vm450_vm2, %v1475_v55  ;;  %v1445_v14 = vmul.f32 0.1, %v1375_v22  ;;  %v10660_v12 = vpop.f32.mrb[36].mxu1  ;;  %10699 = vmatprep.mubr.msk.f32.mxu0 %vm450_vm2, %v13228_v47  ;;  %v13372_v40 = vld [vmem:[#allocation2 + $0x127] sm:$0xff]  ;;  %v13376_v35 = vld [vmem:[#allocation2 + $0x12f] sm:$0xff] }
 0x27d   : > { %v1478_v34 = vmax.f32 %v1380_v43, %v1446_v4  ;;  %v1390_v36 = vadd.f32 %v10660_v12, %v13117_v21  ;;  %v1384_v16 = vpop.f32.mrb[37].mxu1  ;;  %10700 = vmatmul.mubr.msk.f32.gmra.mrb[38].mxu0 %vm450_vm2, %v13233_v8 }
 0x27e   : > { %v1477_v31 = vmax.f32 %v1375_v22, %v1445_v14  ;;  %v1385_v39 = vadd.f32 %v13117_v21, %v1384_v16  ;;  %v13245_v12 = vld [vmem:[#allocation2 + $0x150] sm:$0xff] }
 0x27f   : > { %1511 = vst.msk [vmem:[#allocation2 + $0x190] sm:$0xff] %vm450_vm2, %v1478_v34  ;;  %v1448_v23 = vmul.f32 0.1, %v1390_v36  ;;  %v13240_v55 = vld [vmem:[#allocation2 + $0x148] sm:$0xff] }
 0x280   : > { %1510 = vst.msk [vmem:[#allocation2 + $0x188] sm:$0xff] %vm450_vm2, %v1477_v31  ;;  %v1447_v1 = vmul.f32 0.1, %v1385_v39  ;;  %v10663_v60 = vpop.f32.mrb[38].mxu1  ;;  %10702 = vmatprep.mubr.msk.f32.mxu0 %vm450_vm2, %v13240_v55  ;;  %v13380_v30 = vld [vmem:[#allocation2 + $0x147] sm:$0xff]  ;;  %v13386_v6 = vld [vmem:[#allocation2 + $0x14f] sm:$0xff] }
 0x281   : > { %v1480_v43 = vmax.f32 %v1390_v36, %v1448_v23  ;;  %v1400_v4 = vadd.f32 %v10663_v60, %v13117_v21  ;;  %v1394_v22 = vpop.f32.mrb[39].mxu1  ;;  %10703 = vmatmul.mubr.msk.f32.gmra.mrb[40].mxu0 %vm450_vm2, %v13245_v12 }
 0x282   : > { %v1479_v14 = vmax.f32 %v1385_v39, %v1447_v1  ;;  %v1395_v34 = vadd.f32 %v13117_v21, %v1394_v22  ;;  %v13257_v60 = vld [vmem:[#allocation2 + $0x170] sm:$0xff] }
 0x283   : > { %1513 = vst.msk [vmem:[#allocation2 + $0x1b0] sm:$0xff] %vm450_vm2, %v1480_v43  ;;  %v1450_v16 = vmul.f32 0.1, %v1400_v4  ;;  %v13252_v31 = vld [vmem:[#allocation2 + $0x168] sm:$0xff] }
 0x284   : > { %1512 = vst.msk [vmem:[#allocation2 + $0x1a8] sm:$0xff] %vm450_vm2, %v1479_v14  ;;  %v1449_v13 = vmul.f32 0.1, %v1395_v34  ;;  %v10666_v48 = vpop.f32.mrb[40].mxu1  ;;  %10705 = vmatprep.mubr.msk.f32.mxu0 %vm450_vm2, %v13252_v31  ;;  %v13390_v63 = vld [vmem:[#allocation2 + $0x167] sm:$0xff]  ;;  %v13394_v41 = vld [vmem:[#allocation2 + $0x16f] sm:$0xff] }
 0x285   : > { %v1482_v36 = vmax.f32 %v1400_v4, %v1450_v16  ;;  %v1410_v23 = vadd.f32 %v10666_v48, %v13117_v21  ;;  %v1404_v1 = vpop.f32.mrb[41].mxu1  ;;  %10706 = vmatmul.mubr.msk.f32.gmra.mrb[42].mxu0 %vm450_vm2, %v13257_v60 }
 0x286   : > { %v1481_v39 = vmax.f32 %v1395_v34, %v1449_v13  ;;  %v1405_v43 = vadd.f32 %v13117_v21, %v1404_v1  ;;  %v13269_v4 = vld [vmem:[#allocation2 + $0x190] sm:$0xff]  ;;  %v1520_v1 = vld [vmem:[#allocation2 + $0x7] sm:$0xff] }
 0x287   : > { %1515 = vst.msk [vmem:[#allocation2 + $0x1d0] sm:$0xff] %vm450_vm2, %v1482_v36  ;;  %v1452_v22 = vmul.f32 0.1, %v1410_v23  ;;  %v13264_v14 = vld [vmem:[#allocation2 + $0x188] sm:$0xff] }
 0x288   : > { %1514 = vst.msk [vmem:[#allocation2 + $0x1c8] sm:$0xff] %vm450_vm2, %v1481_v39  ;;  %v1451_v3 = vmul.f32 0.1, %v1405_v43  ;;  %10708 = vmatprep.mubr.msk.f32.mxu0 %vm450_vm2, %v13264_v14  ;;  %v10669_v29 = vpop.f32.mrb[42].mxu1 }
 0x289   : > { %v1484_v48 = vmax.f32 %v1410_v23, %v1452_v22  ;;  %10709 = vmatmul.mubr.msk.f32.gmra.mrb[44].mxu0 %vm450_vm2, %v13269_v4  ;;  %v13303_v22 = vld [vmem:[%s15319_s5 + $0x18] sm:$0xff]  ;;  %v1420_v19 = vadd.f32 %v10669_v29, %v13117_v21  ;;  %v1414_v18 = vpop.f32.mrb[43].mxu1  ;;  %v13404_v29 = vld [vmem:[#allocation2 + $0x18f] sm:$0xff] }
 0x28a   : > { %v1483_v13 = vmax.f32 %v1405_v43, %v1451_v3  ;;  %v13279_v16 = vld [vmem:[#allocation2 + $0x1b0] sm:$0xff]  ;;  %v1415_v9 = vadd.f32 %v13117_v21, %v1414_v18  ;;  %v13399_v18 = vld [vmem:[#allocation2 + $0x187] sm:$0xff] }
 0x28b   : > { %1517 = vst.msk [vmem:[#allocation2 + $0x1f0] sm:$0xff] %vm450_vm2, %v1484_v48  ;;  %v13274_v34 = vld [vmem:[#allocation2 + $0x1a8] sm:$0xff]  ;;  %v1454_v0 = vmul.f32 0.1, %v1420_v19 }
 0x28c   : > { %1516 = vst.msk [vmem:[#allocation2 + $0x1e8] sm:$0xff] %vm450_vm2, %v1483_v13  ;;  %10711 = vmatprep.mubr.msk.f32.mxu0 %vm450_vm2, %v13274_v34  ;;  %v1521_v43 = vld [vmem:[#allocation2 + $0xf] sm:$0xff]  ;;  %v13306_v48 = vld [vmem:[#allocation2 + $0x27] sm:$0xff]  ;;  %v1453_v53 = vmul.f32 0.1, %v1415_v9 }
 0x28d   : > { %10712 = vmatmul.mubr.msk.f32.gmra.mrb[46].mxu0 %vm450_vm2, %v13279_v16  ;;  %v13312_v13 = vld [vmem:[#allocation2 + $0x2f] sm:$0xff]  ;;  %v1486_v52 = vmax.f32 %v1420_v19, %v1454_v0 }
 0x28e   : > { %v13287_v3 = vld [vmem:[#allocation2 + $0x1d0] sm:$0xff]  ;;  %v1485_v44 = vmax.f32 %v1415_v9, %v1453_v53  ;;  %v13408_v53 = vld [vmem:[#allocation2 + $0x1a7] sm:$0xff] }
 0x28f   : > { %v13283_v36 = vld [vmem:[#allocation2 + $0x1c8] sm:$0xff]  ;;  %1519 = vst.msk [vmem:[#allocation2 + $0x210] sm:$0xff] %vm450_vm2, %v1486_v52 }
 0x290   : > { %10714 = vmatprep.mubr.msk.f32.mxu0 %vm450_vm2, %v13283_v36  ;;  %1518 = vst.msk [vmem:[#allocation2 + $0x208] sm:$0xff] %vm450_vm2, %v1485_v44  ;;  %v13412_v52 = vld [vmem:[#allocation2 + $0x1af] sm:$0xff]  ;;  %v13416_v0 = vld [vmem:[#allocation2 + $0x1c7] sm:$0xff] }
 0x291   : > { %10715 = vmatmul.mubr.msk.f32.gmra.mrb[48].mxu0 %vm450_vm2, %v13287_v3  ;;  %v13420_v44 = vld [vmem:[#allocation2 + $0x1cf] sm:$0xff] }
 0x292   : > { %v13295_v39 = vld [vmem:[#allocation2 + $0x1f0] sm:$0xff] }
 0x293   : > { %v13291_v23 = vld [vmem:[#allocation2 + $0x1e8] sm:$0xff]  ;;  %15515 = vst [vmem:[#allocation43_spill] sm:$0xff] %v13295_v39 }
 0x294   : > { %15514 = vst [vmem:[#allocation42_spill] sm:$0xff] %v13291_v23  ;;  %10717 = vmatprep.mubr.msk.f32.mxu0 %vm450_vm2, %v13291_v23  ;;  %v13424_v9 = vld [vmem:[#allocation2 + $0x1e7] sm:$0xff]  ;;  %v13428_v21 = vld [vmem:[#allocation2 + $0x1ef] sm:$0xff] }
 0x295   : > { %10718 = vmatmul.mubr.msk.f32.gmra.mrb[50].mxu0 %vm450_vm2, %v13295_v39  ;;  %v2229_v19 = vld [vmem:[#allocation2 + $0x9] sm:$0xff]  ;;  %v13445_v23 = vld [vmem:[#allocation2 + $0x31] sm:$0xff] }
 0x296   : > { %10722 = vmatprep.mubr.msk.f32.mxu0 %vm450_vm2, %v1520_v1  ;;  %v13316_v1 = vld [vmem:[#allocation2 + $0x47] sm:$0xff]  ;;  %15517 = vst [vmem:[#allocation45_spill] sm:$0xff] %v13445_v23 }
 0x297   : > { %v13439_v39 = vld [vmem:[#allocation2 + $0x29] sm:$0xff] }
 0x298   : > { %15516 = vst [vmem:[#allocation44_spill] sm:$0xff] %v13439_v39 }
 0x299   : > { %10723 = vmatmul.mubr.msk.f32.vlgmr.msra.gmra.mrb[20].mxu0 %vm450_vm2, %v1521_v43  ;;  %v13320_v43 = vld [vmem:[#allocation2 + $0x4f] sm:$0xff] }
 0x29a   : > { %10725 = vmatprep.mubr.msk.f32.mxu0 %vm450_vm2, %v13306_v48  ;;  %10771 = vmatpush3.msra.mxu0 %v13111_v20  ;;  %v13328_v20 = vld [vmem:[#allocation2 + $0x6f] sm:$0xff] }
 0x29b   : > { %10820 = vmatprep.subr.mxu0 %v13303_v22 }
 0x29d   : > { %10726 = vmatmul.mubr.msk.f32.gmra.mrb[22].mxu0 %vm450_vm2, %v13312_v13 }
 0x29e   : > { %10728 = vmatprep.mubr.msk.f32.mxu0 %vm450_vm2, %v13316_v1 }
 0x2a1   : > { %10729 = vmatmul.mubr.msk.f32.gmra.mrb[24].mxu0 %vm450_vm2, %v13320_v43 }
 0x2a2   : > { %10731 = vmatprep.mubr.msk.f32.mxu0 %vm450_vm2, %v13324_v2 }
 0x2a5   : > { %10732 = vmatmul.mubr.msk.f32.gmra.mrb[26].mxu0 %vm450_vm2, %v13328_v20 }
 0x2a6   : > { %10734 = vmatprep.mubr.msk.f32.mxu0 %vm450_vm2, %v13332_v57 }
 0x2a9   : > { %10735 = vmatmul.mubr.msk.f32.gmra.mrb[28].mxu0 %vm450_vm2, %v13336_v56 }
 0x2aa   : > { %10737 = vmatprep.mubr.msk.f32.mxu0 %vm450_vm2, %v13340_v11 }
 0x2ad   : > { %10738 = vmatmul.mubr.msk.f32.gmra.mrb[30].mxu0 %vm450_vm2, %v13344_v46 }
 0x2ae   : > { %10740 = vmatprep.mubr.msk.f32.mxu0 %vm450_vm2, %v13348_v61 }
 0x2b1   : > { %10741 = vmatmul.mubr.msk.f32.gmra.mrb[32].mxu0 %vm450_vm2, %v13352_v15 }
 0x2b2   : > { %10743 = vmatprep.mubr.msk.f32.mxu0 %vm450_vm2, %v13356_v7 }
 0x2b5   : > { %10744 = vmatmul.mubr.msk.f32.gmra.mrb[34].mxu0 %vm450_vm2, %v13360_v5 }
 0x2b6   : > { %10746 = vmatprep.mubr.msk.f32.mxu0 %vm450_vm2, %v13364_v54 }
 0x2b9   : > { %10747 = vmatmul.mubr.msk.f32.gmra.mrb[36].mxu0 %vm450_vm2, %v13368_v51 }
 0x2ba   : > { %10749 = vmatprep.mubr.msk.f32.mxu0 %vm450_vm2, %v13372_v40 }
 0x2bd   : > { %10750 = vmatmul.mubr.msk.f32.gmra.mrb[38].mxu0 %vm450_vm2, %v13376_v35 }
 0x2be   : > { %10752 = vmatprep.mubr.msk.f32.mxu0 %vm450_vm2, %v13380_v30 }
 0x2c1   : > { %10753 = vmatmul.mubr.msk.f32.gmra.mrb[40].mxu0 %vm450_vm2, %v13386_v6 }
 0x2c2   : > { %10755 = vmatprep.mubr.msk.f32.mxu0 %vm450_vm2, %v13390_v63 }
 0x2c5   : > { %10756 = vmatmul.mubr.msk.f32.gmra.mrb[42].mxu0 %vm450_vm2, %v13394_v41 }
 0x2c6   : > { %10758 = vmatprep.mubr.msk.f32.mxu0 %vm450_vm2, %v13399_v18 }
 0x2c9   : > { %10759 = vmatmul.mubr.msk.f32.gmra.mrb[44].mxu0 %vm450_vm2, %v13404_v29 }
 0x2ca   : > { %10761 = vmatprep.mubr.msk.f32.mxu0 %vm450_vm2, %v13408_v53 }
 0x2cd   : > { %10762 = vmatmul.mubr.msk.f32.gmra.mrb[46].mxu0 %vm450_vm2, %v13412_v52 }
 0x2ce   : > { %10764 = vmatprep.mubr.msk.f32.mxu0 %vm450_vm2, %v13416_v0 }
 0x2d1   : > { %10765 = vmatmul.mubr.msk.f32.gmra.mrb[48].mxu0 %vm450_vm2, %v13420_v44 }
 0x2d2   : > { %10767 = vmatprep.mubr.msk.f32.mxu0 %vm450_vm2, %v13424_v9 }
 0x2d5   : > { %10768 = vmatmul.mubr.msk.f32.gmra.mrb[50].mxu0 %vm450_vm2, %v13428_v21 }
 0x2d6   : > { %10772 = vmatprep.mubr.msk.f32.mxu0 %vm450_vm2, %v2229_v19  ;;  %v13449_v19 = vld [vmem:[#allocation2 + $0x49] sm:$0xff] }
 0x2d7   : > { %15518 = vst [vmem:[#allocation46_spill] sm:$0xff] %v13449_v19 }
 0x2d9   : > { %10773 = vmatmul.mubr.msk.f32.vlgmr.msra.gmra.mrb[20].mxu0 %vm450_vm2, %v2230_v38  ;;  %v13453_v38 = vld [vmem:[#allocation2 + $0x51] sm:$0xff] }
 0x2da   : > { %10775 = vmatprep.mubr.msk.f32.mxu0 %vm450_vm2, %v13439_v39  ;;  %10821 = vmatpush3.msra.mxu0 %v13303_v22  ;;  %15519 = vst [vmem:[#allocation47_spill] sm:$0xff] %v13453_v38  ;;  %v13457_v39 = vld [vmem:[#allocation2 + $0x69] sm:$0xff]  ;;  %v13461_v22 = vld [vmem:[#allocation2 + $0x71] sm:$0xff] }
 0x2db   : > { %10870 = vmatprep.subr.mxu0 %v13436_v37  ;;  %15520 = vst [vmem:[#allocation48_spill] sm:$0xff] %v13457_v39  ;;  %15521 = vst [vmem:[#allocation49_spill] sm:$0xff] %v13461_v22 }
 0x2dd   : > { %10776 = vmatmul.mubr.msk.f32.gmra.mrb[22].mxu0 %vm450_vm2, %v13445_v23  ;;  %v13465_v23 = vld [vmem:[#allocation2 + $0x89] sm:$0xff] }
 0x2de   : > { %10778 = vmatprep.mubr.msk.f32.mxu0 %vm450_vm2, %v13449_v19  ;;  %15522 = vst [vmem:[#allocation50_spill] sm:$0xff] %v13465_v23  ;;  %v13469_v19 = vld [vmem:[#allocation2 + $0x91] sm:$0xff] }
 0x2df   : > { %15523 = vst [vmem:[#allocation51_spill] sm:$0xff] %v13469_v19 }
 0x2e1   : > { %10779 = vmatmul.mubr.msk.f32.gmra.mrb[24].mxu0 %vm450_vm2, %v13453_v38  ;;  %v13473_v38 = vld [vmem:[#allocation2 + $0xa9] sm:$0xff] }
 0x2e2   : > { %10781 = vmatprep.mubr.msk.f32.mxu0 %vm450_vm2, %v13457_v39  ;;  %15524 = vst [vmem:[#allocation52_spill] sm:$0xff] %v13473_v38  ;;  %v13477_v39 = vld [vmem:[#allocation2 + $0xb1] sm:$0xff] }
 0x2e3   : > { %15525 = vst [vmem:[#allocation53_spill] sm:$0xff] %v13477_v39 }
 0x2e5   : > { %10782 = vmatmul.mubr.msk.f32.gmra.mrb[26].mxu0 %vm450_vm2, %v13461_v22  ;;  %v13481_v22 = vld [vmem:[#allocation2 + $0xc9] sm:$0xff] }
 0x2e6   : > { %10784 = vmatprep.mubr.msk.f32.mxu0 %vm450_vm2, %v13465_v23  ;;  %15526 = vst [vmem:[#allocation54_spill] sm:$0xff] %v13481_v22  ;;  %v13485_v23 = vld [vmem:[#allocation2 + $0xd1] sm:$0xff] }
 0x2e7   : > { %15527 = vst [vmem:[#allocation55_spill] sm:$0xff] %v13485_v23 }
 0x2e9   : > { %10785 = vmatmul.mubr.msk.f32.gmra.mrb[28].mxu0 %vm450_vm2, %v13469_v19  ;;  %v13489_v19 = vld [vmem:[#allocation2 + $0xe9] sm:$0xff] }
 0x2ea   : > { %10787 = vmatprep.mubr.msk.f32.mxu0 %vm450_vm2, %v13473_v38  ;;  %15528 = vst [vmem:[#allocation56_spill] sm:$0xff] %v13489_v19  ;;  %v13493_v38 = vld [vmem:[#allocation2 + $0xf1] sm:$0xff] }
 0x2eb   : > { %15529 = vst [vmem:[#allocation57_spill] sm:$0xff] %v13493_v38 }
 0x2ed   : > { %10788 = vmatmul.mubr.msk.f32.gmra.mrb[30].mxu0 %vm450_vm2, %v13477_v39  ;;  %v13497_v39 = vld [vmem:[#allocation2 + $0x109] sm:$0xff] }
 0x2ee   : > { %10790 = vmatprep.mubr.msk.f32.mxu0 %vm450_vm2, %v13481_v22  ;;  %15530 = vst [vmem:[#allocation58_spill] sm:$0xff] %v13497_v39  ;;  %v13501_v22 = vld [vmem:[#allocation2 + $0x111] sm:$0xff] }
 0x2ef   : > { %15531 = vst [vmem:[#allocation59_spill] sm:$0xff] %v13501_v22 }
 0x2f1   : > { %10791 = vmatmul.mubr.msk.f32.gmra.mrb[32].mxu0 %vm450_vm2, %v13485_v23  ;;  %v13505_v23 = vld [vmem:[#allocation2 + $0x129] sm:$0xff] }
 0x2f2   : > { %10793 = vmatprep.mubr.msk.f32.mxu0 %vm450_vm2, %v13489_v19  ;;  %15532 = vst [vmem:[#allocation60_spill] sm:$0xff] %v13505_v23  ;;  %v13509_v19 = vld [vmem:[#allocation2 + $0x131] sm:$0xff] }
 0x2f3   : > { %15533 = vst [vmem:[#allocation61_spill] sm:$0xff] %v13509_v19 }
 0x2f5   : > { %10794 = vmatmul.mubr.msk.f32.gmra.mrb[34].mxu0 %vm450_vm2, %v13493_v38  ;;  %v13513_v38 = vld [vmem:[#allocation2 + $0x149] sm:$0xff] }
 0x2f6   : > { %10796 = vmatprep.mubr.msk.f32.mxu0 %vm450_vm2, %v13497_v39  ;;  %15534 = vst [vmem:[#allocation62_spill] sm:$0xff] %v13513_v38  ;;  %v13517_v39 = vld [vmem:[#allocation2 + $0x151] sm:$0xff] }
 0x2f7   : > { %15535 = vst [vmem:[#allocation63_spill] sm:$0xff] %v13517_v39 }
 0x2f9   : > { %10797 = vmatmul.mubr.msk.f32.gmra.mrb[36].mxu0 %vm450_vm2, %v13501_v22  ;;  %v13521_v22 = vld [vmem:[#allocation2 + $0x169] sm:$0xff] }
 0x2fa   : > { %10799 = vmatprep.mubr.msk.f32.mxu0 %vm450_vm2, %v13505_v23  ;;  %15536 = vst [vmem:[#allocation64_spill] sm:$0xff] %v13521_v22  ;;  %v13525_v23 = vld [vmem:[#allocation2 + $0x171] sm:$0xff] }
 0x2fb   : > { %15537 = vst [vmem:[#allocation65_spill] sm:$0xff] %v13525_v23 }
 0x2fd   : > { %10800 = vmatmul.mubr.msk.f32.gmra.mrb[38].mxu0 %vm450_vm2, %v13509_v19  ;;  %v13529_v19 = vld [vmem:[#allocation2 + $0x189] sm:$0xff] }
 0x2fe   : > { %10802 = vmatprep.mubr.msk.f32.mxu0 %vm450_vm2, %v13513_v38  ;;  %15538 = vst [vmem:[#allocation66_spill] sm:$0xff] %v13529_v19  ;;  %v13533_v38 = vld [vmem:[#allocation2 + $0x191] sm:$0xff] }
 0x2ff   : > { %15539 = vst [vmem:[#allocation67_spill] sm:$0xff] %v13533_v38 }
 0x301   : > { %10803 = vmatmul.mubr.msk.f32.gmra.mrb[40].mxu0 %vm450_vm2, %v13517_v39  ;;  %v13537_v39 = vld [vmem:[#allocation2 + $0x1a9] sm:$0xff] }
 0x302   : > { %10805 = vmatprep.mubr.msk.f32.mxu0 %vm450_vm2, %v13521_v22  ;;  %15540 = vst [vmem:[#allocation68_spill] sm:$0xff] %v13537_v39  ;;  %v13541_v22 = vld [vmem:[#allocation2 + $0x1b1] sm:$0xff] }
 0x305   : > { %10806 = vmatmul.mubr.msk.f32.gmra.mrb[42].mxu0 %vm450_vm2, %v13525_v23  ;;  %v13545_v23 = vld [vmem:[#allocation2 + $0x1c9] sm:$0xff] }
 0x306   : > { %10808 = vmatprep.mubr.msk.f32.mxu0 %vm450_vm2, %v13529_v19  ;;  %15541 = vst [vmem:[#allocation69_spill] sm:$0xff] %v13545_v23  ;;  %v13549_v19 = vld [vmem:[#allocation2 + $0x1d1] sm:$0xff] }
 0x309   : > { %10809 = vmatmul.mubr.msk.f32.gmra.mrb[44].mxu0 %vm450_vm2, %v13533_v38  ;;  %v13553_v38 = vld [vmem:[#allocation2 + $0x1e9] sm:$0xff] }
 0x30a   : > { %10811 = vmatprep.mubr.msk.f32.mxu0 %vm450_vm2, %v13537_v39  ;;  %15542 = vst [vmem:[#allocation70_spill] sm:$0xff] %v13553_v38  ;;  %v13557_v39 = vld [vmem:[#allocation2 + $0x1f1] sm:$0xff] }
 0x30d   : > { %10812 = vmatmul.mubr.msk.f32.gmra.mrb[46].mxu0 %vm450_vm2, %v13541_v22 }
 0x30e   : > { %10814 = vmatprep.mubr.msk.f32.mxu0 %vm450_vm2, %v13545_v23  ;;  %v9400_v23 = vld [vmem:[%s15319_s5 + $0x28] sm:$0xff] }
 0x311   : > { %10815 = vmatmul.mubr.msk.f32.gmra.mrb[48].mxu0 %vm450_vm2, %v13549_v19 }
 0x312   : > { %10817 = vmatprep.mubr.msk.f32.mxu0 %vm450_vm2, %v13553_v38 }
 0x315   : > { %10818 = vmatmul.mubr.msk.f32.gmra.mrb[50].mxu0 %vm450_vm2, %v13557_v39 }
 0x316   : > { %10822 = vmatprep.mubr.msk.f32.mxu0 %vm450_vm2, %v13306_v48  ;;  %v13629_v48 = vld [vmem:[#allocation2 + $0x20f] sm:$0xff] }
 0x319   : > { %10823 = vmatmul.mubr.msk.f32.vlgmr.msra.gmra.mrb[20].mxu0 %vm450_vm2, %v13312_v13  ;;  %v9433_v13 = vld [vmem:[%s15319_s5 + $0x30] sm:$0xff] }
 0x31a   : > { %10825 = vmatprep.mubr.msk.f32.mxu0 %vm450_vm2, %v13316_v1  ;;  %10871 = vmatpush3.msra.mxu0 %v13436_v37  ;;  %v13625_v37 = vld [vmem:[#allocation2 + $0x207] sm:$0xff] }
 0x31b   : > { %10920 = vmatprep.subr.mxu0 %v9400_v23 }
 0x31d   : > { %10826 = vmatmul.mubr.msk.f32.gmra.mrb[22].mxu0 %vm450_vm2, %v13320_v43 }
 0x31e   : > { %10828 = vmatprep.mubr.msk.f32.mxu0 %vm450_vm2, %v13324_v2 }
 0x321   : > { %10829 = vmatmul.mubr.msk.f32.gmra.mrb[24].mxu0 %vm450_vm2, %v13328_v20 }
 0x322   : > { %10831 = vmatprep.mubr.msk.f32.mxu0 %vm450_vm2, %v13332_v57 }
 0x325   : > { %10832 = vmatmul.mubr.msk.f32.gmra.mrb[26].mxu0 %vm450_vm2, %v13336_v56 }
 0x326   : > { %10834 = vmatprep.mubr.msk.f32.mxu0 %vm450_vm2, %v13340_v11 }
 0x329   : > { %10835 = vmatmul.mubr.msk.f32.gmra.mrb[28].mxu0 %vm450_vm2, %v13344_v46 }
 0x32a   : > { %10837 = vmatprep.mubr.msk.f32.mxu0 %vm450_vm2, %v13348_v61 }
 0x32d   : > { %10838 = vmatmul.mubr.msk.f32.gmra.mrb[30].mxu0 %vm450_vm2, %v13352_v15 }
 0x32e   : > { %10840 = vmatprep.mubr.msk.f32.mxu0 %vm450_vm2, %v13356_v7 }
 0x331   : > { %10841 = vmatmul.mubr.msk.f32.gmra.mrb[32].mxu0 %vm450_vm2, %v13360_v5 }
 0x332   : > { %10843 = vmatprep.mubr.msk.f32.mxu0 %vm450_vm2, %v13364_v54 }
 0x335   : > { %10844 = vmatmul.mubr.msk.f32.gmra.mrb[34].mxu0 %vm450_vm2, %v13368_v51 }
 0x336   : > { %10846 = vmatprep.mubr.msk.f32.mxu0 %vm450_vm2, %v13372_v40 }
 0x339   : > { %10847 = vmatmul.mubr.msk.f32.gmra.mrb[36].mxu0 %vm450_vm2, %v13376_v35 }
 0x33a   : > { %10849 = vmatprep.mubr.msk.f32.mxu0 %vm450_vm2, %v13380_v30 }
 0x33d   : > { %10850 = vmatmul.mubr.msk.f32.gmra.mrb[38].mxu0 %vm450_vm2, %v13386_v6 }
 0x33e   : > { %10852 = vmatprep.mubr.msk.f32.mxu0 %vm450_vm2, %v13390_v63 }
 0x341   : > { %10853 = vmatmul.mubr.msk.f32.gmra.mrb[40].mxu0 %vm450_vm2, %v13394_v41 }
 0x342   : > { %10855 = vmatprep.mubr.msk.f32.mxu0 %vm450_vm2, %v13399_v18 }
 0x345   : > { %10856 = vmatmul.mubr.msk.f32.gmra.mrb[42].mxu0 %vm450_vm2, %v13404_v29 }
 0x346   : > { %10858 = vmatprep.mubr.msk.f32.mxu0 %vm450_vm2, %v13408_v53 }
 0x349   : > { %10859 = vmatmul.mubr.msk.f32.gmra.mrb[44].mxu0 %vm450_vm2, %v13412_v52 }
 0x34a   : > { %10861 = vmatprep.mubr.msk.f32.mxu0 %vm450_vm2, %v13416_v0 }
 0x34d   : > { %10862 = vmatmul.mubr.msk.f32.gmra.mrb[46].mxu0 %vm450_vm2, %v13420_v44 }
 0x34e   : > { %10864 = vmatprep.mubr.msk.f32.mxu0 %vm450_vm2, %v13424_v9 }
 0x351   : > { %10865 = vmatmul.mubr.msk.f32.gmra.mrb[48].mxu0 %vm450_vm2, %v13428_v21 }
 0x352   : > { %10867 = vmatprep.mubr.msk.f32.mxu0 %vm450_vm2, %v13625_v37 }
 0x355   : > { %10868 = vmatmul.mubr.msk.f32.gmra.mrb[50].mxu0 %vm450_vm2, %v13629_v48 }
 0x356   : > { %10872 = vmatprep.mubr.msk.f32.mxu0 %vm450_vm2, %v13132_v24  ;;  %v15543_v24 = vld [vmem:[#allocation42_spill] sm:$0xff] }
 0x359   : > { %10873 = vmatmul.mubr.msk.f32.vlgmr.msra.gmra.mrb[20].mxu0 %vm450_vm2, %v13137_v27  ;;  %v15544_v27 = vld [vmem:[#allocation43_spill] sm:$0xff] }
 0x35a   : > { %10875 = vmatprep.mubr.msk.f32.mxu0 %vm450_vm2, %v13144_v42  ;;  %10921 = vmatpush3.msra.mxu0 %v9400_v23  ;;  %v13696_v42 = vld [vmem:[#allocation2 + $0x208] sm:$0xff]  ;;  %v15553_v23 = vld [vmem:[#allocation52_spill] sm:$0xff] }
 0x35b   : > { %10970 = vmatprep.subr.mxu0 %v9433_v13 }
 0x35d   : > { %10876 = vmatmul.mubr.msk.f32.gmra.mrb[22].mxu0 %vm450_vm2, %v13149_v45  ;;  %v13700_v45 = vld [vmem:[#allocation2 + $0x210] sm:$0xff] }
 0x35e   : > { %10878 = vmatprep.mubr.msk.f32.mxu0 %vm450_vm2, %v13156_v62  ;;  %v15545_v62 = vld [vmem:[#allocation44_spill] sm:$0xff] }
 0x361   : > { %10879 = vmatmul.mubr.msk.f32.gmra.mrb[24].mxu0 %vm450_vm2, %v13161_v10  ;;  %v9466_v10 = vld [vmem:[%s15319_s5 + $0x38] sm:$0xff] }
 0x362   : > { %10881 = vmatprep.mubr.msk.f32.mxu0 %vm450_vm2, %v13168_v26  ;;  %v15546_v26 = vld [vmem:[#allocation45_spill] sm:$0xff] }
 0x365   : > { %10882 = vmatmul.mubr.msk.f32.gmra.mrb[26].mxu0 %vm450_vm2, %v13173_v32  ;;  %v15547_v32 = vld [vmem:[#allocation46_spill] sm:$0xff] }
 0x366   : > { %10884 = vmatprep.mubr.msk.f32.mxu0 %vm450_vm2, %v13180_v50  ;;  %v15548_v50 = vld [vmem:[#allocation47_spill] sm:$0xff] }
 0x369   : > { %10885 = vmatmul.mubr.msk.f32.gmra.mrb[28].mxu0 %vm450_vm2, %v13185_v58  ;;  %v15549_v58 = vld [vmem:[#allocation48_spill] sm:$0xff] }
 0x36a   : > { %10887 = vmatprep.mubr.msk.f32.mxu0 %vm450_vm2, %v13192_v17  ;;  %v15550_v17 = vld [vmem:[#allocation49_spill] sm:$0xff] }
 0x36d   : > { %10888 = vmatmul.mubr.msk.f32.gmra.mrb[30].mxu0 %vm450_vm2, %v13197_v28  ;;  %v15551_v28 = vld [vmem:[#allocation50_spill] sm:$0xff] }
 0x36e   : > { %10890 = vmatprep.mubr.msk.f32.mxu0 %vm450_vm2, %v13204_v49  ;;  %v15552_v49 = vld [vmem:[#allocation51_spill] sm:$0xff] }
 0x371   : > { %10891 = vmatmul.mubr.msk.f32.gmra.mrb[32].mxu0 %vm450_vm2, %v13209_v59 }
 0x372   : > { %10893 = vmatprep.mubr.msk.f32.mxu0 %vm450_vm2, %v13216_v25 }
 0x375   : > { %10894 = vmatmul.mubr.msk.f32.gmra.mrb[34].mxu0 %vm450_vm2, %v13221_v33 }
 0x376   : > { %10896 = vmatprep.mubr.msk.f32.mxu0 %vm450_vm2, %v13228_v47 }
 0x379   : > { %10897 = vmatmul.mubr.msk.f32.gmra.mrb[36].mxu0 %vm450_vm2, %v13233_v8 }
 0x37a   : > { %10899 = vmatprep.mubr.msk.f32.mxu0 %vm450_vm2, %v13240_v55 }
 0x37d   : > { %10900 = vmatmul.mubr.msk.f32.gmra.mrb[38].mxu0 %vm450_vm2, %v13245_v12 }
 0x37e   : > { %10902 = vmatprep.mubr.msk.f32.mxu0 %vm450_vm2, %v13252_v31 }
 0x381   : > { %10903 = vmatmul.mubr.msk.f32.gmra.mrb[40].mxu0 %vm450_vm2, %v13257_v60 }
 0x382   : > { %10905 = vmatprep.mubr.msk.f32.mxu0 %vm450_vm2, %v13264_v14 }
 0x385   : > { %10906 = vmatmul.mubr.msk.f32.gmra.mrb[42].mxu0 %vm450_vm2, %v13269_v4 }
 0x386   : > { %10908 = vmatprep.mubr.msk.f32.mxu0 %vm450_vm2, %v13274_v34 }
 0x389   : > { %10909 = vmatmul.mubr.msk.f32.gmra.mrb[44].mxu0 %vm450_vm2, %v13279_v16 }
 0x38a   : > { %10911 = vmatprep.mubr.msk.f32.mxu0 %vm450_vm2, %v13283_v36 }
 0x38d   : > { %10912 = vmatmul.mubr.msk.f32.gmra.mrb[46].mxu0 %vm450_vm2, %v13287_v3 }
 0x38e   : > { %10914 = vmatprep.mubr.msk.f32.mxu0 %vm450_vm2, %v15543_v24 }
 0x391   : > { %10915 = vmatmul.mubr.msk.f32.gmra.mrb[48].mxu0 %vm450_vm2, %v15544_v27 }
 0x392   : > { %10917 = vmatprep.mubr.msk.f32.mxu0 %vm450_vm2, %v13696_v42 }
 0x395   : > { %10918 = vmatmul.mubr.msk.f32.gmra.mrb[50].mxu0 %vm450_vm2, %v13700_v45 }
 0x396   : > { %10922 = vmatprep.mubr.msk.f32.mxu0 %vm450_vm2, %v15545_v62  ;;  %v15555_v62 = vld [vmem:[#allocation54_spill] sm:$0xff] }
 0x399   : > { %10923 = vmatmul.mubr.msk.f32.vlgmr.msra.gmra.mrb[20].mxu0 %vm450_vm2, %v15546_v26  ;;  %v15556_v26 = vld [vmem:[#allocation55_spill] sm:$0xff] }
 0x39a   : > { %10925 = vmatprep.mubr.msk.f32.mxu0 %vm450_vm2, %v15547_v32  ;;  %10971 = vmatpush3.msra.mxu0 %v9433_v13  ;;  %v15554_v13 = vld [vmem:[#allocation53_spill] sm:$0xff] }
 0x39b   : > { %11020 = vmatprep.subr.mxu0 %v9466_v10 }
 0x39d   : > { %10926 = vmatmul.mubr.msk.f32.gmra.mrb[22].mxu0 %vm450_vm2, %v15548_v50 }
 0x39e   : > { %10928 = vmatprep.mubr.msk.f32.mxu0 %vm450_vm2, %v15549_v58  ;;  %v15557_v58 = vld [vmem:[#allocation56_spill] sm:$0xff] }
 0x3a1   : > { %10929 = vmatmul.mubr.msk.f32.gmra.mrb[24].mxu0 %vm450_vm2, %v15550_v17  ;;  %v15558_v17 = vld [vmem:[#allocation57_spill] sm:$0xff] }
 0x3a2   : > { %10931 = vmatprep.mubr.msk.f32.mxu0 %vm450_vm2, %v15551_v28  ;;  %v15559_v28 = vld [vmem:[#allocation58_spill] sm:$0xff] }
 0x3a5   : > { %10932 = vmatmul.mubr.msk.f32.gmra.mrb[26].mxu0 %vm450_vm2, %v15552_v49  ;;  %v15560_v49 = vld [vmem:[#allocation59_spill] sm:$0xff] }
 0x3a6   : > { %10934 = vmatprep.mubr.msk.f32.mxu0 %vm450_vm2, %v15553_v23  ;;  %v15561_v23 = vld [vmem:[#allocation60_spill] sm:$0xff] }
 0x3a9   : > { %10935 = vmatmul.mubr.msk.f32.gmra.mrb[28].mxu0 %vm450_vm2, %v15554_v13  ;;  %v15562_v13 = vld [vmem:[#allocation61_spill] sm:$0xff] }
 0x3aa   : > { %10937 = vmatprep.mubr.msk.f32.mxu0 %vm450_vm2, %v15555_v62  ;;  %v15563_v62 = vld [vmem:[#allocation62_spill] sm:$0xff] }
 0x3ad   : > { %10938 = vmatmul.mubr.msk.f32.gmra.mrb[30].mxu0 %vm450_vm2, %v15556_v26  ;;  %v15564_v26 = vld [vmem:[#allocation63_spill] sm:$0xff] }
 0x3ae   : > { %10940 = vmatprep.mubr.msk.f32.mxu0 %vm450_vm2, %v15557_v58  ;;  %v15565_v58 = vld [vmem:[#allocation64_spill] sm:$0xff] }
 0x3b1   : > { %10941 = vmatmul.mubr.msk.f32.gmra.mrb[32].mxu0 %vm450_vm2, %v15558_v17  ;;  %v15566_v17 = vld [vmem:[#allocation65_spill] sm:$0xff] }
 0x3b2   : > { %10943 = vmatprep.mubr.msk.f32.mxu0 %vm450_vm2, %v15559_v28  ;;  %v15567_v28 = vld [vmem:[#allocation66_spill] sm:$0xff] }
 0x3b5   : > { %10944 = vmatmul.mubr.msk.f32.gmra.mrb[34].mxu0 %vm450_vm2, %v15560_v49  ;;  %v15568_v49 = vld [vmem:[#allocation67_spill] sm:$0xff] }
 0x3b6   : > { %10946 = vmatprep.mubr.msk.f32.mxu0 %vm450_vm2, %v15561_v23  ;;  %v15569_v23 = vld [vmem:[#allocation68_spill] sm:$0xff] }
 0x3b9   : > { %10947 = vmatmul.mubr.msk.f32.gmra.mrb[36].mxu0 %vm450_vm2, %v15562_v13 }
 0x3ba   : > { %10949 = vmatprep.mubr.msk.f32.mxu0 %vm450_vm2, %v15563_v62  ;;  %v15570_v62 = vld [vmem:[#allocation69_spill] sm:$0xff] }
 0x3bd   : > { %10950 = vmatmul.mubr.msk.f32.gmra.mrb[38].mxu0 %vm450_vm2, %v15564_v26 }
 0x3be   : > { %10952 = vmatprep.mubr.msk.f32.mxu0 %vm450_vm2, %v15565_v58 }
 0x3c1   : > { %10953 = vmatmul.mubr.msk.f32.gmra.mrb[40].mxu0 %vm450_vm2, %v15566_v17 }
 0x3c2   : > { %10955 = vmatprep.mubr.msk.f32.mxu0 %vm450_vm2, %v15567_v28  ;;  %v13767_v28 = vld [vmem:[#allocation2 + $0x209] sm:$0xff] }
 0x3c5   : > { %10956 = vmatmul.mubr.msk.f32.gmra.mrb[42].mxu0 %vm450_vm2, %v15568_v49 }
 0x3c6   : > { %10958 = vmatprep.mubr.msk.f32.mxu0 %vm450_vm2, %v15569_v23  ;;  %v13771_v23 = vld [vmem:[#allocation2 + $0x211] sm:$0xff] }
 0x3c9   : > { %10959 = vmatmul.mubr.msk.f32.gmra.mrb[44].mxu0 %vm450_vm2, %v13541_v22 }
 0x3ca   : > { %10961 = vmatprep.mubr.msk.f32.mxu0 %vm450_vm2, %v15570_v62 }
 0x3cd   : > { %10962 = vmatmul.mubr.msk.f32.gmra.mrb[46].mxu0 %vm450_vm2, %v13549_v19 }
 0x3ce   : > { %10964 = vmatprep.mubr.msk.f32.mxu0 %vm450_vm2, %v13553_v38  ;;  %v13780_v38 = vld [vmem:[%s15319_s5 + $0x40] sm:$0xff] }
 0x3d1   : > { %10965 = vmatmul.mubr.msk.f32.gmra.mrb[48].mxu0 %vm450_vm2, %v13557_v39 }
 0x3d2   : > { %10967 = vmatprep.mubr.msk.f32.mxu0 %vm450_vm2, %v13767_v28 }
 0x3d5   : > { %10968 = vmatmul.mubr.msk.f32.gmra.mrb[50].mxu0 %vm450_vm2, %v13771_v23 }
 0x3d6   : > { %10972 = vmatprep.mubr.msk.f32.mxu0 %vm450_vm2, %v13316_v1  ;;  %v15585_v1 = vld [vmem:[#allocation62_spill] sm:$0xff] }
 0x3d9   : > { %10973 = vmatmul.mubr.msk.f32.vlgmr.msra.gmra.mrb[20].mxu0 %vm450_vm2, %v13320_v43  ;;  %v15586_v43 = vld [vmem:[#allocation66_spill] sm:$0xff] }
 0x3da   : > { %10975 = vmatprep.mubr.msk.f32.mxu0 %vm450_vm2, %v13324_v2  ;;  %11021 = vmatpush3.msra.mxu0 %v9466_v10  ;;  %v4175_v2 = vld [vmem:[#allocation2 + $0xe8] sm:$0xff] }
 0x3db   : > { %11070 = vmatprep.subr.mxu0 %v13780_v38 }
 0x3dd   : > { %10976 = vmatmul.mubr.msk.f32.gmra.mrb[22].mxu0 %vm450_vm2, %v13328_v20  ;;  %v15587_v20 = vld [vmem:[#allocation68_spill] sm:$0xff] }
 0x3de   : > { %10978 = vmatprep.mubr.msk.f32.mxu0 %vm450_vm2, %v13332_v57  ;;  %v4172_v57 = vld [vmem:[#allocation2 + $0xb0] sm:$0xff] }
 0x3e1   : > { %10979 = vmatmul.mubr.msk.f32.gmra.mrb[24].mxu0 %vm450_vm2, %v13336_v56  ;;  %v4174_v56 = vld [vmem:[#allocation2 + $0xd0] sm:$0xff] }
 0x3e2   : > { %10981 = vmatprep.mubr.msk.f32.mxu0 %vm450_vm2, %v13340_v11  ;;  %v4170_v11 = vld [vmem:[#allocation2 + $0x90] sm:$0xff] }
 0x3e5   : > { %10982 = vmatmul.mubr.msk.f32.gmra.mrb[26].mxu0 %vm450_vm2, %v13344_v46  ;;  %v4173_v46 = vld [vmem:[#allocation2 + $0xc8] sm:$0xff] }
 0x3e6   : > { %10984 = vmatprep.mubr.msk.f32.mxu0 %vm450_vm2, %v13348_v61  ;;  %v4167_v61 = vld [vmem:[#allocation2 + $0x68] sm:$0xff] }
 0x3e9   : > { %10985 = vmatmul.mubr.msk.f32.gmra.mrb[28].mxu0 %vm450_vm2, %v13352_v15  ;;  %v4171_v15 = vld [vmem:[#allocation2 + $0xa8] sm:$0xff] }
 0x3ea   : > { %10987 = vmatprep.mubr.msk.f32.mxu0 %vm450_vm2, %v13356_v7  ;;  %v4169_v7 = vld [vmem:[#allocation2 + $0x88] sm:$0xff] }
 0x3ed   : > { %10988 = vmatmul.mubr.msk.f32.gmra.mrb[30].mxu0 %vm450_vm2, %v13360_v5  ;;  %v4168_v5 = vld [vmem:[#allocation2 + $0x70] sm:$0xff] }
 0x3ee   : > { %10990 = vmatprep.mubr.msk.f32.mxu0 %vm450_vm2, %v13364_v54  ;;  %v4166_v54 = vld [vmem:[#allocation2 + $0x50] sm:$0xff] }
 0x3f1   : > { %10991 = vmatmul.mubr.msk.f32.gmra.mrb[32].mxu0 %vm450_vm2, %v13368_v51  ;;  %v15571_v51 = vmov 0.0  }
 0x3f2   : > { %10993 = vmatprep.mubr.msk.f32.mxu0 %vm450_vm2, %v13372_v40  ;;  %530 = vst.msk [vmem:[#allocation3 + $0x30] sm:$0xff] %vm523_vm3, %v15571_v51  ;;  %524 = vst.msk [vmem:[#allocation3] sm:$0xff] %vm523_vm3, %v15571_v51 }
 0x3f3   : > { %525 = vst.msk [vmem:[#allocation3 + $0x8] sm:$0xff] %vm523_vm3, %v15571_v51  ;;  %526 = vst.msk [vmem:[#allocation3 + $0x10] sm:$0xff] %vm523_vm3, %v15571_v51 }
 0x3f4   : > { %527 = vst.msk [vmem:[#allocation3 + $0x18] sm:$0xff] %vm523_vm3, %v15571_v51  ;;  %528 = vst.msk [vmem:[#allocation3 + $0x20] sm:$0xff] %vm523_vm3, %v15571_v51 }
 0x3f5   : > { %10994 = vmatmul.mubr.msk.f32.gmra.mrb[34].mxu0 %vm450_vm2, %v13376_v35  ;;  %v9534_v35 = vld [vmem:[%s15321_s7 + $0x28] sm:$0xff]  ;;  %529 = vst.msk [vmem:[#allocation3 + $0x28] sm:$0xff] %vm523_vm3, %v15571_v51  ;;  %531 = vst.msk [vmem:[#allocation3 + $0x38] sm:$0xff] %vm523_vm3, %v15571_v51 }
 0x3f6   : > { %10996 = vmatprep.mubr.msk.f32.mxu0 %vm450_vm2, %v13380_v30  ;;  %v9533_v30 = vld [vmem:[%s15321_s7 + $0x20] sm:$0xff]  ;;  %532 = vst.msk [vmem:[#allocation3 + $0x40] sm:$0xff] %vm523_vm3, %v15571_v51  ;;  %533 = vst.msk [vmem:[#allocation3 + $0x48] sm:$0xff] %vm523_vm3, %v15571_v51 }
 0x3f7   : > { %v13850_v40 = vpack.c.bf16 %v9534_v35, %v9533_v30  ;;  %534 = vst.msk [vmem:[#allocation3 + $0x50] sm:$0xff] %vm523_vm3, %v15571_v51  ;;  %535 = vst.msk [vmem:[#allocation3 + $0x58] sm:$0xff] %vm523_vm3, %v15571_v51  ;;  %v15590_v35 = vld [vmem:[#allocation11_spill] sm:$0xff] }
 0x3f8   : > { %536 = vst.msk [vmem:[#allocation3 + $0x60] sm:$0xff] %vm523_vm3, %v15571_v51  ;;  %537 = vst.msk [vmem:[#allocation3 + $0x68] sm:$0xff] %vm523_vm3, %v15571_v51 }
 0x3f9   : > { %10997 = vmatmul.mubr.msk.f32.gmra.mrb[36].mxu0 %vm450_vm2, %v13386_v6  ;;  %v4165_v6 = vld [vmem:[#allocation2 + $0x48] sm:$0xff]  ;;  %538 = vst.msk [vmem:[#allocation3 + $0x70] sm:$0xff] %vm523_vm3, %v15571_v51  ;;  %539 = vst.msk [vmem:[#allocation3 + $0x78] sm:$0xff] %vm523_vm3, %v15571_v51  ;;  %11677 = vmatprep.subr.bf16.mxu1 %v13850_v40 }
 0x3fa   : > { %10999 = vmatprep.mubr.msk.f32.mxu0 %vm450_vm2, %v13390_v63  ;;  %v3809_v63 = vld [vmem:[#allocation2 + $0x22f] sm:$0xff]  ;;  %540 = vst.msk [vmem:[#allocation3 + $0x80] sm:$0xff] %vm523_vm3, %v15571_v51  ;;  %541 = vst.msk [vmem:[#allocation3 + $0x88] sm:$0xff] %vm523_vm3, %v15571_v51  ;;  %11679 = vmatpush3.bf16.msra.mxu1 %v13850_v40 }
 0x3fb   : > { %542 = vst.msk [vmem:[#allocation3 + $0x90] sm:$0xff] %vm523_vm3, %v15571_v51  ;;  %543 = vst.msk [vmem:[#allocation3 + $0x98] sm:$0xff] %vm523_vm3, %v15571_v51 }
 0x3fc   : > { %544 = vst.msk [vmem:[#allocation3 + $0xa0] sm:$0xff] %vm523_vm3, %v15571_v51  ;;  %545 = vst.msk [vmem:[#allocation3 + $0xa8] sm:$0xff] %vm523_vm3, %v15571_v51 }
 0x3fd   : > { %11000 = vmatmul.mubr.msk.f32.gmra.mrb[38].mxu0 %vm450_vm2, %v13394_v41  ;;  %v3808_v41 = vld [vmem:[#allocation2 + $0x227] sm:$0xff]  ;;  %546 = vst.msk [vmem:[#allocation3 + $0xb0] sm:$0xff] %vm523_vm3, %v15571_v51  ;;  %547 = vst.msk [vmem:[#allocation3 + $0xb8] sm:$0xff] %vm523_vm3, %v15571_v51 }
 0x3fe   : > { %11002 = vmatprep.mubr.msk.f32.mxu0 %vm450_vm2, %v13399_v18  ;;  %548 = vst.msk [vmem:[#allocation3 + $0xc0] sm:$0xff] %vm523_vm3, %v15571_v51  ;;  %549 = vst.msk [vmem:[#allocation3 + $0xc8] sm:$0xff] %vm523_vm3, %v15571_v51  ;;  %v15588_v18 = vld [vmem:[#allocation70_spill] sm:$0xff] }
 0x3ff   : > { %550 = vst.msk [vmem:[#allocation3 + $0xd0] sm:$0xff] %vm523_vm3, %v15571_v51  ;;  %551 = vst.msk [vmem:[#allocation3 + $0xd8] sm:$0xff] %vm523_vm3, %v15571_v51 }
 0x400   : > { %552 = vst.msk [vmem:[#allocation3 + $0xe0] sm:$0xff] %vm523_vm3, %v15571_v51  ;;  %553 = vst.msk [vmem:[#allocation3 + $0xe8] sm:$0xff] %vm523_vm3, %v15571_v51 }
 0x401   : > { %11003 = vmatmul.mubr.msk.f32.gmra.mrb[40].mxu0 %vm450_vm2, %v13404_v29  ;;  %554 = vst.msk [vmem:[#allocation3 + $0xf0] sm:$0xff] %vm523_vm3, %v15571_v51  ;;  %555 = vst.msk [vmem:[#allocation3 + $0xf8] sm:$0xff] %vm523_vm3, %v15571_v51  ;;  %v4582_v29 = vld [vmem:[#allocation2 + $0x229] sm:$0xff] }
 0x402   : > { %11005 = vmatprep.mubr.msk.f32.mxu0 %vm450_vm2, %v13408_v53  ;;  %556 = vst.msk [vmem:[#allocation3 + $0x100] sm:$0xff] %vm523_vm3, %v15571_v51  ;;  %557 = vst.msk [vmem:[#allocation3 + $0x108] sm:$0xff] %vm523_vm3, %v15571_v51  ;;  %v4583_v53 = vld [vmem:[#allocation2 + $0x231] sm:$0xff] }
 0x403   : > { %558 = vst.msk [vmem:[#allocation3 + $0x110] sm:$0xff] %vm523_vm3, %v15571_v51  ;;  %559 = vst.msk [vmem:[#allocation3 + $0x118] sm:$0xff] %vm523_vm3, %v15571_v51 }
 0x404   : > { %560 = vst.msk [vmem:[#allocation3 + $0x120] sm:$0xff] %vm523_vm3, %v15571_v51  ;;  %561 = vst.msk [vmem:[#allocation3 + $0x128] sm:$0xff] %vm523_vm3, %v15571_v51 }
 0x405   : > { %11006 = vmatmul.mubr.msk.f32.gmra.mrb[42].mxu0 %vm450_vm2, %v13412_v52  ;;  %562 = vst.msk [vmem:[#allocation3 + $0x130] sm:$0xff] %vm523_vm3, %v15571_v51  ;;  %563 = vst.msk [vmem:[#allocation3 + $0x138] sm:$0xff] %vm523_vm3, %v15571_v51  ;;  %v9535_v52 = vld [vmem:[%s15321_s7 + $0x30] sm:$0xff] }
 0x406   : > { %11008 = vmatprep.mubr.msk.f32.mxu0 %vm450_vm2, %v13416_v0  ;;  %564 = vst.msk [vmem:[#allocation3 + $0x140] sm:$0xff] %vm523_vm3, %v15571_v51  ;;  %565 = vst.msk [vmem:[#allocation3 + $0x148] sm:$0xff] %vm523_vm3, %v15571_v51 }
 0x407   : > { %566 = vst.msk [vmem:[#allocation3 + $0x150] sm:$0xff] %vm523_vm3, %v15571_v51  ;;  %567 = vst.msk [vmem:[#allocation3 + $0x158] sm:$0xff] %vm523_vm3, %v15571_v51 }
 0x408   : > { %568 = vst.msk [vmem:[#allocation3 + $0x160] sm:$0xff] %vm523_vm3, %v15571_v51  ;;  %569 = vst.msk [vmem:[#allocation3 + $0x168] sm:$0xff] %vm523_vm3, %v15571_v51 }
 0x409   : > { %11009 = vmatmul.mubr.msk.f32.gmra.mrb[44].mxu0 %vm450_vm2, %v13420_v44  ;;  %570 = vst.msk [vmem:[#allocation3 + $0x170] sm:$0xff] %vm523_vm3, %v15571_v51  ;;  %571 = vst.msk [vmem:[#allocation3 + $0x178] sm:$0xff] %vm523_vm3, %v15571_v51  ;;  %v5159_v44 = vld [vmem:[#allocation3 + $0x8] sm:$0xff] }
 0x40a   : > { %11011 = vmatprep.mubr.msk.f32.mxu0 %vm450_vm2, %v13424_v9  ;;  %572 = vst.msk [vmem:[#allocation3 + $0x180] sm:$0xff] %vm523_vm3, %v15571_v51  ;;  %573 = vst.msk [vmem:[#allocation3 + $0x188] sm:$0xff] %vm523_vm3, %v15571_v51  ;;  %11128 = vmatprep.mubr.msk.f32.mxu1 %vm523_vm3, %v5159_v44  ;;  %v5160_v9 = vld [vmem:[#allocation3 + $0x10] sm:$0xff] }
 0x40b   : > { %574 = vst.msk [vmem:[#allocation3 + $0x190] sm:$0xff] %vm523_vm3, %v15571_v51  ;;  %575 = vst.msk [vmem:[#allocation3 + $0x198] sm:$0xff] %vm523_vm3, %v15571_v51 }
 0x40c   : > { %576 = vst.msk [vmem:[#allocation3 + $0x1a0] sm:$0xff] %vm523_vm3, %v15571_v51  ;;  %577 = vst.msk [vmem:[#allocation3 + $0x1a8] sm:$0xff] %vm523_vm3, %v15571_v51 }
 0x40d   : > { %11012 = vmatmul.mubr.msk.f32.gmra.mrb[46].mxu0 %vm450_vm2, %v13428_v21  ;;  %578 = vst.msk [vmem:[#allocation3 + $0x1b0] sm:$0xff] %vm523_vm3, %v15571_v51  ;;  %579 = vst.msk [vmem:[#allocation3 + $0x1b8] sm:$0xff] %vm523_vm3, %v15571_v51  ;;  %v5155_v21 = vld [vmem:[%s15321_s7] sm:$0xff] }
 0x40e   : > { %11014 = vmatprep.mubr.msk.f32.mxu0 %vm450_vm2, %v13625_v37  ;;  %580 = vst.msk [vmem:[#allocation3 + $0x1c0] sm:$0xff] %vm523_vm3, %v15571_v51  ;;  %581 = vst.msk [vmem:[#allocation3 + $0x1c8] sm:$0xff] %vm523_vm3, %v15571_v51  ;;  %v5158_v37 = vld [vmem:[%s15321_s7 + $0x18] sm:$0xff] }
 0x40f   : > { %582 = vst.msk [vmem:[#allocation3 + $0x1d0] sm:$0xff] %vm523_vm3, %v15571_v51  ;;  %583 = vst.msk [vmem:[#allocation3 + $0x1d8] sm:$0xff] %vm523_vm3, %v15571_v51 }
 0x410   : > { %584 = vst.msk [vmem:[#allocation3 + $0x1e0] sm:$0xff] %vm523_vm3, %v15571_v51  ;;  %585 = vst.msk [vmem:[#allocation3 + $0x1e8] sm:$0xff] %vm523_vm3, %v15571_v51 }
 0x411   : > { %11015 = vmatmul.mubr.msk.f32.gmra.mrb[48].mxu0 %vm450_vm2, %v13629_v48  ;;  %586 = vst.msk [vmem:[#allocation3 + $0x1f0] sm:$0xff] %vm523_vm3, %v15571_v51  ;;  %587 = vst.msk [vmem:[#allocation3 + $0x1f8] sm:$0xff] %vm523_vm3, %v15571_v51 }
 0x412   : > { %11017 = vmatprep.mubr.msk.f32.mxu0 %vm450_vm2, %v3808_v41  ;;  %588 = vst.msk [vmem:[#allocation3 + $0x200] sm:$0xff] %vm523_vm3, %v15571_v51  ;;  %589 = vst.msk [vmem:[#allocation3 + $0x208] sm:$0xff] %vm523_vm3, %v15571_v51 }
 0x413   : > { %590 = vst.msk [vmem:[#allocation3 + $0x210] sm:$0xff] %vm523_vm3, %v15571_v51  ;;  %591 = vst.msk [vmem:[#allocation3 + $0x218] sm:$0xff] %vm523_vm3, %v15571_v51 }
 0x414   : > { %592 = vst.msk [vmem:[#allocation3 + $0x220] sm:$0xff] %vm523_vm3, %v15571_v51  ;;  %593 = vst.msk [vmem:[#allocation3 + $0x228] sm:$0xff] %vm523_vm3, %v15571_v51 }
 0x415   : > { %11018 = vmatmul.mubr.msk.f32.gmra.mrb[50].mxu0 %vm450_vm2, %v3809_v63  ;;  %594 = vst.msk [vmem:[#allocation3 + $0x230] sm:$0xff] %vm523_vm3, %v15571_v51  ;;  %595 = vst.msk [vmem:[#allocation3 + $0x238] sm:$0xff] %vm523_vm3, %v15571_v51  ;;  %v15589_v63 = vld [vmem:[#allocation10_spill] sm:$0xff] }
 0x416   : > { %11022 = vmatprep.mubr.msk.f32.mxu0 %vm450_vm2, %v4165_v6 }
 0x419   : > { %11023 = vmatmul.mubr.msk.f32.vlgmr.msra.gmra.mrb[20].mxu0 %vm450_vm2, %v4166_v54 }
 0x41a   : > { %11025 = vmatprep.mubr.msk.f32.mxu0 %vm450_vm2, %v4167_v61  ;;  %11071 = vmatpush3.msra.mxu0 %v13780_v38 }
 0x41d   : > { %11026 = vmatmul.mubr.msk.f32.gmra.mrb[22].mxu0 %vm450_vm2, %v4168_v5 }
 0x41e   : > { %11028 = vmatprep.mubr.msk.f32.mxu0 %vm450_vm2, %v4169_v7 }
 0x421   : > { %11029 = vmatmul.mubr.msk.f32.gmra.mrb[24].mxu0 %vm450_vm2, %v4170_v11 }
 0x422   : > { %11031 = vmatprep.mubr.msk.f32.mxu0 %vm450_vm2, %v4171_v15 }
 0x425   : > { %11032 = vmatmul.mubr.msk.f32.gmra.mrb[26].mxu0 %vm450_vm2, %v4172_v57  ;;  %v15591_v57 = vld [vmem:[#allocation12_spill] sm:$0xff] }
 0x426   : > { %11034 = vmatprep.mubr.msk.f32.mxu0 %vm450_vm2, %v4173_v46 }
 0x429   : > { %11035 = vmatmul.mubr.msk.f32.gmra.mrb[28].mxu0 %vm450_vm2, %v4174_v56 }
 0x42a   : > { %11037 = vmatprep.mubr.msk.f32.mxu0 %vm450_vm2, %v4175_v2  ;;  %v15592_v2 = vld [vmem:[#allocation13_spill] sm:$0xff] }
 0x42d   : > { %11038 = vmatmul.mubr.msk.f32.gmra.mrb[30].mxu0 %vm450_vm2, %v13209_v59  ;;  %v4195_v59 = vld [vmem:[#allocation2 + $0x228] sm:$0xff] }
 0x42e   : > { %11040 = vmatprep.mubr.msk.f32.mxu0 %vm450_vm2, %v13216_v25  ;;  %v4196_v25 = vld [vmem:[#allocation2 + $0x230] sm:$0xff] }
 0x431   : > { %11041 = vmatmul.mubr.msk.f32.gmra.mrb[32].mxu0 %vm450_vm2, %v13221_v33  ;;  %v15572_v33 = vld [vmem:[#allocation48_spill] sm:$0xff] }
 0x432   : > { %11043 = vmatprep.mubr.msk.f32.mxu0 %vm450_vm2, %v13228_v47  ;;  %v15573_v47 = vld [vmem:[#allocation49_spill] sm:$0xff] }
 0x435   : > { %11044 = vmatmul.mubr.msk.f32.gmra.mrb[34].mxu0 %vm450_vm2, %v13233_v8  ;;  %v15574_v8 = vld [vmem:[#allocation50_spill] sm:$0xff] }
 0x436   : > { %11046 = vmatprep.mubr.msk.f32.mxu0 %vm450_vm2, %v13240_v55  ;;  %v15575_v55 = vld [vmem:[#allocation51_spill] sm:$0xff] }
 0x439   : > { %11047 = vmatmul.mubr.msk.f32.gmra.mrb[36].mxu0 %vm450_vm2, %v13245_v12  ;;  %v15576_v12 = vld [vmem:[#allocation52_spill] sm:$0xff] }
 0x43a   : > { %11049 = vmatprep.mubr.msk.f32.mxu0 %vm450_vm2, %v13252_v31  ;;  %v15577_v31 = vld [vmem:[#allocation53_spill] sm:$0xff] }
 0x43d   : > { %11050 = vmatmul.mubr.msk.f32.gmra.mrb[38].mxu0 %vm450_vm2, %v13257_v60  ;;  %v15578_v60 = vld [vmem:[#allocation54_spill] sm:$0xff] }
 0x43e   : > { %11052 = vmatprep.mubr.msk.f32.mxu0 %vm450_vm2, %v13264_v14  ;;  %v15579_v14 = vld [vmem:[#allocation55_spill] sm:$0xff] }
 0x441   : > { %11053 = vmatmul.mubr.msk.f32.gmra.mrb[40].mxu0 %vm450_vm2, %v13269_v4  ;;  %v15580_v4 = vld [vmem:[#allocation56_spill] sm:$0xff] }
 0x442   : > { %11055 = vmatprep.mubr.msk.f32.mxu0 %vm450_vm2, %v13274_v34  ;;  %v15581_v34 = vld [vmem:[#allocation57_spill] sm:$0xff] }
 0x445   : > { %11056 = vmatmul.mubr.msk.f32.gmra.mrb[42].mxu0 %vm450_vm2, %v13279_v16  ;;  %v15582_v16 = vld [vmem:[#allocation58_spill] sm:$0xff] }
 0x446   : > { %11058 = vmatprep.mubr.msk.f32.mxu0 %vm450_vm2, %v13283_v36  ;;  %v15583_v36 = vld [vmem:[#allocation59_spill] sm:$0xff] }
 0x449   : > { %11059 = vmatmul.mubr.msk.f32.gmra.mrb[44].mxu0 %vm450_vm2, %v13287_v3  ;;  %v15584_v3 = vld [vmem:[#allocation60_spill] sm:$0xff] }
 0x44a   : > { %11061 = vmatprep.mubr.msk.f32.mxu0 %vm450_vm2, %v15543_v24  ;;  %v9569_v24 = vld [vmem:[%s15321_s7 + $0x40] sm:$0xff] }
 0x44d   : > { %11062 = vmatmul.mubr.msk.f32.gmra.mrb[46].mxu0 %vm450_vm2, %v15544_v27  ;;  %v9570_v27 = vld [vmem:[%s15321_s7 + $0x48] sm:$0xff] }
 0x44e   : > { %11064 = vmatprep.mubr.msk.f32.mxu0 %vm450_vm2, %v13696_v42  ;;  %v14137_v42 = vpack.c.bf16 %v9570_v27, %v9569_v24 }
 0x451   : > { %11065 = vmatmul.mubr.msk.f32.gmra.mrb[48].mxu0 %vm450_vm2, %v13700_v45  ;;  %v14143_v45 = vld [vmem:[%s15320_s6] ss:$0 sm:$0xff] }
 0x452   : > { %11067 = vmatprep.mubr.msk.f32.mxu0 %vm450_vm2, %v4195_v59 }
 0x455   : > { %11068 = vmatmul.mubr.msk.f32.gmra.mrb[50].mxu0 %vm450_vm2, %v4196_v25 }
 0x456   : > { %11072 = vmatprep.mubr.msk.f32.mxu0 %vm450_vm2, %v15547_v32 }
 0x459   : > { %11073 = vmatmul.mubr.msk.f32.vlgmr.msra.gmra.mrb[20].mxu0 %vm450_vm2, %v15548_v50 }
 0x45a   : > { %11075 = vmatprep.mubr.msk.f32.mxu0 %vm450_vm2, %v15572_v33 }
 0x45d   : > { %11076 = vmatmul.mubr.msk.f32.gmra.mrb[22].mxu0 %vm450_vm2, %v15573_v47 }
 0x45e   : > { %11078 = vmatprep.mubr.msk.f32.mxu0 %vm450_vm2, %v15574_v8 }
 0x461   : > { %11079 = vmatmul.mubr.msk.f32.gmra.mrb[24].mxu0 %vm450_vm2, %v15575_v55 }
 0x462   : > { %11081 = vmatprep.mubr.msk.f32.mxu0 %vm450_vm2, %v15576_v12 }
 0x465   : > { %11082 = vmatmul.mubr.msk.f32.gmra.mrb[26].mxu0 %vm450_vm2, %v15577_v31 }
 0x466   : > { %11084 = vmatprep.mubr.msk.f32.mxu0 %vm450_vm2, %v15578_v60  ;;  %v15593_v60 = vld [vmem:[#allocation14_spill] sm:$0xff] }
 0x469   : > { %11085 = vmatmul.mubr.msk.f32.gmra.mrb[28].mxu0 %vm450_vm2, %v15579_v14 }
 0x46a   : > { %11087 = vmatprep.mubr.msk.f32.mxu0 %vm450_vm2, %v15580_v4 }
 0x46d   : > { %11088 = vmatmul.mubr.msk.f32.gmra.mrb[30].mxu0 %vm450_vm2, %v15581_v34  ;;  %v15594_v34 = vld [vmem:[#allocation15_spill] sm:$0xff] }
 0x46e   : > { %11090 = vmatprep.mubr.msk.f32.mxu0 %vm450_vm2, %v15582_v16 }
 0x471   : > { %11091 = vmatmul.mubr.msk.f32.gmra.mrb[32].mxu0 %vm450_vm2, %v15583_v36 }
 0x472   : > { %11093 = vmatprep.mubr.msk.f32.mxu0 %vm450_vm2, %v15584_v3 }
 0x475   : > { %11094 = vmatmul.mubr.msk.f32.gmra.mrb[34].mxu0 %vm450_vm2, %v15562_v13 }
 0x476   : > { %11096 = vmatprep.mubr.msk.f32.mxu0 %vm450_vm2, %v15585_v1 }
 0x479   : > { %11097 = vmatmul.mubr.msk.f32.gmra.mrb[36].mxu0 %vm450_vm2, %v15564_v26 }
 0x47a   : > { %11099 = vmatprep.mubr.msk.f32.mxu0 %vm450_vm2, %v15565_v58 }
 0x47d   : > { %11100 = vmatmul.mubr.msk.f32.gmra.mrb[38].mxu0 %vm450_vm2, %v15566_v17 }
 0x47e   : > { %11102 = vmatprep.mubr.msk.f32.mxu0 %vm450_vm2, %v15586_v43 }
 0x481   : > { %11103 = vmatmul.mubr.msk.f32.gmra.mrb[40].mxu0 %vm450_vm2, %v15568_v49 }
 0x482   : > { %11105 = vmatprep.mubr.msk.f32.mxu0 %vm450_vm2, %v15587_v20 }
 0x485   : > { %11106 = vmatmul.mubr.msk.f32.gmra.mrb[42].mxu0 %vm450_vm2, %v13541_v22  ;;  %v5157_v22 = vld [vmem:[%s15321_s7 + $0x10] sm:$0xff] }
 0x486   : > { %11108 = vmatprep.mubr.msk.f32.mxu0 %vm450_vm2, %v15570_v62  ;;  %v11688_v48 = vpack.c.bf16 %v5158_v37, %v5157_v22 }
 0x489   : > { %11109 = vmatmul.mubr.msk.f32.gmra.mrb[44].mxu0 %vm450_vm2, %v13549_v19  ;;  %v5156_v19 = vld [vmem:[%s15321_s7 + $0x8] sm:$0xff] }
 0x48a   : > { %11111 = vmatprep.mubr.msk.f32.mxu0 %vm450_vm2, %v15588_v18  ;;  %v11684_v38 = vpack.c.bf16 %v5156_v19, %v5155_v21 }
 0x48d   : > { %11112 = vmatmul.mubr.msk.f32.gmra.mrb[46].mxu0 %vm450_vm2, %v13557_v39  ;;  %v9536_v39 = vld [vmem:[%s15321_s7 + $0x38] sm:$0xff] }
 0x48e   : > { %11114 = vmatprep.mubr.msk.f32.mxu0 %vm450_vm2, %v13767_v28  ;;  %v11680_v0 = vpack.c.bf16 %v9536_v39, %v9535_v52 }
 0x490   : > { %11681 = vmatprep.subr.bf16.mxu1 %v11680_v0 }
 0x491   : > { %11115 = vmatmul.mubr.msk.f32.gmra.mrb[48].mxu0 %vm450_vm2, %v13771_v23  ;;  %11683 = vmatpush3.bf16.msra.mxu1 %v11680_v0  ;;  %v15596_v0 = vld [vmem:[#allocation17_spill] sm:$0xff] }
 0x492   : > { %11117 = vmatprep.mubr.msk.f32.mxu0 %vm450_vm2, %v4582_v29  ;;  %11685 = vmatprep.subr.bf16.mxu1 %v11684_v38 }
 0x494   : > { %11129 = vmatmul.mubr.msk.f32.vlgmr.msra.gmra.mrb[44].mxu1 %vm523_vm3, %v5160_v9 }
 0x495   : > { %11118 = vmatmul.mubr.msk.f32.gmra.mrb[50].mxu0 %vm450_vm2, %v4583_v53  ;;  %11687 = vmatpush3.bf16.msra.mxu1 %v11684_v38  ;;  %v15595_v53 = vld [vmem:[#allocation16_spill] sm:$0xff] }
 0x496   : > { %11689 = vmatprep.subr.bf16.mxu1 %v11688_v48 }
 0x499   : > { %11691 = vmatpush3.bf16.msra.mxu1 %v11688_v48 }
 0x49a   : > { %11693 = vmatprep.subr.bf16.mxu1 %v14137_v42 }
 0x52c   : > { %v11074_v10 = vpop.f32.mrb[20].mxu0 }
 0x52d   : > { %v4947_v32 = vadd.f32 %v11074_v10, %v14143_v45  ;;  %v4748_v50 = vpop.f32.mrb[21].mxu0  ;;  %v15597_v10 = vld [vmem:[#allocation18_spill] sm:$0xff] }
 0x52e   : > { %v4946_v58 = vadd.f32 %v14143_v45, %v4748_v50 }
 0x52f   : > { %v4979_v17 = vmul.f32 0.1, %v4947_v32 }
 0x530   : > { %v4978_v28 = vmul.f32 0.1, %v4946_v58  ;;  %v11077_v49 = vpop.f32.mrb[22].mxu0 }
 0x531   : > { %v5011_v23 = vmax.f32 %v4947_v32, %v4979_v17  ;;  %v4949_v13 = vadd.f32 %v11077_v49, %v14143_v45  ;;  %v4758_v62 = vpop.f32.mrb[23].mxu0 }
 0x532   : > { %v5010_v26 = vmax.f32 %v4946_v58, %v4978_v28  ;;  %v4948_v41 = vadd.f32 %v14143_v45, %v4758_v62  ;;  %v15598_v58 = vld [vmem:[#allocation19_spill] sm:$0xff] }
 0x533   : > { %v5043_v6 = vadd.f32 %v5011_v23, %v15589_v63  ;;  %v4981_v30 = vmul.f32 0.1, %v4949_v13  ;;  %v15599_v63 = vld [vmem:[#allocation20_spill] sm:$0xff] }
 0x534   : > { %v5042_v40 = vadd.f32 %v5010_v26, %v15590_v35  ;;  %v4980_v51 = vmul.f32 0.1, %v4948_v41  ;;  %v11080_v54 = vpop.f32.mrb[24].mxu0  ;;  %v15600_v35 = vld [vmem:[#allocation21_spill] sm:$0xff] }
 0x535   : > { %5075 = vst.msk [vmem:[%s14155_s20 + $0x8] sm:$0xff] %vm523_vm3, %v5043_v6  ;;  %5108 = vst.msk [vmem:[#allocation3 + $0x30] sm:$0xff] %vm523_vm3, %v5043_v6  ;;  %v5013_v61 = vmax.f32 %v4949_v13, %v4981_v30  ;;  %v4951_v5 = vadd.f32 %v11080_v54, %v14143_v45  ;;  %v4768_v7 = vpop.f32.mrb[25].mxu0 }
 0x536   : > { %5074 = vst.msk [vmem:[%s14155_s20] sm:$0xff] %vm523_vm3, %v5042_v40  ;;  %5107 = vst.msk [vmem:[#allocation3 + $0x28] sm:$0xff] %vm523_vm3, %v5042_v40  ;;  %v5012_v11 = vmax.f32 %v4948_v41, %v4980_v51  ;;  %v4950_v15 = vadd.f32 %v14143_v45, %v4768_v7 }
 0x537   : > { %v5045_v46 = vadd.f32 %v5013_v61, %v15591_v57  ;;  %v4983_v56 = vmul.f32 0.1, %v4951_v5 }
 0x538   : > { %v5044_v59 = vadd.f32 %v5012_v11, %v15592_v2  ;;  %v4982_v25 = vmul.f32 0.1, %v4950_v15  ;;  %v11083_v33 = vpop.f32.mrb[26].mxu0 }
 0x539   : > { %5077 = vst.msk [vmem:[%s14155_s20 + $0x18] sm:$0xff] %vm523_vm3, %v5045_v46  ;;  %5110 = vst.msk [vmem:[#allocation3 + $0x50] sm:$0xff] %vm523_vm3, %v5045_v46  ;;  %v5015_v47 = vmax.f32 %v4951_v5, %v4983_v56  ;;  %v4953_v8 = vadd.f32 %v11083_v33, %v14143_v45  ;;  %v4778_v55 = vpop.f32.mrb[27].mxu0  ;;  %v15601_v56 = vld [vmem:[#allocation22_spill] sm:$0xff] }
 0x53a   : > { %5076 = vst.msk [vmem:[%s14155_s20 + $0x10] sm:$0xff] %vm523_vm3, %v5044_v59  ;;  %5109 = vst.msk [vmem:[#allocation3 + $0x48] sm:$0xff] %vm523_vm3, %v5044_v59  ;;  %v5014_v12 = vmax.f32 %v4950_v15, %v4982_v25  ;;  %v4952_v31 = vadd.f32 %v14143_v45, %v4778_v55  ;;  %v15602_v25 = vld [vmem:[#allocation23_spill] sm:$0xff] }
 0x53b   : > { %v5047_v14 = vadd.f32 %v5015_v47, %v15593_v60  ;;  %v4985_v4 = vmul.f32 0.1, %v4953_v8 }
 0x53c   : > { %v5046_v16 = vadd.f32 %v5014_v12, %v15594_v34  ;;  %v4984_v36 = vmul.f32 0.1, %v4952_v31  ;;  %v11086_v3 = vpop.f32.mrb[28].mxu0 }
 0x53d   : > { %5079 = vst.msk [vmem:[%s14155_s20 + $0x28] sm:$0xff] %vm523_vm3, %v5047_v14  ;;  %5112 = vst.msk [vmem:[#allocation3 + $0x70] sm:$0xff] %vm523_vm3, %v5047_v14  ;;  %v5017_v1 = vmax.f32 %v4953_v8, %v4985_v4  ;;  %v4955_v43 = vadd.f32 %v11086_v3, %v14143_v45  ;;  %v4788_v20 = vpop.f32.mrb[29].mxu0  ;;  %v15603_v4 = vld [vmem:[#allocation24_spill] sm:$0xff] }
 0x53e   : > { %5078 = vst.msk [vmem:[%s14155_s20 + $0x20] sm:$0xff] %vm523_vm3, %v5046_v16  ;;  %5111 = vst.msk [vmem:[#allocation3 + $0x68] sm:$0xff] %vm523_vm3, %v5046_v16  ;;  %v5016_v18 = vmax.f32 %v4952_v31, %v4984_v36  ;;  %v4954_v29 = vadd.f32 %v14143_v45, %v4788_v20  ;;  %v15604_v36 = vld [vmem:[#allocation25_spill] sm:$0xff] }
 0x53f   : > { %v5049_v52 = vadd.f32 %v5017_v1, %v15595_v53  ;;  %v4987_v39 = vmul.f32 0.1, %v4955_v43 }
 0x540   : > { %v5048_v44 = vadd.f32 %v5016_v18, %v15596_v0  ;;  %v4986_v9 = vmul.f32 0.1, %v4954_v29  ;;  %v11089_v21 = vpop.f32.mrb[30].mxu0  ;;  %v5162_v27 = vld [vmem:[#allocation3 + $0x50] sm:$0xff] }
 0x541   : > { %5081 = vst.msk [vmem:[%s14155_s20 + $0x38] sm:$0xff] %vm523_vm3, %v5049_v52  ;;  %5114 = vst.msk [vmem:[#allocation3 + $0x90] sm:$0xff] %vm523_vm3, %v5049_v52  ;;  %v5019_v19 = vmax.f32 %v4955_v43, %v4987_v39  ;;  %v4957_v38 = vadd.f32 %v11089_v21, %v14143_v45  ;;  %v4798_v22 = vpop.f32.mrb[31].mxu0  ;;  %v5161_v37 = vld [vmem:[#allocation3 + $0x48] sm:$0xff] }
 0x542   : > { %5080 = vst.msk [vmem:[%s14155_s20 + $0x30] sm:$0xff] %vm523_vm3, %v5048_v44  ;;  %5113 = vst.msk [vmem:[#allocation3 + $0x88] sm:$0xff] %vm523_vm3, %v5048_v44  ;;  %v5018_v48 = vmax.f32 %v4954_v29, %v4986_v9  ;;  %v4956_v24 = vadd.f32 %v14143_v45, %v4798_v22  ;;  %11131 = vmatprep.mubr.msk.f32.mxu1 %vm523_vm3, %v5161_v37  ;;  %v15605_v44 = vld [vmem:[#allocation26_spill] sm:$0xff] }
 0x543   : > { %v5051_v32 = vadd.f32 %v5019_v19, %v15597_v10  ;;  %v4989_v50 = vmul.f32 0.1, %v4957_v38  ;;  %11132 = vmatmul.mubr.msk.f32.gmra.mrb[46].mxu1 %vm523_vm3, %v5162_v27  ;;  %v15606_v19 = vld [vmem:[#allocation27_spill] sm:$0xff] }
 0x544   : > { %v5050_v17 = vadd.f32 %v5018_v48, %v15598_v58  ;;  %v4988_v28 = vmul.f32 0.1, %v4956_v24  ;;  %v11092_v49 = vpop.f32.mrb[32].mxu0 }
 0x545   : > { %5083 = vst.msk [vmem:[%s14155_s20 + $0x48] sm:$0xff] %vm523_vm3, %v5051_v32  ;;  %5116 = vst.msk [vmem:[#allocation3 + $0xb0] sm:$0xff] %vm523_vm3, %v5051_v32  ;;  %v5021_v23 = vmax.f32 %v4957_v38, %v4989_v50  ;;  %v4959_v13 = vadd.f32 %v11092_v49, %v14143_v45  ;;  %v4808_v62 = vpop.f32.mrb[33].mxu0  ;;  %v15607_v50 = vld [vmem:[#allocation29_spill] sm:$0xff] }
 0x546   : > { %5082 = vst.msk [vmem:[%s14155_s20 + $0x40] sm:$0xff] %vm523_vm3, %v5050_v17  ;;  %5115 = vst.msk [vmem:[#allocation3 + $0xa8] sm:$0xff] %vm523_vm3, %v5050_v17  ;;  %v5020_v26 = vmax.f32 %v4956_v24, %v4988_v28  ;;  %v4958_v41 = vadd.f32 %v14143_v45, %v4808_v62  ;;  %v15608_v28 = vld [vmem:[#allocation30_spill] sm:$0xff] }
 0x547   : > { %v5053_v6 = vadd.f32 %v5021_v23, %v15599_v63  ;;  %v4991_v30 = vmul.f32 0.1, %v4959_v13 }
 0x548   : > { %v5052_v40 = vadd.f32 %v5020_v26, %v15600_v35  ;;  %v4990_v51 = vmul.f32 0.1, %v4958_v41  ;;  %v11095_v54 = vpop.f32.mrb[34].mxu0  ;;  %v14221_v46 = vld [vmem:[#allocation3 + $0x90] sm:$0xff] }
 0x549   : > { %5085 = vst.msk [vmem:[%s14155_s20 + $0x58] sm:$0xff] %vm523_vm3, %v5053_v6  ;;  %5118 = vst.msk [vmem:[#allocation3 + $0xd0] sm:$0xff] %vm523_vm3, %v5053_v6  ;;  %v5023_v61 = vmax.f32 %v4959_v13, %v4991_v30  ;;  %v4961_v5 = vadd.f32 %v11095_v54, %v14143_v45  ;;  %v4818_v7 = vpop.f32.mrb[35].mxu0  ;;  %v14213_v11 = vld [vmem:[#allocation3 + $0x88] sm:$0xff] }
 0x54a   : > { %5084 = vst.msk [vmem:[%s14155_s20 + $0x50] sm:$0xff] %vm523_vm3, %v5052_v40  ;;  %5117 = vst.msk [vmem:[#allocation3 + $0xc8] sm:$0xff] %vm523_vm3, %v5052_v40  ;;  %v5022_v15 = vmax.f32 %v4958_v41, %v4990_v51  ;;  %v4960_v57 = vadd.f32 %v14143_v45, %v4818_v7  ;;  %11134 = vmatprep.mubr.msk.f32.mxu1 %vm523_vm3, %v14213_v11  ;;  %v15609_v40 = vld [vmem:[#allocation32_spill] sm:$0xff] }
 0x54b   : > { %v5055_v2 = vadd.f32 %v5023_v61, %v15601_v56  ;;  %v4993_v59 = vmul.f32 0.1, %v4961_v5  ;;  %11135 = vmatmul.mubr.msk.f32.gmra.mrb[48].mxu1 %vm523_vm3, %v14221_v46  ;;  %v15610_v61 = vld [vmem:[#allocation28_spill] sm:$0xff] }
 0x54c   : > { %v5054_v33 = vadd.f32 %v5022_v15, %v15602_v25  ;;  %v4992_v47 = vmul.f32 0.1, %v4960_v57  ;;  %v11098_v8 = vpop.f32.mrb[36].mxu0 }
 0x54d   : > { %5087 = vst.msk [vmem:[%s14155_s20 + $0x68] sm:$0xff] %vm523_vm3, %v5055_v2  ;;  %5120 = vst.msk [vmem:[#allocation3 + $0xf0] sm:$0xff] %vm523_vm3, %v5055_v2  ;;  %v5025_v55 = vmax.f32 %v4961_v5, %v4993_v59  ;;  %v4963_v12 = vadd.f32 %v11098_v8, %v14143_v45  ;;  %v4828_v31 = vpop.f32.mrb[37].mxu0 }
 0x54e   : > { %5086 = vst.msk [vmem:[%s14155_s20 + $0x60] sm:$0xff] %vm523_vm3, %v5054_v33  ;;  %5119 = vst.msk [vmem:[#allocation3 + $0xe8] sm:$0xff] %vm523_vm3, %v5054_v33  ;;  %v5024_v60 = vmax.f32 %v4960_v57, %v4992_v47  ;;  %v4962_v14 = vadd.f32 %v14143_v45, %v4828_v31  ;;  %v15611_v33 = vld [vmem:[#allocation34_spill] sm:$0xff] }
 0x54f   : > { %v5057_v34 = vadd.f32 %v5025_v55, %v15603_v4  ;;  %v4995_v16 = vmul.f32 0.1, %v4963_v12  ;;  %v15612_v55 = vld [vmem:[#allocation31_spill] sm:$0xff] }
 0x550   : > { %v5056_v3 = vadd.f32 %v5024_v60, %v15604_v36  ;;  %v4994_v1 = vmul.f32 0.1, %v4962_v14  ;;  %v11101_v43 = vpop.f32.mrb[38].mxu0  ;;  %v14249_v0 = vld [vmem:[#allocation3 + $0xd0] sm:$0xff] }
 0x551   : > { %5089 = vst.msk [vmem:[%s14155_s20 + $0x78] sm:$0xff] %vm523_vm3, %v5057_v34  ;;  %5122 = vst.msk [vmem:[#allocation3 + $0x110] sm:$0xff] %vm523_vm3, %v5057_v34  ;;  %v5027_v20 = vmax.f32 %v4963_v12, %v4995_v16  ;;  %v4965_v18 = vadd.f32 %v11101_v43, %v14143_v45  ;;  %v4838_v29 = vpop.f32.mrb[39].mxu0  ;;  %v14241_v53 = vld [vmem:[#allocation3 + $0xc8] sm:$0xff]  ;;  %v15613_v43 = vld [vmem:[#allocation36_spill] sm:$0xff] }
 0x552   : > { %5088 = vst.msk [vmem:[%s14155_s20 + $0x70] sm:$0xff] %vm523_vm3, %v5056_v3  ;;  %5121 = vst.msk [vmem:[#allocation3 + $0x108] sm:$0xff] %vm523_vm3, %v5056_v3  ;;  %v5026_v52 = vmax.f32 %v4962_v14, %v4994_v1  ;;  %v4964_v39 = vadd.f32 %v14143_v45, %v4838_v29  ;;  %11137 = vmatprep.mubr.msk.f32.mxu1 %vm523_vm3, %v14241_v53  ;;  %v15614_v29 = vld [vmem:[#allocation33_spill] sm:$0xff] }
 0x553   : > { %v5059_v9 = vadd.f32 %v5027_v20, %v15605_v44  ;;  %v4997_v21 = vmul.f32 0.1, %v4965_v18  ;;  %11138 = vmatmul.mubr.msk.f32.gmra.mrb[50].mxu1 %vm523_vm3, %v14249_v0 }
 0x554   : > { %v5058_v38 = vadd.f32 %v5026_v52, %v15606_v19  ;;  %v4996_v22 = vmul.f32 0.1, %v4964_v39  ;;  %v11104_v37 = vpop.f32.mrb[40].mxu0 }
 0x555   : > { %5091 = vst.msk [vmem:[%s14155_s20 + $0x88] sm:$0xff] %vm523_vm3, %v5059_v9  ;;  %5124 = vst.msk [vmem:[#allocation3 + $0x130] sm:$0xff] %vm523_vm3, %v5059_v9  ;;  %v5029_v48 = vmax.f32 %v4965_v18, %v4997_v21  ;;  %v4967_v24 = vadd.f32 %v11104_v37, %v14143_v45  ;;  %v4848_v27 = vpop.f32.mrb[41].mxu0  ;;  %v15615_v37 = vld [vmem:[#allocation38_spill] sm:$0xff] }
 0x556   : > { %5090 = vst.msk [vmem:[%s14155_s20 + $0x80] sm:$0xff] %vm523_vm3, %v5058_v38  ;;  %5123 = vst.msk [vmem:[#allocation3 + $0x128] sm:$0xff] %vm523_vm3, %v5058_v38  ;;  %v5028_v10 = vmax.f32 %v4964_v39, %v4996_v22  ;;  %v4966_v32 = vadd.f32 %v14143_v45, %v4848_v27  ;;  %v15616_v27 = vld [vmem:[#allocation35_spill] sm:$0xff] }
 0x557   : > { %v5061_v58 = vadd.f32 %v5029_v48, %v15607_v50  ;;  %v4999_v17 = vmul.f32 0.1, %v4967_v24 }
 0x558   : > { %v5060_v49 = vadd.f32 %v5028_v10, %v15608_v28  ;;  %v4998_v23 = vmul.f32 0.1, %v4966_v32  ;;  %v11107_v13 = vpop.f32.mrb[42].mxu0  ;;  %v14277_v35 = vld [vmem:[#allocation3 + $0x110] sm:$0xff] }
 0x559   : > { %5093 = vst.msk [vmem:[%s14155_s20 + $0x98] sm:$0xff] %vm523_vm3, %v5061_v58  ;;  %5126 = vst.msk [vmem:[#allocation3 + $0x150] sm:$0xff] %vm523_vm3, %v5061_v58  ;;  %v5031_v62 = vmax.f32 %v4967_v24, %v4999_v17  ;;  %v4969_v26 = vadd.f32 %v11107_v13, %v14143_v45  ;;  %v4858_v41 = vpop.f32.mrb[43].mxu0  ;;  %v14269_v63 = vld [vmem:[#allocation3 + $0x108] sm:$0xff] }
 0x55a   : > { %5092 = vst.msk [vmem:[%s14155_s20 + $0x90] sm:$0xff] %vm523_vm3, %v5060_v49  ;;  %5125 = vst.msk [vmem:[#allocation3 + $0x148] sm:$0xff] %vm523_vm3, %v5060_v49  ;;  %v5030_v6 = vmax.f32 %v4966_v32, %v4998_v23  ;;  %v4968_v30 = vadd.f32 %v14143_v45, %v4858_v41  ;;  %11140 = vmatprep.mubr.msk.f32.mxu1 %vm523_vm3, %v14269_v63 }
 0x55b   : > { %v5063_v51 = vadd.f32 %v5031_v62, %v15609_v40  ;;  %v5001_v54 = vmul.f32 0.1, %v4969_v26  ;;  %11141 = vmatmul.mubr.msk.f32.gmra.mrb[52].mxu1 %vm523_vm3, %v14277_v35 }
 0x55c   : > { %v5062_v5 = vadd.f32 %v5030_v6, %v15610_v61  ;;  %v5000_v7 = vmul.f32 0.1, %v4968_v30  ;;  %v11110_v15 = vpop.f32.mrb[44].mxu0  ;;  %v15619_v61 = vld [vmem:[#allocation40_spill] sm:$0xff] }
 0x55d   : > { %5095 = vst.msk [vmem:[%s14155_s20 + $0xa8] sm:$0xff] %vm523_vm3, %v5063_v51  ;;  %5128 = vst.msk [vmem:[#allocation3 + $0x170] sm:$0xff] %vm523_vm3, %v5063_v51  ;;  %v5033_v57 = vmax.f32 %v4969_v26, %v5001_v54  ;;  %v4971_v56 = vadd.f32 %v11110_v15, %v14143_v45  ;;  %v4868_v2 = vpop.f32.mrb[45].mxu0  ;;  %v15617_v26 = vld [vmem:[#allocation39_spill] sm:$0xff] }
 0x55e   : > { %5094 = vst.msk [vmem:[%s14155_s20 + $0xa0] sm:$0xff] %vm523_vm3, %v5062_v5  ;;  %5127 = vst.msk [vmem:[#allocation3 + $0x168] sm:$0xff] %vm523_vm3, %v5062_v5  ;;  %v5032_v59 = vmax.f32 %v4968_v30, %v5000_v7  ;;  %v4970_v25 = vadd.f32 %v14143_v45, %v4868_v2  ;;  %v15618_v30 = vld [vmem:[#allocation37_spill] sm:$0xff] }
 0x55f   : > { %v5065_v47 = vadd.f32 %v5033_v57, %v15611_v33  ;;  %v5003_v8 = vmul.f32 0.1, %v4971_v56  ;;  %v15620_v7 = vld [vmem:[#allocation41_spill] sm:$0xff]  ;;  %v5140_v33 = vld [vmem:[#allocation3 + $0xf] sm:$0xff] }
 0x560   : > { %v5064_v12 = vadd.f32 %v5032_v59, %v15612_v55  ;;  %v5002_v31 = vmul.f32 0.1, %v4970_v25  ;;  %v11113_v60 = vpop.f32.mrb[46].mxu0  ;;  %v14305_v1 = vld [vmem:[#allocation3 + $0x150] sm:$0xff]  ;;  %v9590_v55 = vld [vmem:[%s15321_s7 + $0x68] sm:$0xff] }
 0x561   : > { %5097 = vst.msk [vmem:[%s14155_s20 + $0xb8] sm:$0xff] %vm523_vm3, %v5065_v47  ;;  %5130 = vst.msk [vmem:[#allocation3 + $0x190] sm:$0xff] %vm523_vm3, %v5065_v47  ;;  %v5035_v14 = vmax.f32 %v4971_v56, %v5003_v8  ;;  %v4973_v4 = vadd.f32 %v11113_v60, %v14143_v45  ;;  %v4878_v34 = vpop.f32.mrb[47].mxu0  ;;  %v14297_v16 = vld [vmem:[#allocation3 + $0x148] sm:$0xff]  ;;  %v9571_v59 = vld [vmem:[%s15321_s7 + $0x50] sm:$0xff] }
 0x562   : > { %5096 = vst.msk [vmem:[%s14155_s20 + $0xb0] sm:$0xff] %vm523_vm3, %v5064_v12  ;;  %5129 = vst.msk [vmem:[#allocation3 + $0x188] sm:$0xff] %vm523_vm3, %v5064_v12  ;;  %v5034_v36 = vmax.f32 %v4970_v25, %v5002_v31  ;;  %v4972_v3 = vadd.f32 %v14143_v45, %v4878_v34  ;;  %11143 = vmatprep.mubr.msk.f32.mxu1 %vm523_vm3, %v14297_v16  ;;  %v5139_v56 = vld [vmem:[#allocation3 + $0x7] sm:$0xff]  ;;  %v9572_v25 = vld [vmem:[%s15321_s7 + $0x58] sm:$0xff] }
 0x563   : > { %v5067_v20 = vadd.f32 %v5035_v14, %v15613_v43  ;;  %v5005_v18 = vmul.f32 0.1, %v4973_v4  ;;  %11144 = vmatmul.mubr.msk.f32.gmra.mrb[54].mxu1 %vm523_vm3, %v14305_v1  ;;  %v11696_v47 = vpack.c.bf16 %v9572_v25, %v9571_v59  ;;  %v9589_v8 = vld [vmem:[%s15321_s7 + $0x60] sm:$0xff]  ;;  %v14380_v60 = vld [vmem:[#allocation3 + $0x4f] sm:$0xff] }
 0x564   : > { %v5066_v52 = vadd.f32 %v5034_v36, %v15614_v29  ;;  %v5004_v39 = vmul.f32 0.1, %v4972_v3  ;;  %v11116_v44 = vpop.f32.mrb[48].mxu0  ;;  %v14375_v12 = vld [vmem:[#allocation3 + $0x47] sm:$0xff]  ;;  %v11700_v31 = vpack.c.bf16 %v9590_v55, %v9589_v8  ;;  %v14396_v34 = vld [vmem:[#allocation3 + $0xcf] sm:$0xff] }
 0x565   : > { %5099 = vst.msk [vmem:[%s14155_s20 + $0xc8] sm:$0xff] %vm523_vm3, %v5067_v20  ;;  %5132 = vst.msk [vmem:[#allocation3 + $0x1b0] sm:$0xff] %vm523_vm3, %v5067_v20  ;;  %v5037_v9 = vmax.f32 %v4973_v4, %v5005_v18  ;;  %v4975_v21 = vadd.f32 %v11116_v44, %v14143_v45  ;;  %v4888_v19 = vpop.f32.mrb[49].mxu0  ;;  %v14384_v14 = vld [vmem:[#allocation3 + $0x87] sm:$0xff]  ;;  %v14388_v4 = vld [vmem:[#allocation3 + $0x8f] sm:$0xff] }
 0x566   : > { %5098 = vst.msk [vmem:[%s14155_s20 + $0xc0] sm:$0xff] %vm523_vm3, %v5066_v52  ;;  %5131 = vst.msk [vmem:[#allocation3 + $0x1a8] sm:$0xff] %vm523_vm3, %v5066_v52  ;;  %v5036_v38 = vmax.f32 %v4972_v3, %v5004_v39  ;;  %v4974_v22 = vadd.f32 %v14143_v45, %v4888_v19  ;;  %v14400_v36 = vld [vmem:[#allocation3 + $0x107] sm:$0xff]  ;;  %v14404_v3 = vld [vmem:[#allocation3 + $0x10f] sm:$0xff] }
 0x567   : > { %v5069_v48 = vadd.f32 %v5037_v9, %v15615_v37  ;;  %v5007_v24 = vmul.f32 0.1, %v4975_v21  ;;  %v14408_v43 = vld [vmem:[#allocation3 + $0x147] sm:$0xff]  ;;  %v14412_v20 = vld [vmem:[#allocation3 + $0x14f] sm:$0xff] }
 0x568   : > { %v5068_v10 = vadd.f32 %v5036_v38, %v15616_v27  ;;  %v5006_v32 = vmul.f32 0.1, %v4974_v22  ;;  %v11119_v50 = vpop.f32.mrb[50].mxu0  ;;  %v14333_v62 = vld [vmem:[#allocation3 + $0x190] sm:$0xff]  ;;  %v9610_v37 = vld [vmem:[%s15321_s7 + $0x88] sm:$0xff] }
 0x569   : > { %5101 = vst.msk [vmem:[%s14155_s20 + $0xd8] sm:$0xff] %vm523_vm3, %v5069_v48  ;;  %5134 = vst.msk [vmem:[#allocation3 + $0x1d0] sm:$0xff] %vm523_vm3, %v5069_v48  ;;  %v5039_v58 = vmax.f32 %v4975_v21, %v5007_v24  ;;  %v4977_v17 = vadd.f32 %v11119_v50, %v14143_v45  ;;  %v4898_v28 = vpop.f32.mrb[51].mxu0  ;;  %v14325_v49 = vld [vmem:[#allocation3 + $0x188] sm:$0xff]  ;;  %v9591_v9 = vld [vmem:[%s15321_s7 + $0x70] sm:$0xff] }
 0x56a   : > { %5100 = vst.msk [vmem:[%s14155_s20 + $0xd0] sm:$0xff] %vm523_vm3, %v5068_v10  ;;  %5133 = vst.msk [vmem:[#allocation3 + $0x1c8] sm:$0xff] %vm523_vm3, %v5068_v10  ;;  %v5038_v23 = vmax.f32 %v4974_v22, %v5006_v32  ;;  %v4976_v13 = vadd.f32 %v14143_v45, %v4898_v28  ;;  %11146 = vmatprep.mubr.msk.f32.mxu1 %vm523_vm3, %v14325_v49  ;;  %v14416_v18 = vld [vmem:[#allocation3 + $0x187] sm:$0xff]  ;;  %v14420_v29 = vld [vmem:[#allocation3 + $0x18f] sm:$0xff] }
 0x56b   : > { %v5071_v41 = vadd.f32 %v5039_v58, %v15617_v26  ;;  %v5009_v6 = vmul.f32 0.1, %v4977_v17  ;;  %11147 = vmatmul.mubr.msk.f32.gmra.mrb[56].mxu1 %vm523_vm3, %v14333_v62  ;;  %v5566_v39 = vld [vmem:[#allocation3 + $0x9] sm:$0xff]  ;;  %v9592_v21 = vld [vmem:[%s15321_s7 + $0x78] sm:$0xff]  ;;  %v9609_v22 = vld [vmem:[%s15321_s7 + $0x80] sm:$0xff] }
 0x56c   : > { %v5070_v40 = vadd.f32 %v5038_v23, %v15618_v30  ;;  %v5008_v51 = vmul.f32 0.1, %v4976_v13  ;;  %v5567_v19 = vld [vmem:[#allocation3 + $0x11] sm:$0xff]  ;;  %v11704_v38 = vpack.c.bf16 %v9592_v21, %v9591_v9  ;;  %v14446_v48 = vld [vmem:[#allocation3 + $0x49] sm:$0xff]  ;;  %v11708_v24 = vpack.c.bf16 %v9610_v37, %v9609_v22 }
 0x56d   : > { %5103 = vst.msk [vmem:[%s14155_s20 + $0xe8] sm:$0xff] %vm523_vm3, %v5071_v41  ;;  %5136 = vst.msk [vmem:[#allocation3 + $0x1f0] sm:$0xff] %vm523_vm3, %v5071_v41  ;;  %v5041_v45 = vmax.f32 %v4977_v17, %v5009_v6  ;;  %v14450_v27 = vld [vmem:[#allocation3 + $0x51] sm:$0xff]  ;;  %v14454_v10 = vld [vmem:[#allocation3 + $0x89] sm:$0xff] }
 0x56e   : > { %5102 = vst.msk [vmem:[%s14155_s20 + $0xe0] sm:$0xff] %vm523_vm3, %v5070_v40  ;;  %5135 = vst.msk [vmem:[#allocation3 + $0x1e8] sm:$0xff] %vm523_vm3, %v5070_v40  ;;  %v5040_v54 = vmax.f32 %v4976_v13, %v5008_v51  ;;  %v14458_v32 = vld [vmem:[#allocation3 + $0x91] sm:$0xff]  ;;  %v14462_v50 = vld [vmem:[#allocation3 + $0xc9] sm:$0xff] }
 0x56f   : > { %v5073_v5 = vadd.f32 %v5041_v45, %v15619_v61  ;;  %v14466_v58 = vld [vmem:[#allocation3 + $0xd1] sm:$0xff]  ;;  %v14470_v17 = vld [vmem:[#allocation3 + $0x109] sm:$0xff] }
 0x570   : > { %v5072_v15 = vadd.f32 %v5040_v54, %v15620_v7  ;;  %v14357_v2 = vld [vmem:[#allocation3 + $0x1d0] sm:$0xff]  ;;  %v9612_v45 = vld [vmem:[%s15321_s7 + $0x98] sm:$0xff]  ;;  %v9630_v7 = vld [vmem:[%s15321_s7 + $0xa8] sm:$0xff] }
 0x571   : > { %5105 = vst.msk [vmem:[%s14155_s20 + $0xf8] sm:$0xff] %vm523_vm3, %v5073_v5  ;;  %5138 = vst.msk [vmem:[#allocation3 + $0x210] sm:$0xff] %vm523_vm3, %v5073_v5  ;;  %v14350_v57 = vld [vmem:[#allocation3 + $0x1c8] sm:$0xff]  ;;  %v14474_v28 = vld [vmem:[#allocation3 + $0x111] sm:$0xff] }
 0x572   : > { %5104 = vst.msk [vmem:[%s14155_s20 + $0xf0] sm:$0xff] %vm523_vm3, %v5072_v15  ;;  %5137 = vst.msk [vmem:[#allocation3 + $0x208] sm:$0xff] %vm523_vm3, %v5072_v15  ;;  %11149 = vmatprep.mubr.msk.f32.mxu1 %vm523_vm3, %v14350_v57  ;;  %v14424_v52 = vld [vmem:[#allocation3 + $0x1c7] sm:$0xff]  ;;  %v14428_v44 = vld [vmem:[#allocation3 + $0x1cf] sm:$0xff] }
 0x573   : > { %11150 = vmatmul.mubr.msk.f32.gmra.mrb[58].mxu1 %vm523_vm3, %v14357_v2  ;;  %v14478_v23 = vld [vmem:[#allocation3 + $0x149] sm:$0xff]  ;;  %v14482_v13 = vld [vmem:[#allocation3 + $0x151] sm:$0xff]  ;;  %v9629_v5 = vld [vmem:[%s15321_s7 + $0xa0] sm:$0xff] }
 0x574   : > { %11160 = vmatprep.mubr.msk.f32.mxu1 %vm523_vm3, %v5139_v56  ;;  %v14486_v26 = vld [vmem:[#allocation3 + $0x189] sm:$0xff]  ;;  %v14490_v41 = vld [vmem:[#allocation3 + $0x191] sm:$0xff]  ;;  %v11716_v56 = vpack.c.bf16 %v9630_v7, %v9629_v5 }
 0x575   : > { %v14494_v6 = vld [vmem:[#allocation3 + $0x1c9] sm:$0xff]  ;;  %v14498_v40 = vld [vmem:[#allocation3 + $0x1d1] sm:$0xff] }
 0x576   : > { %v5796_v30 = vld [vmem:[#allocation3 + $0xa] sm:$0xff]  ;;  %v5797_v54 = vld [vmem:[#allocation3 + $0x12] sm:$0xff] }
 0x577   : > { %11161 = vmatmul.mubr.msk.f32.vlgmr.msra.gmra.mrb[44].mxu1 %vm523_vm3, %v5140_v33  ;;  %v9611_v51 = vld [vmem:[%s15321_s7 + $0x90] sm:$0xff]  ;;  %v14586_v5 = vld [vmem:[#allocation3 + $0x67] sm:$0xff] }
 0x578   : > { %11163 = vmatprep.mubr.msk.f32.mxu1 %vm523_vm3, %v14375_v12  ;;  %11695 = vmatpush3.bf16.msra.mxu1 %v14137_v42  ;;  %v14392_v42 = vld [vmem:[#allocation3 + $0xc7] sm:$0xff]  ;;  %v11712_v61 = vpack.c.bf16 %v9612_v45, %v9611_v51  ;;  %v14520_v59 = vld [vmem:[#allocation3 + $0x52] sm:$0xff]  ;;  %15621 = vst [vmem:[#allocation42_spill] sm:$0xff] %v14586_v5 }
 0x579   : > { %11697 = vmatprep.subr.bf16.mxu1 %v11696_v47  ;;  %v14516_v15 = vld [vmem:[#allocation3 + $0x4a] sm:$0xff]  ;;  %v14528_v33 = vld [vmem:[#allocation3 + $0x92] sm:$0xff] }
 0x57a   : > { %v14524_v25 = vld [vmem:[#allocation3 + $0x8a] sm:$0xff]  ;;  %v14536_v8 = vld [vmem:[#allocation3 + $0xd2] sm:$0xff] }
 0x57b   : > { %11164 = vmatmul.mubr.msk.f32.gmra.mrb[46].mxu1 %vm523_vm3, %v14380_v60  ;;  %v14540_v55 = vld [vmem:[#allocation3 + $0x10a] sm:$0xff]  ;;  %v14552_v9 = vld [vmem:[#allocation3 + $0x152] sm:$0xff] }
 0x57c   : > { %11166 = vmatprep.mubr.msk.f32.mxu1 %vm523_vm3, %v14384_v14  ;;  %11699 = vmatpush3.bf16.msra.mxu1 %v11696_v47  ;;  %v14532_v47 = vld [vmem:[#allocation3 + $0xca] sm:$0xff]  ;;  %v14568_v22 = vld [vmem:[#allocation3 + $0x1d2] sm:$0xff] }
 0x57d   : > { %11701 = vmatprep.subr.bf16.mxu1 %v11700_v31  ;;  %v14556_v21 = vld [vmem:[#allocation3 + $0x18a] sm:$0xff] }
 0x57e   : > { %v9631_v37 = vld [vmem:[%s15321_s7 + $0xb0] sm:$0xff] }
 0x57f   : > { %11167 = vmatmul.mubr.msk.f32.gmra.mrb[48].mxu1 %vm523_vm3, %v14388_v4  ;;  %v6027_v45 = vld [vmem:[#allocation3 + $0x2f] sm:$0xff] }
 0x580   : > { %11169 = vmatprep.mubr.msk.f32.mxu1 %vm523_vm3, %v14392_v42 }
 0x583   : > { %11170 = vmatmul.mubr.msk.f32.gmra.mrb[50].mxu1 %vm523_vm3, %v14396_v34 }
 0x584   : > { %11172 = vmatprep.mubr.msk.f32.mxu1 %vm523_vm3, %v14400_v36 }
 0x587   : > { %11173 = vmatmul.mubr.msk.f32.gmra.mrb[52].mxu1 %vm523_vm3, %v14404_v3 }
 0x588   : > { %11175 = vmatprep.mubr.msk.f32.mxu1 %vm523_vm3, %v14408_v43 }
 0x58b   : > { %11176 = vmatmul.mubr.msk.f32.gmra.mrb[54].mxu1 %vm523_vm3, %v14412_v20 }
 0x58c   : > { %11178 = vmatprep.mubr.msk.f32.mxu1 %vm523_vm3, %v14416_v18 }
 0x58f   : > { %11179 = vmatmul.mubr.msk.f32.gmra.mrb[56].mxu1 %vm523_vm3, %v14420_v29 }
 0x590   : > { %11181 = vmatprep.mubr.msk.f32.mxu1 %vm523_vm3, %v14424_v52 }
 0x593   : > { %11182 = vmatmul.mubr.msk.f32.gmra.mrb[58].mxu1 %vm523_vm3, %v14428_v44 }
 0x594   : > { %11192 = vmatprep.mubr.msk.f32.mxu1 %vm523_vm3, %v5566_v39  ;;  %v14548_v39 = vld [vmem:[#allocation3 + $0x14a] sm:$0xff] }
 0x597   : > { %11193 = vmatmul.mubr.msk.f32.vlgmr.msra.gmra.mrb[44].mxu1 %vm523_vm3, %v5567_v19  ;;  %v14560_v19 = vld [vmem:[#allocation3 + $0x192] sm:$0xff] }
 0x598   : > { %11195 = vmatprep.mubr.msk.f32.mxu1 %vm523_vm3, %v14446_v48  ;;  %11703 = vmatpush3.bf16.msra.mxu1 %v11700_v31  ;;  %v14544_v31 = vld [vmem:[#allocation3 + $0x112] sm:$0xff] }
 0x599   : > { %11705 = vmatprep.subr.bf16.mxu1 %v11704_v38 }
 0x59b   : > { %11196 = vmatmul.mubr.msk.f32.gmra.mrb[46].mxu1 %vm523_vm3, %v14450_v27 }
 0x59c   : > { %11198 = vmatprep.mubr.msk.f32.mxu1 %vm523_vm3, %v14454_v10  ;;  %11707 = vmatpush3.bf16.msra.mxu1 %v11704_v38  ;;  %v14564_v38 = vld [vmem:[#allocation3 + $0x1ca] sm:$0xff] }
 0x59d   : > { %11709 = vmatprep.subr.bf16.mxu1 %v11708_v24 }
 0x59f   : > { %11199 = vmatmul.mubr.msk.f32.gmra.mrb[48].mxu1 %vm523_vm3, %v14458_v32 }
 0x5a0   : > { %11201 = vmatprep.mubr.msk.f32.mxu1 %vm523_vm3, %v14462_v50 }
 0x5a3   : > { %11202 = vmatmul.mubr.msk.f32.gmra.mrb[50].mxu1 %vm523_vm3, %v14466_v58 }
 0x5a4   : > { %11204 = vmatprep.mubr.msk.f32.mxu1 %vm523_vm3, %v14470_v17 }
 0x5a7   : > { %11205 = vmatmul.mubr.msk.f32.gmra.mrb[52].mxu1 %vm523_vm3, %v14474_v28 }
 0x5a8   : > { %11207 = vmatprep.mubr.msk.f32.mxu1 %vm523_vm3, %v14478_v23 }
 0x5ab   : > { %11208 = vmatmul.mubr.msk.f32.gmra.mrb[54].mxu1 %vm523_vm3, %v14482_v13 }
 0x5ac   : > { %11210 = vmatprep.mubr.msk.f32.mxu1 %vm523_vm3, %v14486_v26 }
 0x5af   : > { %11211 = vmatmul.mubr.msk.f32.gmra.mrb[56].mxu1 %vm523_vm3, %v14490_v41 }
 0x5b0   : > { %11213 = vmatprep.mubr.msk.f32.mxu1 %vm523_vm3, %v14494_v6 }
 0x5b3   : > { %11214 = vmatmul.mubr.msk.f32.gmra.mrb[58].mxu1 %vm523_vm3, %v14498_v40 }
 0x5b4   : > { %11224 = vmatprep.mubr.msk.f32.mxu1 %vm523_vm3, %v5796_v30  ;;  %v6026_v30 = vld [vmem:[#allocation3 + $0x27] sm:$0xff] }
 0x5b7   : > { %11225 = vmatmul.mubr.msk.f32.vlgmr.msra.gmra.mrb[44].mxu1 %vm523_vm3, %v5797_v54  ;;  %v9649_v54 = vld [vmem:[%s15321_s7 + $0xc0] sm:$0xff] }
 0x5b8   : > { %11227 = vmatprep.mubr.msk.f32.mxu1 %vm523_vm3, %v14516_v15  ;;  %11711 = vmatpush3.bf16.msra.mxu1 %v11708_v24  ;;  %v9632_v24 = vld [vmem:[%s15321_s7 + $0xb8] sm:$0xff] }
 0x5b9   : > { %11713 = vmatprep.subr.bf16.mxu1 %v11712_v61  ;;  %v11720_v51 = vpack.c.bf16 %v9632_v24, %v9631_v37  ;;  %v14590_v37 = vld [vmem:[#allocation3 + $0x6f] sm:$0xff]  ;;  %v14594_v24 = vld [vmem:[#allocation3 + $0xa7] sm:$0xff] }
 0x5ba   : > { %15622 = vst [vmem:[#allocation43_spill] sm:$0xff] %v14590_v37  ;;  %15623 = vst [vmem:[#allocation44_spill] sm:$0xff] %v14594_v24 }
 0x5bb   : > { %11228 = vmatmul.mubr.msk.f32.gmra.mrb[46].mxu1 %vm523_vm3, %v14520_v59 }
 0x5bc   : > { %11230 = vmatprep.mubr.msk.f32.mxu1 %vm523_vm3, %v14524_v25  ;;  %11715 = vmatpush3.bf16.msra.mxu1 %v11712_v61  ;;  %v9650_v61 = vld [vmem:[%s15321_s7 + $0xc8] sm:$0xff] }
 0x5bd   : > { %11717 = vmatprep.subr.bf16.mxu1 %v11716_v56  ;;  %v11724_v7 = vpack.c.bf16 %v9650_v61, %v9649_v54  ;;  %v14610_v54 = vld [vmem:[#allocation3 + $0x127] sm:$0xff] }
 0x5be   : > { %15627 = vst [vmem:[#allocation61_spill] sm:$0xff] %v14610_v54  ;;  %v14618_v61 = vld [vmem:[#allocation3 + $0x167] sm:$0xff] }
 0x5bf   : > { %11231 = vmatmul.mubr.msk.f32.gmra.mrb[48].mxu1 %vm523_vm3, %v14528_v33  ;;  %15629 = vst [vmem:[#allocation64_spill] sm:$0xff] %v14618_v61 }
 0x5c0   : > { %11233 = vmatprep.mubr.msk.f32.mxu1 %vm523_vm3, %v14532_v47 }
 0x5c3   : > { %11234 = vmatmul.mubr.msk.f32.gmra.mrb[50].mxu1 %vm523_vm3, %v14536_v8 }
 0x5c4   : > { %11236 = vmatprep.mubr.msk.f32.mxu1 %vm523_vm3, %v14540_v55 }
 0x5c7   : > { %11237 = vmatmul.mubr.msk.f32.gmra.mrb[52].mxu1 %vm523_vm3, %v14544_v31 }
 0x5c8   : > { %11239 = vmatprep.mubr.msk.f32.mxu1 %vm523_vm3, %v14548_v39 }
 0x5cb   : > { %11240 = vmatmul.mubr.msk.f32.gmra.mrb[54].mxu1 %vm523_vm3, %v14552_v9 }
 0x5cc   : > { %11242 = vmatprep.mubr.msk.f32.mxu1 %vm523_vm3, %v14556_v21 }
 0x5cf   : > { %11243 = vmatmul.mubr.msk.f32.gmra.mrb[56].mxu1 %vm523_vm3, %v14560_v19 }
 0x5d0   : > { %11245 = vmatprep.mubr.msk.f32.mxu1 %vm523_vm3, %v14564_v38 }
 0x5d3   : > { %11246 = vmatmul.mubr.msk.f32.gmra.mrb[58].mxu1 %vm523_vm3, %v14568_v22 }
 0x5d4   : > { %11256 = vmatprep.mubr.msk.f32.mxu1 %vm523_vm3, %v6026_v30  ;;  %v14598_v30 = vld [vmem:[#allocation3 + $0xaf] sm:$0xff] }
 0x5d5   : > { %15624 = vst [vmem:[#allocation45_spill] sm:$0xff] %v14598_v30 }
 0x5d7   : > { %11257 = vmatmul.mubr.msk.f32.vlgmr.msra.gmra.mrb[44].mxu1 %vm523_vm3, %v6027_v45  ;;  %v14606_v45 = vld [vmem:[#allocation3 + $0xef] sm:$0xff] }
 0x5d8   : > { %11259 = vmatprep.mubr.msk.f32.mxu1 %vm523_vm3, %v14586_v5  ;;  %11719 = vmatpush3.bf16.msra.mxu1 %v11716_v56  ;;  %v14602_v56 = vld [vmem:[#allocation3 + $0xe7] sm:$0xff]  ;;  %15626 = vst [vmem:[#allocation47_spill] sm:$0xff] %v14606_v45 }
 0x5d9   : > { %11721 = vmatprep.subr.bf16.mxu1 %v11720_v51  ;;  %15625 = vst [vmem:[#allocation46_spill] sm:$0xff] %v14602_v56  ;;  %v14656_v5 = vld [vmem:[#allocation3 + $0x68] sm:$0xff] }
 0x5da   : > { %15635 = vst [vmem:[#allocation50_spill] sm:$0xff] %v14656_v5 }
 0x5db   : > { %11260 = vmatmul.mubr.msk.f32.gmra.mrb[46].mxu1 %vm523_vm3, %v14590_v37  ;;  %v9670_v37 = vld [vmem:[%s15321_s7 + $0xe8] sm:$0xff] }
 0x5dc   : > { %11262 = vmatprep.mubr.msk.f32.mxu1 %vm523_vm3, %v14594_v24  ;;  %11723 = vmatpush3.bf16.msra.mxu1 %v11720_v51  ;;  %v14614_v51 = vld [vmem:[#allocation3 + $0x12f] sm:$0xff] }
 0x5dd   : > { %11725 = vmatprep.subr.bf16.mxu1 %v11724_v7  ;;  %15628 = vst [vmem:[#allocation63_spill] sm:$0xff] %v14614_v51  ;;  %v6257_v24 = vld [vmem:[#allocation3 + $0x30] sm:$0xff] }
 0x5df   : > { %11263 = vmatmul.mubr.msk.f32.gmra.mrb[48].mxu1 %vm523_vm3, %v14598_v30  ;;  %v6256_v30 = vld [vmem:[#allocation3 + $0x28] sm:$0xff] }
 0x5e0   : > { %11265 = vmatprep.mubr.msk.f32.mxu1 %vm523_vm3, %v14602_v56  ;;  %v14622_v56 = vld [vmem:[#allocation3 + $0x16f] sm:$0xff] }
 0x5e1   : > { %15630 = vst [vmem:[#allocation65_spill] sm:$0xff] %v14622_v56 }
 0x5e3   : > { %11266 = vmatmul.mubr.msk.f32.gmra.mrb[50].mxu1 %vm523_vm3, %v14606_v45  ;;  %v14626_v45 = vld [vmem:[#allocation3 + $0x1a7] sm:$0xff] }
 0x5e4   : > { %11268 = vmatprep.mubr.msk.f32.mxu1 %vm523_vm3, %v14610_v54  ;;  %15631 = vst [vmem:[#allocation67_spill] sm:$0xff] %v14626_v45  ;;  %v14630_v54 = vld [vmem:[#allocation3 + $0x1af] sm:$0xff] }
 0x5e5   : > { %15632 = vst [vmem:[#allocation69_spill] sm:$0xff] %v14630_v54 }
 0x5e7   : > { %11269 = vmatmul.mubr.msk.f32.gmra.mrb[52].mxu1 %vm523_vm3, %v14614_v51  ;;  %v14634_v51 = vld [vmem:[#allocation3 + $0x1e7] sm:$0xff] }
 0x5e8   : > { %11271 = vmatprep.mubr.msk.f32.mxu1 %vm523_vm3, %v14618_v61  ;;  %15633 = vst [vmem:[#allocation48_spill] sm:$0xff] %v14634_v51  ;;  %v14638_v61 = vld [vmem:[#allocation3 + $0x1ef] sm:$0xff] }
 0x5e9   : > { %15634 = vst [vmem:[#allocation49_spill] sm:$0xff] %v14638_v61 }
 0x5eb   : > { %11272 = vmatmul.mubr.msk.f32.gmra.mrb[54].mxu1 %vm523_vm3, %v14622_v56  ;;  %v9651_v56 = vld [vmem:[%s15321_s7 + $0xd0] sm:$0xff] }
 0x5ec   : > { %11274 = vmatprep.mubr.msk.f32.mxu1 %vm523_vm3, %v14626_v45  ;;  %v9652_v45 = vld [vmem:[%s15321_s7 + $0xd8] sm:$0xff] }
 0x5ef   : > { %11275 = vmatmul.mubr.msk.f32.gmra.mrb[56].mxu1 %vm523_vm3, %v14630_v54  ;;  %v11728_v54 = vpack.c.bf16 %v9652_v45, %v9651_v56  ;;  %v14660_v56 = vld [vmem:[#allocation3 + $0x70] sm:$0xff]  ;;  %v14664_v45 = vld [vmem:[#allocation3 + $0xa8] sm:$0xff] }
 0x5f0   : > { %11277 = vmatprep.mubr.msk.f32.mxu1 %vm523_vm3, %v14634_v51  ;;  %v9669_v51 = vld [vmem:[%s15321_s7 + $0xe0] sm:$0xff]  ;;  %15636 = vst [vmem:[#allocation51_spill] sm:$0xff] %v14660_v56  ;;  %15637 = vst [vmem:[#allocation52_spill] sm:$0xff] %v14664_v45 }
 0x5f3   : > { %11278 = vmatmul.mubr.msk.f32.gmra.mrb[58].mxu1 %vm523_vm3, %v14638_v61  ;;  %v14726_v61 = vld [vmem:[#allocation3 + $0x69] sm:$0xff] }
 0x5f4   : > { %11288 = vmatprep.mubr.msk.f32.mxu1 %vm523_vm3, %v6256_v30  ;;  %v11732_v30 = vpack.c.bf16 %v9670_v37, %v9669_v51  ;;  %v14676_v37 = vld [vmem:[#allocation3 + $0xf0] sm:$0xff]  ;;  %v14680_v51 = vld [vmem:[#allocation3 + $0x128] sm:$0xff]  ;;  %15649 = vst [vmem:[#allocation70_spill] sm:$0xff] %v14726_v61 }
 0x5f5   : > { %15640 = vst [vmem:[#allocation55_spill] sm:$0xff] %v14676_v37  ;;  %15641 = vst [vmem:[#allocation56_spill] sm:$0xff] %v14680_v51 }
 0x5f7   : > { %11289 = vmatmul.mubr.msk.f32.vlgmr.msra.gmra.mrb[44].mxu1 %vm523_vm3, %v6257_v24  ;;  %v14668_v24 = vld [vmem:[#allocation3 + $0xb0] sm:$0xff] }
 0x5f8   : > { %11291 = vmatprep.mubr.msk.f32.mxu1 %vm523_vm3, %v14656_v5  ;;  %11727 = vmatpush3.bf16.msra.mxu1 %v11724_v7  ;;  %15638 = vst [vmem:[#allocation53_spill] sm:$0xff] %v14668_v24  ;;  %v14672_v7 = vld [vmem:[#allocation3 + $0xe8] sm:$0xff] }
 0x5f9   : > { %11729 = vmatprep.subr.bf16.mxu1 %v11728_v54  ;;  %15639 = vst [vmem:[#allocation54_spill] sm:$0xff] %v14672_v7  ;;  %v9690_v5 = vld [vmem:[%s15321_s7 + $0x108] sm:$0xff] }
 0x5fb   : > { %11292 = vmatmul.mubr.msk.f32.gmra.mrb[46].mxu1 %vm523_vm3, %v14660_v56  ;;  %v6487_v56 = vld [vmem:[#allocation3 + $0x31] sm:$0xff] }
 0x5fc   : > { %11294 = vmatprep.mubr.msk.f32.mxu1 %vm523_vm3, %v14664_v45  ;;  %11731 = vmatpush3.bf16.msra.mxu1 %v11728_v54  ;;  %v14684_v54 = vld [vmem:[#allocation3 + $0x130] sm:$0xff] }
 0x5fd   : > { %11733 = vmatprep.subr.bf16.mxu1 %v11732_v30  ;;  %15642 = vst [vmem:[#allocation57_spill] sm:$0xff] %v14684_v54  ;;  %v6486_v45 = vld [vmem:[#allocation3 + $0x29] sm:$0xff] }
 0x5ff   : > { %11295 = vmatmul.mubr.msk.f32.gmra.mrb[48].mxu1 %vm523_vm3, %v14668_v24  ;;  %v14688_v24 = vld [vmem:[#allocation3 + $0x168] sm:$0xff] }
 0x600   : > { %11297 = vmatprep.mubr.msk.f32.mxu1 %vm523_vm3, %v14672_v7  ;;  %15643 = vst [vmem:[#allocation58_spill] sm:$0xff] %v14688_v24  ;;  %v14692_v7 = vld [vmem:[#allocation3 + $0x170] sm:$0xff] }
 0x601   : > { %15644 = vst [vmem:[#allocation59_spill] sm:$0xff] %v14692_v7 }
 0x603   : > { %11298 = vmatmul.mubr.msk.f32.gmra.mrb[50].mxu1 %vm523_vm3, %v14676_v37  ;;  %v14696_v37 = vld [vmem:[#allocation3 + $0x1a8] sm:$0xff] }
 0x604   : > { %11300 = vmatprep.mubr.msk.f32.mxu1 %vm523_vm3, %v14680_v51  ;;  %15645 = vst [vmem:[#allocation60_spill] sm:$0xff] %v14696_v37  ;;  %v14700_v51 = vld [vmem:[#allocation3 + $0x1b0] sm:$0xff] }
 0x605   : > { %15646 = vst [vmem:[#allocation62_spill] sm:$0xff] %v14700_v51 }
 0x607   : > { %11301 = vmatmul.mubr.msk.f32.gmra.mrb[52].mxu1 %vm523_vm3, %v14684_v54  ;;  %v14704_v54 = vld [vmem:[#allocation3 + $0x1e8] sm:$0xff] }
 0x608   : > { %11303 = vmatprep.mubr.msk.f32.mxu1 %vm523_vm3, %v14688_v24  ;;  %15647 = vst [vmem:[#allocation66_spill] sm:$0xff] %v14704_v54  ;;  %v14708_v24 = vld [vmem:[#allocation3 + $0x1f0] sm:$0xff] }
 0x609   : > { %15648 = vst [vmem:[#allocation68_spill] sm:$0xff] %v14708_v24 }
 0x60b   : > { %11304 = vmatmul.mubr.msk.f32.gmra.mrb[54].mxu1 %vm523_vm3, %v14692_v7  ;;  %v9671_v7 = vld [vmem:[%s15321_s7 + $0xf0] sm:$0xff] }
 0x60c   : > { %11306 = vmatprep.mubr.msk.f32.mxu1 %vm523_vm3, %v14696_v37  ;;  %v9672_v37 = vld [vmem:[%s15321_s7 + $0xf8] sm:$0xff] }
 0x60f   : > { %11307 = vmatmul.mubr.msk.f32.gmra.mrb[56].mxu1 %vm523_vm3, %v14700_v51  ;;  %v11736_v51 = vpack.c.bf16 %v9672_v37, %v9671_v7  ;;  %v14730_v7 = vld [vmem:[#allocation3 + $0x71] sm:$0xff]  ;;  %v14734_v37 = vld [vmem:[#allocation3 + $0xa9] sm:$0xff] }
 0x610   : > { %11309 = vmatprep.mubr.msk.f32.mxu1 %vm523_vm3, %v14704_v54  ;;  %v9689_v54 = vld [vmem:[%s15321_s7 + $0x100] sm:$0xff]  ;;  %15650 = vst [vmem:[#allocation10_spill] sm:$0xff] %v14730_v7  ;;  %15651 = vst [vmem:[#allocation11_spill] sm:$0xff] %v14734_v37 }
 0x613   : > { %11310 = vmatmul.mubr.msk.f32.gmra.mrb[58].mxu1 %vm523_vm3, %v14708_v24  ;;  %v14796_v24 = vld [vmem:[#allocation3 + $0x6a] sm:$0xff] }
 0x614   : > { %11320 = vmatprep.mubr.msk.f32.mxu1 %vm523_vm3, %v6486_v45  ;;  %v11740_v45 = vpack.c.bf16 %v9690_v5, %v9689_v54  ;;  %v14746_v5 = vld [vmem:[#allocation3 + $0xf1] sm:$0xff]  ;;  %v14750_v54 = vld [vmem:[#allocation3 + $0x129] sm:$0xff] }
 0x615   : > { %15654 = vst [vmem:[#allocation14_spill] sm:$0xff] %v14746_v5  ;;  %15655 = vst [vmem:[#allocation15_spill] sm:$0xff] %v14750_v54 }
 0x617   : > { %11321 = vmatmul.mubr.msk.f32.vlgmr.msra.gmra.mrb[44].mxu1 %vm523_vm3, %v6487_v56  ;;  %v14738_v56 = vld [vmem:[#allocation3 + $0xb1] sm:$0xff] }
 0x618   : > { %11323 = vmatprep.mubr.msk.f32.mxu1 %vm523_vm3, %v14726_v61  ;;  %11735 = vmatpush3.bf16.msra.mxu1 %v11732_v30  ;;  %15652 = vst [vmem:[#allocation12_spill] sm:$0xff] %v14738_v56  ;;  %v14742_v30 = vld [vmem:[#allocation3 + $0xe9] sm:$0xff] }
 0x619   : > { %11737 = vmatprep.subr.bf16.mxu1 %v11736_v51  ;;  %15653 = vst [vmem:[#allocation13_spill] sm:$0xff] %v14742_v30  ;;  %v9710_v61 = vld [vmem:[%s15321_s7 + $0x128] sm:$0xff] }
 0x61b   : > { %11324 = vmatmul.mubr.msk.f32.gmra.mrb[46].mxu1 %vm523_vm3, %v14730_v7  ;;  %v6717_v7 = vld [vmem:[#allocation3 + $0x32] sm:$0xff] }
 0x61c   : > { %11326 = vmatprep.mubr.msk.f32.mxu1 %vm523_vm3, %v14734_v37  ;;  %11739 = vmatpush3.bf16.msra.mxu1 %v11736_v51  ;;  %v14754_v51 = vld [vmem:[#allocation3 + $0x131] sm:$0xff] }
 0x61d   : > { %11741 = vmatprep.subr.bf16.mxu1 %v11740_v45  ;;  %15656 = vst [vmem:[#allocation16_spill] sm:$0xff] %v14754_v51  ;;  %v6716_v37 = vld [vmem:[#allocation3 + $0x2a] sm:$0xff] }
 0x61f   : > { %11327 = vmatmul.mubr.msk.f32.gmra.mrb[48].mxu1 %vm523_vm3, %v14738_v56  ;;  %v14758_v56 = vld [vmem:[#allocation3 + $0x169] sm:$0xff] }
 0x620   : > { %11329 = vmatprep.mubr.msk.f32.mxu1 %vm523_vm3, %v14742_v30  ;;  %15657 = vst [vmem:[#allocation17_spill] sm:$0xff] %v14758_v56  ;;  %v14762_v30 = vld [vmem:[#allocation3 + $0x171] sm:$0xff] }
 0x621   : > { %15658 = vst [vmem:[#allocation18_spill] sm:$0xff] %v14762_v30 }
 0x623   : > { %11330 = vmatmul.mubr.msk.f32.gmra.mrb[50].mxu1 %vm523_vm3, %v14746_v5  ;;  %v14766_v5 = vld [vmem:[#allocation3 + $0x1a9] sm:$0xff] }
 0x624   : > { %11332 = vmatprep.mubr.msk.f32.mxu1 %vm523_vm3, %v14750_v54  ;;  %15659 = vst [vmem:[#allocation19_spill] sm:$0xff] %v14766_v5  ;;  %v14770_v54 = vld [vmem:[#allocation3 + $0x1b1] sm:$0xff] }
 0x625   : > { %15660 = vst [vmem:[#allocation20_spill] sm:$0xff] %v14770_v54 }
 0x627   : > { %11333 = vmatmul.mubr.msk.f32.gmra.mrb[52].mxu1 %vm523_vm3, %v14754_v51  ;;  %v14774_v51 = vld [vmem:[#allocation3 + $0x1e9] sm:$0xff] }
 0x628   : > { %11335 = vmatprep.mubr.msk.f32.mxu1 %vm523_vm3, %v14758_v56  ;;  %15661 = vst [vmem:[#allocation21_spill] sm:$0xff] %v14774_v51  ;;  %v14778_v56 = vld [vmem:[#allocation3 + $0x1f1] sm:$0xff] }
 0x62b   : > { %11336 = vmatmul.mubr.msk.f32.gmra.mrb[54].mxu1 %vm523_vm3, %v14762_v30  ;;  %v9691_v30 = vld [vmem:[%s15321_s7 + $0x110] sm:$0xff] }
 0x62c   : > { %11338 = vmatprep.mubr.msk.f32.mxu1 %vm523_vm3, %v14766_v5  ;;  %v9692_v5 = vld [vmem:[%s15321_s7 + $0x118] sm:$0xff] }
 0x62f   : > { %11339 = vmatmul.mubr.msk.f32.gmra.mrb[56].mxu1 %vm523_vm3, %v14770_v54  ;;  %v11744_v54 = vpack.c.bf16 %v9692_v5, %v9691_v30  ;;  %v14800_v30 = vld [vmem:[#allocation3 + $0x72] sm:$0xff]  ;;  %v14804_v5 = vld [vmem:[#allocation3 + $0xaa] sm:$0xff] }
 0x630   : > { %11341 = vmatprep.mubr.msk.f32.mxu1 %vm523_vm3, %v14774_v51  ;;  %v9709_v51 = vld [vmem:[%s15321_s7 + $0x120] sm:$0xff]  ;;  %15662 = vst [vmem:[#allocation22_spill] sm:$0xff] %v14804_v5 }
 0x633   : > { %11342 = vmatmul.mubr.msk.f32.gmra.mrb[58].mxu1 %vm523_vm3, %v14778_v56 }
 0x634   : > { %11352 = vmatprep.mubr.msk.f32.mxu1 %vm523_vm3, %v6716_v37  ;;  %v11748_v37 = vpack.c.bf16 %v9710_v61, %v9709_v51  ;;  %v14816_v61 = vld [vmem:[#allocation3 + $0xf2] sm:$0xff]  ;;  %v14820_v51 = vld [vmem:[#allocation3 + $0x12a] sm:$0xff] }
 0x635   : > { %15665 = vst [vmem:[#allocation25_spill] sm:$0xff] %v14816_v61  ;;  %15666 = vst [vmem:[#allocation26_spill] sm:$0xff] %v14820_v51 }
 0x637   : > { %11353 = vmatmul.mubr.msk.f32.vlgmr.msra.gmra.mrb[44].mxu1 %vm523_vm3, %v6717_v7  ;;  %v14808_v7 = vld [vmem:[#allocation3 + $0xb2] sm:$0xff] }
 0x638   : > { %11355 = vmatprep.mubr.msk.f32.mxu1 %vm523_vm3, %v14796_v24  ;;  %11743 = vmatpush3.bf16.msra.mxu1 %v11740_v45  ;;  %15663 = vst [vmem:[#allocation23_spill] sm:$0xff] %v14808_v7  ;;  %v14812_v45 = vld [vmem:[#allocation3 + $0xea] sm:$0xff] }
 0x639   : > { %11745 = vmatprep.subr.bf16.mxu1 %v11744_v54  ;;  %15664 = vst [vmem:[#allocation24_spill] sm:$0xff] %v14812_v45 }
 0x63b   : > { %11356 = vmatmul.mubr.msk.f32.gmra.mrb[46].mxu1 %vm523_vm3, %v14800_v30 }
 0x63c   : > { %11358 = vmatprep.mubr.msk.f32.mxu1 %vm523_vm3, %v14804_v5  ;;  %11747 = vmatpush3.bf16.msra.mxu1 %v11744_v54  ;;  %v14824_v54 = vld [vmem:[#allocation3 + $0x132] sm:$0xff]  ;;  %v9730_v5 = vld [vmem:[%s15321_s7 + $0x148] sm:$0xff] }
 0x63d   : > { %11749 = vmatprep.subr.bf16.mxu1 %v11748_v37  ;;  %15667 = vst [vmem:[#allocation27_spill] sm:$0xff] %v14824_v54 }
 0x63f   : > { %11359 = vmatmul.mubr.msk.f32.gmra.mrb[48].mxu1 %vm523_vm3, %v14808_v7  ;;  %v14828_v7 = vld [vmem:[#allocation3 + $0x16a] sm:$0xff] }
 0x640   : > { %11361 = vmatprep.mubr.msk.f32.mxu1 %vm523_vm3, %v14812_v45  ;;  %15668 = vst [vmem:[#allocation29_spill] sm:$0xff] %v14828_v7  ;;  %v14832_v45 = vld [vmem:[#allocation3 + $0x172] sm:$0xff] }
 0x641   : > { %15669 = vst [vmem:[#allocation30_spill] sm:$0xff] %v14832_v45 }
 0x643   : > { %11362 = vmatmul.mubr.msk.f32.gmra.mrb[50].mxu1 %vm523_vm3, %v14816_v61  ;;  %v14836_v61 = vld [vmem:[#allocation3 + $0x1aa] sm:$0xff] }
 0x644   : > { %11364 = vmatprep.mubr.msk.f32.mxu1 %vm523_vm3, %v14820_v51  ;;  %15670 = vst [vmem:[#allocation32_spill] sm:$0xff] %v14836_v61  ;;  %v14840_v51 = vld [vmem:[#allocation3 + $0x1b2] sm:$0xff] }
 0x645   : > { %15671 = vst [vmem:[#allocation28_spill] sm:$0xff] %v14840_v51 }
 0x647   : > { %11365 = vmatmul.mubr.msk.f32.gmra.mrb[52].mxu1 %vm523_vm3, %v14824_v54  ;;  %v14844_v54 = vld [vmem:[#allocation3 + $0x1ea] sm:$0xff] }
 0x648   : > { %11367 = vmatprep.mubr.msk.f32.mxu1 %vm523_vm3, %v14828_v7  ;;  %15672 = vst [vmem:[#allocation34_spill] sm:$0xff] %v14844_v54  ;;  %v14848_v7 = vld [vmem:[#allocation3 + $0x1f2] sm:$0xff] }
 0x649   : > { %15673 = vst [vmem:[#allocation31_spill] sm:$0xff] %v14848_v7 }
 0x64b   : > { %11368 = vmatmul.mubr.msk.f32.gmra.mrb[54].mxu1 %vm523_vm3, %v14832_v45  ;;  %v9711_v45 = vld [vmem:[%s15321_s7 + $0x130] sm:$0xff] }
 0x64c   : > { %11370 = vmatprep.mubr.msk.f32.mxu1 %vm523_vm3, %v14836_v61  ;;  %v9712_v61 = vld [vmem:[%s15321_s7 + $0x138] sm:$0xff] }
 0x64f   : > { %11371 = vmatmul.mubr.msk.f32.gmra.mrb[56].mxu1 %vm523_vm3, %v14840_v51  ;;  %v11752_v51 = vpack.c.bf16 %v9712_v61, %v9711_v45  ;;  %v15690_v45 = vld [vmem:[#allocation52_spill] sm:$0xff] }
 0x650   : > { %11373 = vmatprep.mubr.msk.f32.mxu1 %vm523_vm3, %v14844_v54  ;;  %v9729_v54 = vld [vmem:[%s15321_s7 + $0x140] sm:$0xff] }
 0x653   : > { %11374 = vmatmul.mubr.msk.f32.gmra.mrb[58].mxu1 %vm523_vm3, %v14848_v7  ;;  %v11756_v7 = vpack.c.bf16 %v9730_v5, %v9729_v54  ;;  %v9830_v5 = vld [vmem:[%s15321_s7 + $0x1e8] sm:$0xff]  ;;  %v15692_v54 = vld [vmem:[#allocation54_spill] sm:$0xff] }
 0x654   : > { %11384 = vmatprep.mubr.msk.f32.mxu1 %vm523_vm3, %v14375_v12  ;;  %v6961_v12 = vld [vmem:[#allocation3 + $0x207] sm:$0xff] }
 0x657   : > { %11385 = vmatmul.mubr.msk.f32.vlgmr.msra.gmra.mrb[44].mxu1 %vm523_vm3, %v14380_v60  ;;  %v6962_v60 = vld [vmem:[#allocation3 + $0x20f] sm:$0xff] }
 0x658   : > { %11387 = vmatprep.mubr.msk.f32.mxu1 %vm523_vm3, %v14384_v14  ;;  %11751 = vmatpush3.bf16.msra.mxu1 %v11748_v37  ;;  %v9731_v14 = vld [vmem:[%s15321_s7 + $0x150] sm:$0xff]  ;;  %v9829_v37 = vld [vmem:[%s15321_s7 + $0x1e0] sm:$0xff] }
 0x659   : > { %11753 = vmatprep.subr.bf16.mxu1 %v11752_v51  ;;  %v11796_v61 = vpack.c.bf16 %v9830_v5, %v9829_v37 }
 0x65b   : > { %11388 = vmatmul.mubr.msk.f32.gmra.mrb[46].mxu1 %vm523_vm3, %v14388_v4  ;;  %v9732_v4 = vld [vmem:[%s15321_s7 + $0x158] sm:$0xff] }
 0x65c   : > { %11390 = vmatprep.mubr.msk.f32.mxu1 %vm523_vm3, %v14392_v42  ;;  %11755 = vmatpush3.bf16.msra.mxu1 %v11752_v51  ;;  %v7177_v42 = vld [vmem:[#allocation3 + $0x48] sm:$0xff]  ;;  %v15691_v51 = vld [vmem:[#allocation53_spill] sm:$0xff] }
 0x65d   : > { %11757 = vmatprep.subr.bf16.mxu1 %v11756_v7 }
 0x65f   : > { %11391 = vmatmul.mubr.msk.f32.gmra.mrb[48].mxu1 %vm523_vm3, %v14396_v34  ;;  %v11760_v34 = vpack.c.bf16 %v9732_v4, %v9731_v14  ;;  %v15695_v14 = vld [vmem:[#allocation57_spill] sm:$0xff]  ;;  %v15696_v4 = vld [vmem:[#allocation58_spill] sm:$0xff] }
 0x660   : > { %11393 = vmatprep.mubr.msk.f32.mxu1 %vm523_vm3, %v14400_v36  ;;  %v7178_v36 = vld [vmem:[#allocation3 + $0x50] sm:$0xff] }
 0x663   : > { %11394 = vmatmul.mubr.msk.f32.gmra.mrb[50].mxu1 %vm523_vm3, %v14404_v3  ;;  %v9749_v3 = vld [vmem:[%s15321_s7 + $0x160] sm:$0xff] }
 0x664   : > { %11396 = vmatprep.mubr.msk.f32.mxu1 %vm523_vm3, %v14408_v43  ;;  %v9750_v43 = vld [vmem:[%s15321_s7 + $0x168] sm:$0xff] }
 0x667   : > { %11397 = vmatmul.mubr.msk.f32.gmra.mrb[52].mxu1 %vm523_vm3, %v14412_v20  ;;  %v11764_v20 = vpack.c.bf16 %v9750_v43, %v9749_v3  ;;  %v15700_v3 = vld [vmem:[#allocation66_spill] sm:$0xff]  ;;  %v8112_v43 = vld [vmem:[#allocation3 + $0x228] sm:$0xff] }
 0x668   : > { %11399 = vmatprep.mubr.msk.f32.mxu1 %vm523_vm3, %v14416_v18 }
 0x66b   : > { %11400 = vmatmul.mubr.msk.f32.gmra.mrb[54].mxu1 %vm523_vm3, %v14420_v29  ;;  %v9789_v29 = vld [vmem:[%s15321_s7 + $0x1a0] sm:$0xff] }
 0x66c   : > { %11402 = vmatprep.mubr.msk.f32.mxu1 %vm523_vm3, %v14424_v52  ;;  %v9790_v52 = vld [vmem:[%s15321_s7 + $0x1a8] sm:$0xff] }
 0x66f   : > { %11403 = vmatmul.mubr.msk.f32.gmra.mrb[56].mxu1 %vm523_vm3, %v14428_v44  ;;  %v11780_v44 = vpack.c.bf16 %v9790_v52, %v9789_v29  ;;  %v15711_v29 = vld [vmem:[#allocation18_spill] sm:$0xff]  ;;  %v15712_v52 = vld [vmem:[#allocation19_spill] sm:$0xff] }
 0x670   : > { %11405 = vmatprep.mubr.msk.f32.mxu1 %vm523_vm3, %v6961_v12  ;;  %v15693_v12 = vld [vmem:[#allocation55_spill] sm:$0xff] }
 0x673   : > { %11406 = vmatmul.mubr.msk.f32.gmra.mrb[58].mxu1 %vm523_vm3, %v6962_v60  ;;  %v15694_v60 = vld [vmem:[#allocation56_spill] sm:$0xff] }
 0x674   : > { %11416 = vmatprep.mubr.msk.f32.mxu1 %vm523_vm3, %v7177_v42  ;;  %v15697_v42 = vld [vmem:[#allocation59_spill] sm:$0xff] }
 0x677   : > { %11417 = vmatmul.mubr.msk.f32.vlgmr.msra.gmra.mrb[44].mxu1 %vm523_vm3, %v7178_v36  ;;  %v15699_v36 = vld [vmem:[#allocation62_spill] sm:$0xff] }
 0x678   : > { %11419 = vmatprep.mubr.msk.f32.mxu1 %vm523_vm3, %v14213_v11  ;;  %11759 = vmatpush3.bf16.msra.mxu1 %v11756_v7  ;;  %v7191_v11 = vld [vmem:[#allocation3 + $0x208] sm:$0xff] }
 0x679   : > { %11761 = vmatprep.subr.bf16.mxu1 %v11760_v34  ;;  %v15689_v7 = vld [vmem:[#allocation51_spill] sm:$0xff] }
 0x67b   : > { %11420 = vmatmul.mubr.msk.f32.gmra.mrb[46].mxu1 %vm523_vm3, %v14221_v46  ;;  %v7192_v46 = vld [vmem:[#allocation3 + $0x210] sm:$0xff] }
 0x67c   : > { %11422 = vmatprep.mubr.msk.f32.mxu1 %vm523_vm3, %v14241_v53  ;;  %11763 = vmatpush3.bf16.msra.mxu1 %v11760_v34  ;;  %v9751_v53 = vld [vmem:[%s15321_s7 + $0x170] sm:$0xff] }
 0x67d   : > { %11765 = vmatprep.subr.bf16.mxu1 %v11764_v20  ;;  %v15698_v34 = vld [vmem:[#allocation60_spill] sm:$0xff] }
 0x67f   : > { %11423 = vmatmul.mubr.msk.f32.gmra.mrb[48].mxu1 %vm523_vm3, %v14249_v0  ;;  %v9752_v0 = vld [vmem:[%s15321_s7 + $0x178] sm:$0xff] }
 0x680   : > { %11425 = vmatprep.mubr.msk.f32.mxu1 %vm523_vm3, %v14269_v63  ;;  %v11768_v63 = vpack.c.bf16 %v9752_v0, %v9751_v53  ;;  %v9832_v53 = vld [vmem:[%s15321_s7 + $0x1f8] sm:$0xff]  ;;  %v15702_v0 = vld [vmem:[#allocation70_spill] sm:$0xff] }
 0x683   : > { %11426 = vmatmul.mubr.msk.f32.gmra.mrb[50].mxu1 %vm523_vm3, %v14277_v35  ;;  %v9769_v35 = vld [vmem:[%s15321_s7 + $0x180] sm:$0xff] }
 0x684   : > { %11428 = vmatprep.mubr.msk.f32.mxu1 %vm523_vm3, %v14297_v16  ;;  %v9770_v16 = vld [vmem:[%s15321_s7 + $0x188] sm:$0xff] }
 0x687   : > { %11429 = vmatmul.mubr.msk.f32.gmra.mrb[52].mxu1 %vm523_vm3, %v14305_v1  ;;  %v11772_v1 = vpack.c.bf16 %v9770_v16, %v9769_v35  ;;  %v15703_v35 = vld [vmem:[#allocation10_spill] sm:$0xff]  ;;  %v15704_v16 = vld [vmem:[#allocation11_spill] sm:$0xff] }
 0x688   : > { %11431 = vmatprep.mubr.msk.f32.mxu1 %vm523_vm3, %v14325_v49  ;;  %v7421_v49 = vld [vmem:[#allocation3 + $0x209] sm:$0xff] }
 0x68b   : > { %11432 = vmatmul.mubr.msk.f32.gmra.mrb[54].mxu1 %vm523_vm3, %v14333_v62  ;;  %v7422_v62 = vld [vmem:[#allocation3 + $0x211] sm:$0xff] }
 0x68c   : > { %11434 = vmatprep.mubr.msk.f32.mxu1 %vm523_vm3, %v14350_v57  ;;  %v9771_v57 = vld [vmem:[%s15321_s7 + $0x190] sm:$0xff] }
 0x68f   : > { %11435 = vmatmul.mubr.msk.f32.gmra.mrb[56].mxu1 %vm523_vm3, %v14357_v2  ;;  %v9772_v2 = vld [vmem:[%s15321_s7 + $0x198] sm:$0xff] }
 0x690   : > { %11437 = vmatprep.mubr.msk.f32.mxu1 %vm523_vm3, %v7191_v11  ;;  %v11776_v18 = vpack.c.bf16 %v9772_v2, %v9771_v57  ;;  %v8113_v11 = vld [vmem:[#allocation3 + $0x230] sm:$0xff]  ;;  %v15708_v57 = vld [vmem:[#allocation15_spill] sm:$0xff] }
 0x691   : > { %v15709_v2 = vld [vmem:[#allocation16_spill] sm:$0xff] }
 0x693   : > { %11438 = vmatmul.mubr.msk.f32.gmra.mrb[58].mxu1 %vm523_vm3, %v7192_v46  ;;  %v9831_v46 = vld [vmem:[%s15321_s7 + $0x1f0] sm:$0xff] }
 0x694   : > { %11448 = vmatprep.mubr.msk.f32.mxu1 %vm523_vm3, %v14446_v48  ;;  %v7651_v48 = vld [vmem:[#allocation3 + $0x20a] sm:$0xff] }
 0x697   : > { %11449 = vmatmul.mubr.msk.f32.vlgmr.msra.gmra.mrb[44].mxu1 %vm523_vm3, %v14450_v27  ;;  %v7652_v27 = vld [vmem:[#allocation3 + $0x212] sm:$0xff] }
 0x698   : > { %11451 = vmatprep.mubr.msk.f32.mxu1 %vm523_vm3, %v14454_v10  ;;  %11767 = vmatpush3.bf16.msra.mxu1 %v11764_v20  ;;  %v9791_v10 = vld [vmem:[%s15321_s7 + $0x1b0] sm:$0xff] }
 0x699   : > { %11769 = vmatprep.subr.bf16.mxu1 %v11768_v63  ;;  %v15701_v20 = vld [vmem:[#allocation68_spill] sm:$0xff] }
 0x69b   : > { %11452 = vmatmul.mubr.msk.f32.gmra.mrb[46].mxu1 %vm523_vm3, %v14458_v32  ;;  %v9792_v32 = vld [vmem:[%s15321_s7 + $0x1b8] sm:$0xff] }
 0x69c   : > { %11454 = vmatprep.mubr.msk.f32.mxu1 %vm523_vm3, %v14462_v50  ;;  %11771 = vmatpush3.bf16.msra.mxu1 %v11768_v63  ;;  %v15674_v50 = vld [vmem:[#allocation42_spill] sm:$0xff]  ;;  %v11800_v63 = vpack.c.bf16 %v9832_v53, %v9831_v46 }
 0x69d   : > { %11773 = vmatprep.subr.bf16.mxu1 %v11772_v1 }
 0x69f   : > { %11455 = vmatmul.mubr.msk.f32.gmra.mrb[48].mxu1 %vm523_vm3, %v14466_v58  ;;  %v11784_v58 = vpack.c.bf16 %v9792_v32, %v9791_v10  ;;  %v8343_v10 = vld [vmem:[#allocation3 + $0x231] sm:$0xff]  ;;  %v15715_v32 = vld [vmem:[#allocation22_spill] sm:$0xff] }
 0x6a0   : > { %11457 = vmatprep.mubr.msk.f32.mxu1 %vm523_vm3, %v14470_v17  ;;  %v9809_v17 = vld [vmem:[%s15321_s7 + $0x1c0] sm:$0xff] }
 0x6a3   : > { %11458 = vmatmul.mubr.msk.f32.gmra.mrb[50].mxu1 %vm523_vm3, %v14474_v28  ;;  %v9810_v28 = vld [vmem:[%s15321_s7 + $0x1c8] sm:$0xff] }
 0x6a4   : > { %11460 = vmatprep.mubr.msk.f32.mxu1 %vm523_vm3, %v14478_v23  ;;  %v15675_v23 = vld [vmem:[#allocation43_spill] sm:$0xff] }
 0x6a7   : > { %11461 = vmatmul.mubr.msk.f32.gmra.mrb[52].mxu1 %vm523_vm3, %v14482_v13  ;;  %v15676_v13 = vld [vmem:[#allocation44_spill] sm:$0xff] }
 0x6a8   : > { %11463 = vmatprep.mubr.msk.f32.mxu1 %vm523_vm3, %v14486_v26  ;;  %v11788_v26 = vpack.c.bf16 %v9810_v28, %v9809_v17  ;;  %v15719_v17 = vld [vmem:[#allocation26_spill] sm:$0xff]  ;;  %v15720_v28 = vld [vmem:[#allocation27_spill] sm:$0xff] }
 0x6ab   : > { %11464 = vmatmul.mubr.msk.f32.gmra.mrb[54].mxu1 %vm523_vm3, %v14490_v41  ;;  %v15677_v41 = vld [vmem:[#allocation45_spill] sm:$0xff] }
 0x6ac   : > { %11466 = vmatprep.mubr.msk.f32.mxu1 %vm523_vm3, %v14494_v6  ;;  %v15678_v6 = vld [vmem:[#allocation46_spill] sm:$0xff] }
 0x6af   : > { %11467 = vmatmul.mubr.msk.f32.gmra.mrb[56].mxu1 %vm523_vm3, %v14498_v40  ;;  %v15679_v40 = vld [vmem:[#allocation47_spill] sm:$0xff] }
 0x6b0   : > { %11469 = vmatprep.mubr.msk.f32.mxu1 %vm523_vm3, %v7421_v49  ;;  %v15706_v49 = vld [vmem:[#allocation13_spill] sm:$0xff] }
 0x6b3   : > { %11470 = vmatmul.mubr.msk.f32.gmra.mrb[58].mxu1 %vm523_vm3, %v7422_v62  ;;  %v15707_v62 = vld [vmem:[#allocation14_spill] sm:$0xff] }
 0x6b4   : > { %11480 = vmatprep.mubr.msk.f32.mxu1 %vm523_vm3, %v14516_v15  ;;  %v15680_v15 = vld [vmem:[#allocation61_spill] sm:$0xff] }
 0x6b7   : > { %11481 = vmatmul.mubr.msk.f32.vlgmr.msra.gmra.mrb[44].mxu1 %vm523_vm3, %v14520_v59  ;;  %v15681_v59 = vld [vmem:[#allocation63_spill] sm:$0xff] }
 0x6b8   : > { %11483 = vmatprep.mubr.msk.f32.mxu1 %vm523_vm3, %v14524_v25  ;;  %11775 = vmatpush3.bf16.msra.mxu1 %v11772_v1  ;;  %v15682_v25 = vld [vmem:[#allocation64_spill] sm:$0xff] }
 0x6b9   : > { %11777 = vmatprep.subr.bf16.mxu1 %v11776_v18  ;;  %v15705_v1 = vld [vmem:[#allocation12_spill] sm:$0xff] }
 0x6bb   : > { %11484 = vmatmul.mubr.msk.f32.gmra.mrb[46].mxu1 %vm523_vm3, %v14528_v33  ;;  %v15683_v33 = vld [vmem:[#allocation65_spill] sm:$0xff] }
 0x6bc   : > { %11486 = vmatprep.mubr.msk.f32.mxu1 %vm523_vm3, %v14532_v47  ;;  %11779 = vmatpush3.bf16.msra.mxu1 %v11776_v18  ;;  %v15684_v47 = vld [vmem:[#allocation67_spill] sm:$0xff]  ;;  %v15710_v18 = vld [vmem:[#allocation17_spill] sm:$0xff] }
 0x6bd   : > { %11781 = vmatprep.subr.bf16.mxu1 %v11780_v44 }
 0x6bf   : > { %11487 = vmatmul.mubr.msk.f32.gmra.mrb[48].mxu1 %vm523_vm3, %v14536_v8  ;;  %v15685_v8 = vld [vmem:[#allocation69_spill] sm:$0xff] }
 0x6c0   : > { %11489 = vmatprep.mubr.msk.f32.mxu1 %vm523_vm3, %v14540_v55  ;;  %v15686_v55 = vld [vmem:[#allocation48_spill] sm:$0xff] }
 0x6c3   : > { %11490 = vmatmul.mubr.msk.f32.gmra.mrb[50].mxu1 %vm523_vm3, %v14544_v31  ;;  %v7882_v31 = vld [vmem:[#allocation3 + $0x227] sm:$0xff] }
 0x6c4   : > { %11492 = vmatprep.mubr.msk.f32.mxu1 %vm523_vm3, %v14548_v39  ;;  %v15687_v39 = vld [vmem:[#allocation49_spill] sm:$0xff] }
 0x6c7   : > { %11493 = vmatmul.mubr.msk.f32.gmra.mrb[52].mxu1 %vm523_vm3, %v14552_v9  ;;  %v7883_v9 = vld [vmem:[#allocation3 + $0x22f] sm:$0xff] }
 0x6c8   : > { %11495 = vmatprep.mubr.msk.f32.mxu1 %vm523_vm3, %v14556_v21  ;;  %v9811_v21 = vld [vmem:[%s15321_s7 + $0x1d0] sm:$0xff] }
 0x6cb   : > { %11496 = vmatmul.mubr.msk.f32.gmra.mrb[54].mxu1 %vm523_vm3, %v14560_v19  ;;  %v9812_v19 = vld [vmem:[%s15321_s7 + $0x1d8] sm:$0xff] }
 0x6cc   : > { %11498 = vmatprep.mubr.msk.f32.mxu1 %vm523_vm3, %v14564_v38  ;;  %v15688_v38 = vld [vmem:[#allocation50_spill] sm:$0xff] }
 0x6cf   : > { %11499 = vmatmul.mubr.msk.f32.gmra.mrb[56].mxu1 %vm523_vm3, %v14568_v22  ;;  %v11792_v22 = vpack.c.bf16 %v9812_v19, %v9811_v21 }
 0x6d0   : > { %11501 = vmatprep.mubr.msk.f32.mxu1 %vm523_vm3, %v7651_v48  ;;  %v15714_v48 = vld [vmem:[#allocation21_spill] sm:$0xff] }
 0x6d3   : > { %11502 = vmatmul.mubr.msk.f32.gmra.mrb[58].mxu1 %vm523_vm3, %v7652_v27  ;;  %v8342_v27 = vld [vmem:[#allocation3 + $0x229] sm:$0xff] }
 0x6d4   : > { %11512 = vmatprep.mubr.msk.f32.mxu1 %vm523_vm3, %v15674_v50  ;;  %v15716_v50 = vld [vmem:[#allocation23_spill] sm:$0xff] }
 0x6d7   : > { %11513 = vmatmul.mubr.msk.f32.vlgmr.msra.gmra.mrb[44].mxu1 %vm523_vm3, %v15675_v23  ;;  %v15723_v23 = vld [vmem:[#allocation32_spill] sm:$0xff] }
 0x6d8   : > { %11515 = vmatprep.mubr.msk.f32.mxu1 %vm523_vm3, %v15676_v13  ;;  %11783 = vmatpush3.bf16.msra.mxu1 %v11780_v44  ;;  %v15713_v44 = vld [vmem:[#allocation20_spill] sm:$0xff] }
 0x6d9   : > { %11785 = vmatprep.subr.bf16.mxu1 %v11784_v58  ;;  %v15724_v13 = vld [vmem:[#allocation28_spill] sm:$0xff] }
 0x6db   : > { %11516 = vmatmul.mubr.msk.f32.gmra.mrb[46].mxu1 %vm523_vm3, %v15677_v41  ;;  %v8572_v41 = vld [vmem:[#allocation3 + $0x22a] sm:$0xff] }
 0x6dc   : > { %11518 = vmatprep.mubr.msk.f32.mxu1 %vm523_vm3, %v15678_v6  ;;  %11787 = vmatpush3.bf16.msra.mxu1 %v11784_v58  ;;  %v15717_v58 = vld [vmem:[#allocation24_spill] sm:$0xff]  ;;  %v15726_v6 = vld [vmem:[#allocation31_spill] sm:$0xff] }
 0x6dd   : > { %11789 = vmatprep.subr.bf16.mxu1 %v11788_v26 }
 0x6df   : > { %11519 = vmatmul.mubr.msk.f32.gmra.mrb[48].mxu1 %vm523_vm3, %v15679_v40  ;;  %v8573_v40 = vld [vmem:[#allocation3 + $0x232] sm:$0xff] }
 0x6e0   : > { %11521 = vmatprep.mubr.msk.f32.mxu1 %vm523_vm3, %v15680_v15  ;;  %v8788_v15 = vld [vmem:[%s15325_s11] sm:$0xff] }
 0x6e3   : > { %11522 = vmatmul.mubr.msk.f32.gmra.mrb[50].mxu1 %vm523_vm3, %v15681_v59 }
 0x6e4   : > { %11524 = vmatprep.mubr.msk.f32.mxu1 %vm523_vm3, %v15682_v25 }
 0x6e7   : > { %11525 = vmatmul.mubr.msk.f32.gmra.mrb[52].mxu1 %vm523_vm3, %v15683_v33 }
 0x6e8   : > { %11527 = vmatprep.mubr.msk.f32.mxu1 %vm523_vm3, %v15684_v47 }
 0x6eb   : > { %11528 = vmatmul.mubr.msk.f32.gmra.mrb[54].mxu1 %vm523_vm3, %v15685_v8 }
 0x6ec   : > { %11530 = vmatprep.mubr.msk.f32.mxu1 %vm523_vm3, %v15686_v55 }
 0x6ef   : > { %11531 = vmatmul.mubr.msk.f32.gmra.mrb[56].mxu1 %vm523_vm3, %v15687_v39 }
 0x6f0   : > { %11533 = vmatprep.mubr.msk.f32.mxu1 %vm523_vm3, %v7882_v31 }
 0x6f3   : > { %11534 = vmatmul.mubr.msk.f32.gmra.mrb[58].mxu1 %vm523_vm3, %v7883_v9 }
 0x6f4   : > { %11544 = vmatprep.mubr.msk.f32.mxu1 %vm523_vm3, %v15688_v38 }
 0x6f7   : > { %11545 = vmatmul.mubr.msk.f32.vlgmr.msra.gmra.mrb[44].mxu1 %vm523_vm3, %v15689_v7 }
 0x6f8   : > { %11547 = vmatprep.mubr.msk.f32.mxu1 %vm523_vm3, %v15690_v45  ;;  %11791 = vmatpush3.bf16.msra.mxu1 %v11788_v26  ;;  %v15725_v26 = vld [vmem:[#allocation34_spill] sm:$0xff] }
 0x6f9   : > { %11793 = vmatprep.subr.bf16.mxu1 %v11792_v22 }
 0x6fb   : > { %11548 = vmatmul.mubr.msk.f32.gmra.mrb[46].mxu1 %vm523_vm3, %v15691_v51 }
 0x6fc   : > { %11550 = vmatprep.mubr.msk.f32.mxu1 %vm523_vm3, %v15692_v54  ;;  %11795 = vmatpush3.bf16.msra.mxu1 %v11792_v22 }
 0x6fd   : > { %11797 = vmatprep.subr.bf16.mxu1 %v11796_v61 }
 0x6ff   : > { %11551 = vmatmul.mubr.msk.f32.gmra.mrb[48].mxu1 %vm523_vm3, %v15693_v12 }
 0x700   : > { %11553 = vmatprep.mubr.msk.f32.mxu1 %vm523_vm3, %v15694_v60 }
 0x703   : > { %11554 = vmatmul.mubr.msk.f32.gmra.mrb[50].mxu1 %vm523_vm3, %v15695_v14 }
 0x704   : > { %11556 = vmatprep.mubr.msk.f32.mxu1 %vm523_vm3, %v15696_v4 }
 0x707   : > { %11557 = vmatmul.mubr.msk.f32.gmra.mrb[52].mxu1 %vm523_vm3, %v15697_v42  ;;  %v8789_v42 = vld [vmem:[%s15325_s11 + $0x8] sm:$0xff] }
 0x708   : > { %11559 = vmatprep.mubr.msk.f32.mxu1 %vm523_vm3, %v15698_v34  ;;  %v8790_v34 = vld [vmem:[%s15325_s11 + $0x10] sm:$0xff] }
 0x70b   : > { %11560 = vmatmul.mubr.msk.f32.gmra.mrb[54].mxu1 %vm523_vm3, %v15699_v36  ;;  %v8791_v36 = vld [vmem:[%s15325_s11 + $0x18] sm:$0xff] }
 0x70c   : > { %11562 = vmatprep.mubr.msk.f32.mxu1 %vm523_vm3, %v15700_v3  ;;  %v8792_v3 = vld [vmem:[%s15325_s11 + $0x20] sm:$0xff] }
 0x70f   : > { %11563 = vmatmul.mubr.msk.f32.gmra.mrb[56].mxu1 %vm523_vm3, %v15701_v20  ;;  %v8794_v20 = vld [vmem:[%s15325_s11 + $0x30] sm:$0xff] }
 0x710   : > { %11565 = vmatprep.mubr.msk.f32.mxu1 %vm523_vm3, %v8112_v43  ;;  %v8793_v43 = vld [vmem:[%s15325_s11 + $0x28] sm:$0xff] }
 0x713   : > { %11566 = vmatmul.mubr.msk.f32.gmra.mrb[58].mxu1 %vm523_vm3, %v8113_v11  ;;  %v8795_v11 = vld [vmem:[%s15325_s11 + $0x38] sm:$0xff] }
 0x714   : > { %11576 = vmatprep.mubr.msk.f32.mxu1 %vm523_vm3, %v15702_v0 }
 0x717   : > { %11577 = vmatmul.mubr.msk.f32.vlgmr.msra.gmra.mrb[44].mxu1 %vm523_vm3, %v15703_v35 }
 0x718   : > { %11579 = vmatprep.mubr.msk.f32.mxu1 %vm523_vm3, %v15704_v16  ;;  %11799 = vmatpush3.bf16.msra.mxu1 %v11796_v61 }
 0x719   : > { %11801 = vmatprep.subr.bf16.mxu1 %v11800_v63 }
 0x71b   : > { %11580 = vmatmul.mubr.msk.f32.gmra.mrb[46].mxu1 %vm523_vm3, %v15705_v1 }
 0x71c   : > { %11582 = vmatprep.mubr.msk.f32.mxu1 %vm523_vm3, %v15706_v49  ;;  %11803 = vmatpush3.bf16.msra.mxu1 %v11800_v63 }
 0x71f   : > { %11583 = vmatmul.mubr.msk.f32.gmra.mrb[48].mxu1 %vm523_vm3, %v15707_v62 }
 0x720   : > { %11585 = vmatprep.mubr.msk.f32.mxu1 %vm523_vm3, %v15708_v57 }
 0x723   : > { %11586 = vmatmul.mubr.msk.f32.gmra.mrb[50].mxu1 %vm523_vm3, %v15709_v2 }
 0x724   : > { %11588 = vmatprep.mubr.msk.f32.mxu1 %vm523_vm3, %v15710_v18 }
 0x727   : > { %11589 = vmatmul.mubr.msk.f32.gmra.mrb[52].mxu1 %vm523_vm3, %v15711_v29 }
 0x728   : > { %11591 = vmatprep.mubr.msk.f32.mxu1 %vm523_vm3, %v15712_v52 }
 0x72b   : > { %11592 = vmatmul.mubr.msk.f32.gmra.mrb[54].mxu1 %vm523_vm3, %v15713_v44 }
 0x72c   : > { %11594 = vmatprep.mubr.msk.f32.mxu1 %vm523_vm3, %v15714_v48 }
 0x72f   : > { %11595 = vmatmul.mubr.msk.f32.gmra.mrb[56].mxu1 %vm523_vm3, %v14778_v56  ;;  %v15718_v56 = vld [vmem:[#allocation25_spill] sm:$0xff] }
 0x730   : > { %11597 = vmatprep.mubr.msk.f32.mxu1 %vm523_vm3, %v8342_v27 }
 0x733   : > { %11598 = vmatmul.mubr.msk.f32.gmra.mrb[58].mxu1 %vm523_vm3, %v8343_v10 }
 0x734   : > { %11608 = vmatprep.mubr.msk.f32.mxu1 %vm523_vm3, %v14796_v24  ;;  %v15721_v24 = vld [vmem:[#allocation29_spill] sm:$0xff] }
 0x737   : > { %11609 = vmatmul.mubr.msk.f32.vlgmr.msra.gmra.mrb[44].mxu1 %vm523_vm3, %v14800_v30  ;;  %v15722_v30 = vld [vmem:[#allocation30_spill] sm:$0xff] }
 0x738   : > { %11611 = vmatprep.mubr.msk.f32.mxu1 %vm523_vm3, %v15715_v32 }
 0x73b   : > { %11612 = vmatmul.mubr.msk.f32.gmra.mrb[46].mxu1 %vm523_vm3, %v15716_v50 }
 0x73c   : > { %11614 = vmatprep.mubr.msk.f32.mxu1 %vm523_vm3, %v15717_v58 }
 0x73f   : > { %11615 = vmatmul.mubr.msk.f32.gmra.mrb[48].mxu1 %vm523_vm3, %v15718_v56 }
 0x740   : > { %11617 = vmatprep.mubr.msk.f32.mxu1 %vm523_vm3, %v15719_v17 }
 0x743   : > { %11618 = vmatmul.mubr.msk.f32.gmra.mrb[50].mxu1 %vm523_vm3, %v15720_v28 }
 0x744   : > { %11620 = vmatprep.mubr.msk.f32.mxu1 %vm523_vm3, %v15721_v24 }
 0x747   : > { %11621 = vmatmul.mubr.msk.f32.gmra.mrb[52].mxu1 %vm523_vm3, %v15722_v30 }
 0x748   : > { %11623 = vmatprep.mubr.msk.f32.mxu1 %vm523_vm3, %v15723_v23 }
 0x74b   : > { %11624 = vmatmul.mubr.msk.f32.gmra.mrb[54].mxu1 %vm523_vm3, %v15724_v13 }
 0x74c   : > { %11626 = vmatprep.mubr.msk.f32.mxu1 %vm523_vm3, %v15725_v26 }
 0x74f   : > { %11627 = vmatmul.mubr.msk.f32.gmra.mrb[56].mxu1 %vm523_vm3, %v15726_v6 }
 0x750   : > { %11629 = vmatprep.mubr.msk.f32.mxu1 %vm523_vm3, %v8572_v41 }
 0x753   : > { %11630 = vmatmul.mubr.msk.f32.gmra.mrb[58].mxu1 %vm523_vm3, %v8573_v40 }
 0x754   : > { %11664 = vmatprep.mubr.f32.mxu1 %v8788_v15 }
 0x80a   : > { %v11610_v59 = vpop.f32.mrb[44].mxu1 }
 0x80b   : > { %v8693_v25 = vpop.f32.mrb[45].mxu1 }
 0x80c   : > { %v11804_v33 = vpack.c.bf16 %v11610_v59, %v8693_v25 }
 0x80e   : > { %v11613_v47 = vpop.f32.mrb[46].mxu1  ;;  %11805 = vmatprep.subr.bf16.mxu1 %v11804_v33 }
 0x80f   : > { %v8703_v8 = vpop.f32.mrb[47].mxu1  ;;  %11807 = vmatpush3.bf16.msra.mxu1 %v11804_v33 }
 0x810   : > { %v11808_v55 = vpack.c.bf16 %v11613_v47, %v8703_v8 }
 0x812   : > { %v11616_v31 = vpop.f32.mrb[48].mxu1  ;;  %11809 = vmatprep.subr.bf16.mxu1 %v11808_v55 }
 0x813   : > { %v8713_v39 = vpop.f32.mrb[49].mxu1  ;;  %11811 = vmatpush3.bf16.msra.mxu1 %v11808_v55 }
 0x814   : > { %v11812_v9 = vpack.c.bf16 %v11616_v31, %v8713_v39 }
 0x816   : > { %v11619_v21 = vpop.f32.mrb[50].mxu1  ;;  %11813 = vmatprep.subr.bf16.mxu1 %v11812_v9 }
 0x817   : > { %v8723_v19 = vpop.f32.mrb[51].mxu1  ;;  %11815 = vmatpush3.bf16.msra.mxu1 %v11812_v9 }
 0x818   : > { %v11816_v38 = vpack.c.bf16 %v11619_v21, %v8723_v19 }
 0x81a   : > { %v11622_v22 = vpop.f32.mrb[52].mxu1  ;;  %11817 = vmatprep.subr.bf16.mxu1 %v11816_v38 }
 0x81b   : > { %v8733_v37 = vpop.f32.mrb[53].mxu1  ;;  %11819 = vmatpush3.bf16.msra.mxu1 %v11816_v38 }
 0x81c   : > { %v11820_v5 = vpack.c.bf16 %v11622_v22, %v8733_v37 }
 0x81e   : > { %v11625_v7 = vpop.f32.mrb[54].mxu1  ;;  %11821 = vmatprep.subr.bf16.mxu1 %v11820_v5 }
 0x81f   : > { %v8743_v45 = vpop.f32.mrb[55].mxu1  ;;  %11823 = vmatpush3.bf16.msra.mxu1 %v11820_v5 }
 0x820   : > { %v11824_v61 = vpack.c.bf16 %v11625_v7, %v8743_v45 }
 0x822   : > { %v11628_v51 = vpop.f32.mrb[56].mxu1  ;;  %11825 = vmatprep.subr.bf16.mxu1 %v11824_v61 }
 0x823   : > { %v8753_v54 = vpop.f32.mrb[57].mxu1  ;;  %11827 = vmatpush3.bf16.msra.mxu1 %v11824_v61 }
 0x824   : > { %v11828_v12 = vpack.c.bf16 %v11628_v51, %v8753_v54 }
 0x826   : > { %v11631_v60 = vpop.f32.mrb[58].mxu1  ;;  %11829 = vmatprep.subr.bf16.mxu1 %v11828_v12 }
 0x827   : > { %v8763_v14 = vpop.f32.mrb[59].mxu1  ;;  %11831 = vmatpush3.bf16.msra.mxu1 %v11828_v12 }
 0x828   : > { %v11832_v4 = vpack.c.bf16 %v11631_v60, %v8763_v14 }
 0x82a   : > { %11833 = vmatprep.subr.bf16.mxu1 %v11832_v4 }
 0x82b   : > { %11835 = vmatpush3.bf16.msra.mxu1 %v11832_v4 }
 0x82e   : > { %11665 = vmatmul.mubr.f32.vlgmr.msra.gmra.mrb[60].mxu1 %v8789_v42 }
 0x82f   : > { %11667 = vmatprep.mubr.f32.mxu1 %v8790_v34 }
 0x832   : > { %11668 = vmatmul.mubr.f32.gmra.mrb[62].mxu1 %v8791_v36 }
 0x833   : > { %11670 = vmatprep.mubr.f32.mxu1 %v8792_v3 }
 0x836   : > { %11671 = vmatmul.mubr.f32.gmra.mrb[64].mxu1 %v8793_v43 }
 0x837   : > { %11673 = vmatprep.mubr.f32.mxu1 %v8794_v20 }
 0x83a   : > { %11674 = vmatmul.mubr.f32.gmra.mrb[66].mxu1 %v8795_v11 }
 0x83b   : > { %12397 = shalt.err (!%p12394_p3)
}
 0x83c   : > { %s12398_s20 = scalar_lea.hbm %s15196_s3, 4096  ;;  %s12402_s23 = scalar_lea.hbm %s15326_s12, 8192 }
 0x83d   : > { %p12399_p4 = scmp.ne.s32.totalorder %s15196_s3, %s12398_s20  ;;  %p12403_p9 = scmp.lt.u32.totalorder %s15196_s3, %s15326_s12 }
 0x83e   : > { %p12404_p10 = scmp.lt.u32.totalorder %s12402_s23, %s12398_s20  ;;  %p12406_p12 = scmp.lt.u32.totalorder %s12398_s20, %s15196_s3 }
 0x83f   : > { %p12400_p7 = pnand %p12399_p4, %p12594_p5 }
 0x840   : > { %p12405_p11 = por %p12404_p10, %p12403_p9 }
 0x841   : > { %p12401_p8 = pneg %p12400_p7 }
 0x842   : > { %p12407_p13 = por %p12406_p12, %p12405_p11 }
 0x844   : > { %p12408_p0 = pnand %p12407_p13, %p12401_p8 }
 0x846   : > { %12411 = shalt.err (!%p12408_p0)
}
 0x847   : > { %s12483_s16 = smov 128   ;;  %s12484_s0 = smov 8   ;;  %v9849_v46 = vld [vmem:[%s15322_s8] ss:$0 sm:$0xff] }
 0x848   : > { %12334 = dma.vmem_to_hbm [thread:$0]  (%p12594_p5), %s15199_s4, 4096, %s15196_s3, %s9033_s30, %s12483_s16, %s12483_s16, %s12484_s0  }
 0x849   : > { %s9166_s3 = sshll.u32 %s14146_s15, 6  ;;  %s9862_s23 = sshll.u32 %s12577_s29, 10 }
 0x84a   : > { %s444_s24 = scalar_lea.vmem [#allocation6], %s9166_s3  ;;  %s15260_s21 = scalar_lea.hbm %s15327_s13, %s9862_s23 }
 0x84b   : > { %s9067_s2 = sshll.u32 %s444_s24, 4  ;;  %s9038_s3 = scalar_lea.sflag [#allocation7], %s14146_s15  ;;  %s15262_s2 = int_to_ptr.vmem [resolvable:$true] %s9067_s2 }
 0x84c   : > { %s12412_s4 = scalar_lea.vmem %s15262_s2, 1024  ;;  %s12485_s30 = smov [#allocation6]  }
 0x84d   : > { %p12413_p1 = scmp.ne.s32.totalorder %s15262_s2, %s12412_s4  ;;  %s12416_s20 = sshll.u32 %s12485_s30, 4  ;;  %s12417_s20 = int_to_ptr.vmem [resolvable:$false] %s12416_s20 }
 0x84e   : > { %s12418_s22 = scalar_lea.vmem %s12417_s20, 2048  ;;  %p12419_p4 = scmp.lt.s32.totalorder %s15262_s2, %s12417_s20 }
 0x84f   : > { %p12414_p2 = pnand %p12413_p1, %p12594_p5  ;;  %p12420_p7 = scmp.lt.s32.totalorder %s12418_s22, %s12412_s4 }
 0x851   : > { %p12415_p3 = pneg %p12414_p2  ;;  %p12421_p8 = por %p12420_p7, %p12419_p4 }
 0x853   : > { %p12422_p9 = pnand %p12421_p8, %p12415_p3 }
 0x901   : > { %v11666_v53 = vpop.f32.mrb[60].mxu1 }
 0x902   : > { %v8875_v0 = vadd.f32 %v11666_v53, %v9849_v46  ;;  %v8869_v63 = vpop.f32.mrb[61].mxu1 }
 0x903   : > { %v8870_v35 = vadd.f32 %v9849_v46, %v8869_v63 }
 0x904   : > { %v8909_v16 = vsel %vm523_vm3, %v8875_v0, 0.0 }
 0x905   : > { %v8908_v1 = vsel %vm523_vm3, %v8870_v35, 0.0  ;;  %v11669_v49 = vpop.f32.mrb[62].mxu1 }
 0x906   : > { %v8910_v62 = vadd.f32 %v8909_v16, %v8908_v1  ;;  %v8879_v57 = vpop.f32.mrb[63].mxu1  ;;  %v8885_v2 = vadd.f32 %v11669_v49, %v9849_v46 }
 0x907   : > { %v8880_v18 = vadd.f32 %v9849_v46, %v8879_v57 }
 0x908   : > { %v8913_v27 = vsel %vm523_vm3, %v8885_v2, 0.0 }
 0x909   : > { %v8911_v29 = vsel %vm523_vm3, %v8880_v18, 0.0  ;;  %v11672_v52 = vpop.f32.mrb[64].mxu1 }
 0x90a   : > { %v8912_v44 = vadd.f32 %v8911_v29, %v8910_v62  ;;  %v8889_v48 = vpop.f32.mrb[65].mxu1  ;;  %v8895_v10 = vadd.f32 %v11672_v52, %v9849_v46 }
 0x90b   : > { %v8890_v32 = vadd.f32 %v9849_v46, %v8889_v48  ;;  %v9850_v48 = vld [vmem:[%s15323_s9] ss:$0 sm:$0xff] }
 0x90c   : > { %v8914_v50 = vadd.f32 %v8913_v27, %v8912_v44  ;;  %v8917_v24 = vsel %vm523_vm3, %v8895_v10, 0.0 }
 0x90d   : > { %v8915_v58 = vsel %vm523_vm3, %v8890_v32, 0.0  ;;  %v11675_v56 = vpop.f32.mrb[66].mxu1 }
 0x90e   : > { %v8916_v17 = vadd.f32 %v8915_v58, %v8914_v50  ;;  %v8899_v28 = vpop.f32.mrb[67].mxu1  ;;  %v8905_v30 = vadd.f32 %v11675_v56, %v9849_v46 }
 0x90f   : > { %v8900_v23 = vadd.f32 %v9849_v46, %v8899_v28 }
 0x910   : > { %v8918_v13 = vadd.f32 %v8917_v24, %v8916_v17  ;;  %v8921_v6 = vsel %vm523_vm3, %v8905_v30, 0.0  ;;  %v9851_v24 = vld [vmem:[%s15324_s10] ss:$0 sm:$0xff] }
 0x911   : > { %v8919_v26 = vsel %vm523_vm3, %v8900_v23, 0.0 }
 0x912   : > { %v8920_v41 = vadd.f32 %v8919_v26, %v8918_v13 }
 0x914   : > { %v8922_v40 = vadd.f32 %v8921_v6, %v8920_v41 }
 0x916   : > { %v8923_v15 = vrot.slane %v8922_v40, 4 }
 0x918   : > { %v8924_v59 = vadd.f32 %v8923_v15, %v8922_v40 }
 0x91a   : > { %v8925_v25 = vrot.slane %v8924_v59, 2 }
 0x91c   : > { %v8926_v33 = vadd.f32 %v8925_v25, %v8924_v59 }
 0x91e   : > { %v8927_v47 = vrot.slane %v8926_v33, 1 }
 0x920   : > { %v8928_v8 = vadd.f32 %v8927_v47, %v8926_v33 }
 0x922   : > { %v8929_v55 = vmul.f32 0.015625, %v8928_v8 }
 0x924   : > { %v8930_v31 = vsub.f32 %v8870_v35, %v8929_v55  ;;  %v8931_v39 = vsub.f32 %v8875_v0, %v8929_v55  ;;  %v8932_v9 = vsub.f32 %v8880_v18, %v8929_v55  ;;  %v8933_v21 = vsub.f32 %v8885_v2, %v8929_v55 }
 0x925   : > { %v8934_v19 = vsub.f32 %v8890_v32, %v8929_v55  ;;  %v8935_v38 = vsub.f32 %v8895_v10, %v8929_v55  ;;  %v8936_v22 = vsub.f32 %v8900_v23, %v8929_v55  ;;  %v8937_v37 = vsub.f32 %v8905_v30, %v8929_v55 }
 0x926   : > { %v8938_v5 = vmul.f32 %v8930_v31, %v8930_v31  ;;  %v8939_v7 = vmul.f32 %v8931_v39, %v8931_v39  ;;  %v8940_v45 = vmul.f32 %v8932_v9, %v8932_v9  ;;  %v8941_v61 = vmul.f32 %v8933_v21, %v8933_v21 }
 0x927   : > { %v8942_v60 = vmul.f32 %v8934_v19, %v8934_v19  ;;  %v8943_v42 = vmul.f32 %v8935_v38, %v8935_v38  ;;  %v8944_v3 = vmul.f32 %v8936_v22, %v8936_v22  ;;  %v8945_v11 = vmul.f32 %v8937_v37, %v8937_v37 }
 0x928   : > { %v8946_v51 = vsel %vm523_vm3, %v8938_v5, 0.0  ;;  %v8947_v54 = vsel %vm523_vm3, %v8939_v7, 0.0  ;;  %v8949_v14 = vsel %vm523_vm3, %v8940_v45, 0.0  ;;  %v8951_v34 = vsel %vm523_vm3, %v8941_v61, 0.0 }
 0x929   : > { %v8948_v12 = vadd.f32 %v8947_v54, %v8946_v51  ;;  %v8953_v43 = vsel %vm523_vm3, %v8942_v60, 0.0  ;;  %v8955_v46 = vsel %vm523_vm3, %v8943_v42, 0.0  ;;  %v8957_v0 = vsel %vm523_vm3, %v8944_v3, 0.0 }
 0x92a   : > { %v8959_v35 = vsel %vm523_vm3, %v8945_v11, 0.0 }
 0x92b   : > { %v8950_v4 = vadd.f32 %v8949_v14, %v8948_v12 }
 0x92d   : > { %v8952_v36 = vadd.f32 %v8951_v34, %v8950_v4 }
 0x92f   : > { %v8954_v20 = vadd.f32 %v8953_v43, %v8952_v36 }
 0x931   : > { %v8956_v53 = vadd.f32 %v8955_v46, %v8954_v20 }
 0x933   : > { %v8958_v63 = vadd.f32 %v8957_v0, %v8956_v53 }
 0x935   : > { %v8960_v16 = vadd.f32 %v8959_v35, %v8958_v63 }
 0x937   : > { %v8961_v1 = vrot.slane %v8960_v16, 4 }
 0x939   : > { %v8962_v49 = vadd.f32 %v8961_v1, %v8960_v16 }
 0x93b   : > { %v8963_v62 = vrot.slane %v8962_v49, 2 }
 0x93d   : > { %v8964_v57 = vadd.f32 %v8963_v62, %v8962_v49 }
 0x93f   : > { %v8965_v2 = vrot.slane %v8964_v57, 1 }
 0x941   : > { %v8966_v18 = vadd.f32 %v8965_v2, %v8964_v57 }
 0x943   : > { %v8967_v29 = vmul.f32 0.015625, %v8966_v18 }
 0x945   : > { %v8968_v52 = vadd.f32 1e-05, %v8967_v29 }
 0x947   : > { %12382 = vrsqrt.f32 %v8968_v52 }
 0x951   : > { %v12383_v44 = vpop.eup %12382 }
 0x952   : > { %v8970_v27 = vmul.f32 %v12383_v44, %v8930_v31  ;;  %v8971_v10 = vmul.f32 %v12383_v44, %v8931_v39  ;;  %v8972_v32 = vmul.f32 %v12383_v44, %v8932_v9  ;;  %v8973_v50 = vmul.f32 %v12383_v44, %v8933_v21 }
 0x953   : > { %v8974_v58 = vmul.f32 %v12383_v44, %v8934_v19  ;;  %v8975_v56 = vmul.f32 %v12383_v44, %v8935_v38  ;;  %v8976_v17 = vmul.f32 %v12383_v44, %v8936_v22  ;;  %v8977_v28 = vmul.f32 %v12383_v44, %v8937_v37 }
 0x954   : > { %v8985_v30 = vmul.f32 %v9850_v48, %v8970_v27  ;;  %v8986_v23 = vmul.f32 %v9850_v48, %v8971_v10  ;;  %v8987_v13 = vmul.f32 %v9850_v48, %v8972_v32  ;;  %v8988_v26 = vmul.f32 %v9850_v48, %v8973_v50 }
 0x955   : > { %v8989_v41 = vmul.f32 %v9850_v48, %v8974_v58  ;;  %v8990_v6 = vmul.f32 %v9850_v48, %v8975_v56  ;;  %v8991_v40 = vmul.f32 %v9850_v48, %v8976_v17  ;;  %v8992_v15 = vmul.f32 %v9850_v48, %v8977_v28 }
 0x956   : > { %v9000_v59 = vadd.f32 %v9851_v24, %v8985_v30  ;;  %v9001_v25 = vadd.f32 %v9851_v24, %v8986_v23  ;;  %v9002_v33 = vadd.f32 %v9851_v24, %v8987_v13  ;;  %v9003_v47 = vadd.f32 %v9851_v24, %v8988_v26 }
 0x957   : > { %v9004_v8 = vadd.f32 %v9851_v24, %v8989_v41  ;;  %v9005_v55 = vadd.f32 %v9851_v24, %v8990_v6  ;;  %v9006_v31 = vadd.f32 %v9851_v24, %v8991_v40  ;;  %v9007_v39 = vadd.f32 %v9851_v24, %v8992_v15 }
 0x958   : > { %v9008_v9 = vmul.f32 0.1, %v9000_v59  ;;  %v9009_v21 = vmul.f32 0.1, %v9001_v25  ;;  %v9010_v19 = vmul.f32 0.1, %v9002_v33 }
 0x959   : > { %v9011_v38 = vmul.f32 0.1, %v9003_v47  ;;  %v9012_v22 = vmul.f32 0.1, %v9004_v8  ;;  %v9013_v37 = vmul.f32 0.1, %v9005_v55 }
 0x95a   : > { %v9014_v5 = vmul.f32 0.1, %v9006_v31  ;;  %v9015_v7 = vmul.f32 0.1, %v9007_v39  ;;  %v9016_v45 = vmax.f32 %v9000_v59, %v9008_v9  ;;  %v9017_v61 = vmax.f32 %v9001_v25, %v9009_v21 }
 0x95b   : > { %v9018_v51 = vmax.f32 %v9002_v33, %v9010_v19  ;;  %v9019_v54 = vmax.f32 %v9003_v47, %v9011_v38  ;;  %v9020_v12 = vmax.f32 %v9004_v8, %v9012_v22  ;;  %v9021_v60 = vmax.f32 %v9005_v55, %v9013_v37 }
 0x95c   : > { %v9022_v14 = vmax.f32 %v9006_v31, %v9014_v5  ;;  %v9023_v4 = vmax.f32 %v9007_v39, %v9015_v7  ;;  %9024 = vst.msk [vmem:[%s444_s24] sm:$0xff] %vm523_vm3, %v9016_v45  ;;  %9025 = vst.msk [vmem:[%s444_s24 + $0x8] sm:$0xff] %vm523_vm3, %v9017_v61 }
 0x95d   : > { %9026 = vst.msk [vmem:[%s444_s24 + $0x10] sm:$0xff] %vm523_vm3, %v9018_v51  ;;  %9027 = vst.msk [vmem:[%s444_s24 + $0x18] sm:$0xff] %vm523_vm3, %v9019_v54 }
 0x95e   : > { %9028 = vst.msk [vmem:[%s444_s24 + $0x20] sm:$0xff] %vm523_vm3, %v9020_v12  ;;  %9029 = vst.msk [vmem:[%s444_s24 + $0x28] sm:$0xff] %vm523_vm3, %v9021_v60 }
 0x95f   : > { %9030 = vst.msk [vmem:[%s444_s24 + $0x30] sm:$0xff] %vm523_vm3, %v9022_v14  ;;  %9031 = vst.msk [vmem:[%s444_s24 + $0x38] sm:$0xff] %vm523_vm3, %v9023_v4 }
 0x960   : > { %12425 = shalt.err (!%p12422_p9)
}
 0x961   : > { %s12426_s23 = scalar_lea.hbm %s15260_s21, 1024  ;;  %s12430_s1 = scalar_lea.hbm %s15327_s13, 2048 }
 0x962   : > { %p12427_p10 = scmp.ne.s32.totalorder %s15260_s21, %s12426_s23  ;;  %p12431_p13 = scmp.lt.u32.totalorder %s15260_s21, %s15327_s13 }
 0x963   : > { %p12432_p0 = scmp.lt.u32.totalorder %s12430_s1, %s12426_s23  ;;  %p12434_p2 = scmp.lt.u32.totalorder %s12426_s23, %s15260_s21 }
 0x964   : > { %p12428_p11 = pnand %p12427_p10, %p12594_p5 }
 0x965   : > { %p12433_p1 = por %p12432_p0, %p12431_p13 }
 0x966   : > { %p12429_p12 = pneg %p12428_p11 }
 0x967   : > { %p12435_p3 = por %p12434_p2, %p12433_p1 }
 0x969   : > { %p12436_p4 = pnand %p12435_p3, %p12429_p12 }
 0x96b   : > { %12439 = shalt.err (!%p12436_p4)
}
 0x96c   : > { %12335 = dma.vmem_to_hbm [thread:$0]  (%p12594_p5), %s15262_s2, 1024, %s15260_s21, %s9038_s3, %s12483_s16, %s12483_s16, %s12484_s0  }
 0x96d PF: > { %p12345_p7 = scmp.ge.s32.totalorder %s12478_s28, 2  ;;  %s9082_s4 = sand.u32 1, %s12466_s25  }
 0x96e   : > { %s9083_s22 = scalar_lea.sflag [#allocation5], %s9082_s4 }
 0x96f   : > { %p12339_p8 = pnand %p12345_p7, %p12598_p6 }
 0x971   : > { %12457 = dma.done.wait (!%p12339_p8), %s9083_s22, 4096  }
 0x972   : > { %12459 = vsyncadd (!%p12339_p8), %s9083_s22, 4294963200  ;;  %s9092_s18 = scalar_lea.sflag [#allocation7], %s9082_s4 }
 0x973   : > { %12461 = dma.done.wait (!%p12339_p8), %s9092_s18, 1024  }
 0x974   : > { %12463 = vsyncadd (!%p12339_p8), %s9092_s18, 4294966272  ;;  %p27_p5 = scmp.ge.s32.totalorder %s12581_s14, 4   ;;  %s15727_s25 = smov %s12470_s26 }
 0x975   : > { %s15728_s26 = smov %s12474_s27  ;;  %s15729_s27 = smov %s12592_s17 }
 0x976   : > { %s15730_s28 = smov %s12581_s14  ;;  %29 = sbr.rel (!%p27_p5) target bundleno = 11 (0xb), region = 148 }
 0x97d   :  { %9097 = vsyncpa [#allocation5], 1 }
 0x97e   :  { %9099 = vsyncpa [#allocation5 + $0x1], 1 }
 0x97f   :  { %9100 = vsyncpa [#allocation7], 1 }
 0x980   :  { %9102 = vsyncpa [#allocation7 + $0x1], 1 }

</bundles_post_ra>
